<compile_context>
chip_gen: v5e
topology: v5e:2x2
jax: 0.10.0
libtpu: 0.0.40
codegen_flags: <defaults>
</compile_context>

<pallas_src>
import functools
import math

import jax
import jax.numpy as jnp
import numpy as np
from jax import lax
from jax.experimental import pallas as pl
from jax.experimental.pallas import tpu as pltpu

ALPHA = 0.2            # opt['leakey']
LANE = 128             # TPU lane width: all feature/hidden dims padded to this

# Constant sigma_2 = clamp(exp(0.1 + 0.9 * softplus(1.0)), 0.1, 5) KLD terms.
_SOFTPLUS_ONE = math.log1p(math.exp(1.0))
_SIGMA2 = min(max(math.exp(0.1 + 0.9 * _SOFTPLUS_ONE), 0.1), 5.0)
_LOG_SIGMA2 = math.log(_SIGMA2)
_INV_2SIGMA2SQ = 1.0 / (2.0 * _SIGMA2 * _SIGMA2)
_LOG_01 = math.log(0.1)
_LOG_5 = math.log(5.0)

# Weight-slab column offsets (all multiples of 128 -> aligned, zero-cost views).
_W_CROSS = slice(0, 128)       # gc3 / gc4                       (F -> H)
_W_SELF1 = slice(128, 256)     # gc1 / gc2                       (F -> H)
_W_UNION_A = slice(256, 384)   # user/item_union half on the self-GCN output
_W_UNION_B = slice(384, 512)   # user/item_union half on the cross-GCN output
_W_SELF2 = slice(512, 640)     # gc5 / gc6                       (F -> H)
_W_ML = slice(640, 896)        # [gc*_mean | gc*_logstd] packed  (H -> 2*128)
_W_HEAD_X = slice(896, 1152)   # x_self half of [union_1 | union_2] packed

# Bias-slab column offsets.
_B_CROSS = slice(0, 128)
_B_SELF1 = slice(128, 256)
_B_UNION = slice(256, 384)
_B_SELF2 = slice(384, 512)
_B_ML = slice(512, 768)
_B_HEADS = slice(768, 1024)


# ------------------------------------------------------------------ kernel ---

def _last_layer_kernel(x_self_ref, x_cross_ref, adj_self_ref, adj_cross_ref,
                       w_ref, bd_ref, b_ref, mean_ref, kld_ref,
                       *, alpha, f_dim, n_user, n_item):
    """Both user (idx 0) and item (idx 1) chains, fused in one body."""

    def gcn(x, adj, w, b):
        # LeakyReLU(adj @ (x @ W) + b, alpha); dropout = identity in eval mode.
        xw = jnp.dot(x, w, preferred_element_type=jnp.float32)
        h = jnp.dot(adj, xw, preferred_element_type=jnp.float32) + b
        return jnp.where(h > 0, h, alpha * h)

    def path(idx, n_valid):
        x_self = x_self_ref[idx]           # (N, 128)   ufea / vfea (zero padded)
        x_cross = x_cross_ref[idx]         # (N, 128)   vfea / ufea
        adj_s = adj_self_ref[idx]          # (N, N)     uu / vv
        adj_c = adj_cross_ref[idx]         # (N, N)     UV_adj / VU_adj

        ho1 = gcn(x_cross, adj_c, w_ref[idx, :, _W_CROSS], b_ref[idx, :, _B_CROSS])
        ho = gcn(x_self, adj_s, w_ref[idx, :, _W_SELF1], b_ref[idx, :, _B_SELF1])
        # nn.Linear(cat([ho, ho1])) with pre-split, pre-transposed weight halves.
        ho = (jnp.dot(ho, w_ref[idx, :, _W_UNION_A], preferred_element_type=jnp.float32)
              + jnp.dot(ho1, w_ref[idx, :, _W_UNION_B], preferred_element_type=jnp.float32)
              + b_ref[idx, :, _B_UNION])
        ho = gcn(ho, adj_s, w_ref[idx, :, _W_SELF2], b_ref[idx, :, _B_SELF2])
        # mean & logstd GCNs share input + adjacency -> one packed GCN (N, 256).
        ml = gcn(ho, adj_s, w_ref[idx, :, _W_ML], b_ref[idx, :, _B_ML])

        # Merged union_1/union_2 heads:
        # packed [mean | logstd] = ml @ blockdiag + x_self @ packed + packed bias.
        heads = (jnp.dot(ml, bd_ref[idx], preferred_element_type=jnp.float32)
                 + jnp.dot(x_self, w_ref[idx, :, _W_HEAD_X],
                           preferred_element_type=jnp.float32)
                 + b_ref[idx, :, _B_HEADS])                      # (N, 256)
        mean = heads[:, :LANE]
        logstd = heads[:, LANE:]
        mean_ref[idx] = mean               # eval mode: sampled_z = mean

        # Fused KLD: KL(N(mean, s1) || N(0, s2)).mean(dim=0).sum()
        sp = jnp.maximum(logstd, 0.0) + jnp.log1p(jnp.exp(-jnp.abs(logstd)))
        log_s1 = jnp.clip(0.1 + 0.9 * sp, _LOG_01, _LOG_5)  # == log(clamp(exp(.)))
        s1 = jnp.exp(log_s1)
        kl = _LOG_SIGMA2 - log_s1 + (s1 * s1 + mean * mean) * _INV_2SIGMA2SQ - 0.5
        # Mask padded rows (nodes >= n_valid) AND padded lanes (cols >= f_dim).
        rows = lax.broadcasted_iota(jnp.int32, kl.shape, 0)
        cols = lax.broadcasted_iota(jnp.int32, kl.shape, 1)
        kl = jnp.where((rows < n_valid) & (cols < f_dim), kl, 0.0)
        kl = jnp.sum(jnp.sum(kl, axis=1, keepdims=True), axis=0, keepdims=True)
        return kl * (1.0 / n_valid)

    kld_user = path(0, n_user)
    kld_item = path(1, n_item)
    kld_ref[...] = kld_user + kld_item


# ---------------------------------------------------- one-time packing helpers

def _pad2d(a, rows, cols):
    return jnp.pad(a, ((0, rows - a.shape[0]), (0, cols - a.shape[1])))


def _padw(w):
    return _pad2d(w, LANE, LANE)


def _padb(b):
    return jnp.pad(b, (0, LANE - b.shape[0]))


def _pack_one_path(p, g_cross, g_self1, g_self2, g_mean, g_logstd,
                   l_union, l_head1, l_head2, f):
    # GCN weights are stored (in, out); nn.Linear weights are torch (out, in).
    w_u = p[l_union + "_w"]
    w_1 = p[l_head1 + "_w"]
    w_2 = p[l_head2 + "_w"]
    wslab = jnp.concatenate([
        _padw(p[g_cross + "_w"]),
        _padw(p[g_self1 + "_w"]),
        _padw(w_u[:, :f].T),           # union half on the self-GCN output
        _padw(w_u[:, f:].T),           # union half on the cross-GCN output
        _padw(p[g_self2 + "_w"]),
        _padw(p[g_mean + "_w"]),       # ml packed: mean lanes ...
        _padw(p[g_logstd + "_w"]),     # ... then logstd lanes
        _padw(w_1[:, f:].T),           # head_x packed: x_self -> mean lanes ...
        _padw(w_2[:, f:].T),           # ... x_self -> logstd lanes
    ], axis=1)                                           # (128, 1152)

    bd = jnp.zeros((2 * LANE, 2 * LANE), jnp.float32)    # block-diag head weight
    bd = bd.at[:LANE, :LANE].set(_padw(w_1[:, :f].T))    # mean_g   -> mean
    bd = bd.at[LANE:, LANE:].set(_padw(w_2[:, :f].T))    # logstd_g -> logstd

    bslab = jnp.concatenate([
        _padb(p[g_cross + "_b"]), _padb(p[g_self1 + "_b"]),
        _padb(p[l_union + "_b"]), _padb(p[g_self2 + "_b"]),
        _padb(p[g_mean + "_b"]), _padb(p[g_logstd + "_b"]),
        _padb(p[l_head1 + "_b"]), _padb(p[l_head2 + "_b"]),
    ])[None, :]                                          # (1, 1024)
    return wslab, bd, bslab


def pack_params(p, f_dim):
    """One-time packing of LastLayer weights into per-path lane-padded slabs."""
    h_dim = p["gc1_w"].shape[1]
    assert p["gc1_w"].shape[0] == f_dim and h_dim == f_dim, \
        "module requires feature_dim == hidden_dim"
    assert f_dim <= LANE  # TODO(synk): tile the feature axis if F/H exceed 128
    w_u, bd_u, b_u = _pack_one_path(p, "gc3", "gc1", "gc5", "gc3_mean", "gc3_logstd",
                                    "user_union", "user_union_1", "user_union_2", f_dim)
    w_i, bd_i, b_i = _pack_one_path(p, "gc4", "gc2", "gc6", "gc4_mean", "gc4_logstd",
                                    "item_union", "item_union_1", "item_union_2", f_dim)
    return {"w": jnp.stack([w_u, w_i]),        # (2, 128, 1152)
            "bd": jnp.stack([bd_u, bd_i]),     # (2, 256, 256)
            "b": jnp.stack([b_u, b_i])}        # (2, 1, 1024)


def pack_graph(UV_adj, VU_adj, uu, vv):
    """One-time padding / stacking of the (static) adjacency matrices."""
    n = max(uu.shape[0], vv.shape[0])
    n = ((n + 7) // 8) * 8                     # sublane-align the shared node dim
    # TODO(synk): for large N, tile the adjacencies over a reduction grid axis
    # with a VMEM accumulator instead of full (N, N) VMEM blocks (v7x: 64 MiB).
    adj_self = jnp.stack([_pad2d(uu, n, n), _pad2d(vv, n, n)])
    adj_cross = jnp.stack([_pad2d(UV_adj, n, n), _pad2d(VU_adj, n, n)])
    return adj_self, adj_cross


# ----------------------------------------------------------------- wrapper ---

@functools.partial(jax.jit, static_argnames=("alpha",))
def last_layer_forward(packed_w, adj_self, adj_cross, ufea, vfea, alpha=ALPHA):
    nu, f = ufea.shape
    nv = vfea.shape[0]
    n = adj_self.shape[1]

    # Only per-call work: lane/row pad the (runtime) feature matrices.
    x_self = jnp.stack([_pad2d(ufea, n, LANE), _pad2d(vfea, n, LANE)])
    x_cross = jnp.stack([_pad2d(vfea, n, LANE), _pad2d(ufea, n, LANE)])

    vmem = pl.BlockSpec(memory_space=pltpu.MemorySpace.VMEM)
    mean_out, kld = pl.pallas_call(
        functools.partial(_last_layer_kernel, alpha=alpha, f_dim=f,
                          n_user=nu, n_item=nv),
        out_shape=(jax.ShapeDtypeStruct((2, n, LANE), jnp.float32),
                   jax.ShapeDtypeStruct((1, 1), jnp.float32)),
        in_specs=[vmem] * 7,
        out_specs=(vmem, vmem),
    )(x_self, x_cross, adj_self, adj_cross,
      packed_w["w"], packed_w["bd"], packed_w["b"])

    return mean_out[0, :nu, :f], mean_out[1, :nv, :f], kld[0, 0]


# -------------------------------------------------------- pure-JAX reference --

def _gcn_ref(x, adj, w, b, alpha=ALPHA):
    h = adj @ (x @ w) + b
    return jnp.where(h > 0, h, alpha * h)


def _linear_ref(x, w, b):
    return x @ w.T + b


def _kld_ref(mu, logstd):
    sp = jax.nn.softplus(logstd)
    sigma1 = jnp.clip(jnp.exp(0.1 + 0.9 * sp), 0.1, 5.0)
    sigma2 = jnp.clip(jnp.exp(0.1 + 0.9 * jax.nn.softplus(1.0)), 0.1, 5.0)
    kl = (jnp.log(sigma2) - jnp.log(sigma1)
          + (sigma1 ** 2 + mu ** 2) / (2.0 * sigma2 ** 2) - 0.5)
    return jnp.sum(jnp.mean(kl, axis=0))


def reference_forward(p, ufea, vfea, UV_adj, VU_adj, uu, vv):
    # user
    u1 = _gcn_ref(vfea, UV_adj, p["gc3_w"], p["gc3_b"])
    u = _gcn_ref(ufea, uu, p["gc1_w"], p["gc1_b"])
    u = _linear_ref(jnp.concatenate([u, u1], 1), p["user_union_w"], p["user_union_b"])
    u = _gcn_ref(u, uu, p["gc5_w"], p["gc5_b"])
    um = _gcn_ref(u, uu, p["gc3_mean_w"], p["gc3_mean_b"])
    ul = _gcn_ref(u, uu, p["gc3_logstd_w"], p["gc3_logstd_b"])
    um = _linear_ref(jnp.concatenate([um, ufea], 1), p["user_union_1_w"], p["user_union_1_b"])
    ul = _linear_ref(jnp.concatenate([ul, ufea], 1), p["user_union_2_w"], p["user_union_2_b"])
    # item
    i1 = _gcn_ref(ufea, VU_adj, p["gc4_w"], p["gc4_b"])
    i = _gcn_ref(vfea, vv, p["gc2_w"], p["gc2_b"])
    i = _linear_ref(jnp.concatenate([i, i1], 1), p["item_union_w"], p["item_union_b"])
    i = _gcn_ref(i, vv, p["gc6_w"], p["gc6_b"])
    im = _gcn_ref(i, vv, p["gc4_mean_w"], p["gc4_mean_b"])
    il = _gcn_ref(i, vv, p["gc4_logstd_w"], p["gc4_logstd_b"])
    im = _linear_ref(jnp.concatenate([im, vfea], 1), p["item_union_1_w"], p["item_union_1_b"])
    il = _linear_ref(jnp.concatenate([il, vfea], 1), p["item_union_2_w"], p["item_union_2_b"])
    return um, im, _kld_ref(um, ul) + _kld_ref(im, il)


# --------------------------------------------------------------------- main --

def make_params(key, f_dim, h_dim):
    names_gcn = ["gc1", "gc2", "gc3", "gc4", "gc5", "gc6"]             # f -> h
    names_gcn2 = ["gc3_mean", "gc3_logstd", "gc4_mean", "gc4_logstd"]  # h -> f
    names_lin = ["user_union", "user_union_1", "user_union_2",
                 "item_union", "item_union_1", "item_union_2"]         # 2f -> f
    p = {}
    keys = jax.random.split(key, len(names_gcn) + len(names_gcn2) + len(names_lin))
    k = 0
    for nme in names_gcn:
        p[nme + "_w"] = 0.1 * jax.random.normal(keys[k], (f_dim, h_dim), jnp.float32)
        p[nme + "_b"] = jnp.zeros((h_dim,), jnp.float32)
        k += 1
    for nme in names_gcn2:
        p[nme + "_w"] = 0.1 * jax.random.normal(keys[k], (h_dim, f_dim), jnp.float32)
        p[nme + "_b"] = jnp.zeros((f_dim,), jnp.float32)
        k += 1
    for nme in names_lin:
        p[nme + "_w"] = 0.1 * jax.random.normal(keys[k], (f_dim, 2 * f_dim), jnp.float32)
        p[nme + "_b"] = 0.01 * jnp.ones((f_dim,), jnp.float32)
        k += 1
    return p


if __name__ == "__main__":
    # small shapes: feature_dim == hidden_dim (required by the module's concat dims)
    F_DIM = 32
    H_DIM = 32
    NU, NV = 16, 24

    key = jax.random.PRNGKey(0)
    k_p, k_u, k_v, k_uv, k_vu, k_uu, k_vv = jax.random.split(key, 7)

    params = make_params(k_p, F_DIM, H_DIM)

    ufea = jax.random.normal(k_u, (NU, F_DIM), jnp.float32)
    vfea = jax.random.normal(k_v, (NV, F_DIM), jnp.float32)
    UV_adj = jax.random.uniform(k_uv, (NU, NV), jnp.float32) / NV
    VU_adj = jax.random.uniform(k_vu, (NV, NU), jnp.float32) / NU
    uu = jax.random.uniform(k_uu, (NU, NU), jnp.float32) / NU
    vv = jax.random.uniform(k_vv, (NV, NV), jnp.float32) / NV

    # One-time packing (weights + static graph), cached across forward calls.
    packed_w = pack_params(params, F_DIM)
    adj_self, adj_cross = pack_graph(UV_adj, VU_adj, uu, vv)

    user, item, kld_loss = last_layer_forward(packed_w, adj_self, adj_cross, ufea, vfea)
    jax.block_until_ready((user, item, kld_loss))

    user_r, item_r, kld_r = reference_forward(params, ufea, vfea, UV_adj, VU_adj, uu, vv)
    np.testing.assert_allclose(np.asarray(user), np.asarray(user_r), rtol=1e-3, atol=1e-3)
    np.testing.assert_allclose(np.asarray(item), np.asarray(item_r), rtol=1e-3, atol=1e-3)
    np.testing.assert_allclose(float(kld_loss), float(kld_r), rtol=1e-3, atol=1e-3)

    print("KERNEL_OK")
</pallas_src>

<mosaic_0001>
module attributes {stable_mosaic.version = 11 : i64} {
  func.func @_last_layer_kernel(%arg0: memref<2x24x128xf32, #tpu.memory_space<vmem>>, %arg1: memref<2x24x128xf32, #tpu.memory_space<vmem>>, %arg2: memref<2x24x24xf32, #tpu.memory_space<vmem>>, %arg3: memref<2x24x24xf32, #tpu.memory_space<vmem>>, %arg4: memref<2x128x1152xf32, #tpu.memory_space<vmem>>, %arg5: memref<2x256x256xf32, #tpu.memory_space<vmem>>, %arg6: memref<2x1x1024xf32, #tpu.memory_space<vmem>>, %arg7: memref<2x24x128xf32, #tpu.memory_space<vmem>>, %arg8: memref<1x1xf32, #tpu.memory_space<vmem>>) attributes {dimension_semantics = [], scalar_prefetch = 0 : i64, scratch_operands = 0 : i64, tpu.core_type = #tpu.core_type<tc>} {
    %c0 = arith.constant 0 : index
    %c0_0 = arith.constant 0 : index
    %c0_1 = arith.constant 0 : index
    %0 = vector.load %arg0[%c0, %c0_0, %c0_1] : memref<2x24x128xf32, #tpu.memory_space<vmem>>, vector<1x24x128xf32>
    %1 = vector.shape_cast %0 : vector<1x24x128xf32> to vector<24x128xf32>
    %c0_2 = arith.constant 0 : index
    %c0_3 = arith.constant 0 : index
    %c0_4 = arith.constant 0 : index
    %2 = vector.load %arg1[%c0_2, %c0_3, %c0_4] : memref<2x24x128xf32, #tpu.memory_space<vmem>>, vector<1x24x128xf32>
    %3 = vector.shape_cast %2 : vector<1x24x128xf32> to vector<24x128xf32>
    %c0_5 = arith.constant 0 : index
    %c0_6 = arith.constant 0 : index
    %c0_7 = arith.constant 0 : index
    %4 = vector.load %arg2[%c0_5, %c0_6, %c0_7] : memref<2x24x24xf32, #tpu.memory_space<vmem>>, vector<1x24x24xf32>
    %5 = vector.shape_cast %4 : vector<1x24x24xf32> to vector<24x24xf32>
    %c0_8 = arith.constant 0 : index
    %c0_9 = arith.constant 0 : index
    %c0_10 = arith.constant 0 : index
    %6 = vector.load %arg3[%c0_8, %c0_9, %c0_10] : memref<2x24x24xf32, #tpu.memory_space<vmem>>, vector<1x24x24xf32>
    %7 = vector.shape_cast %6 : vector<1x24x24xf32> to vector<24x24xf32>
    %c0_11 = arith.constant 0 : index
    %c0_12 = arith.constant 0 : index
    %c0_13 = arith.constant 0 : index
    %8 = vector.load %arg4[%c0_11, %c0_12, %c0_13] : memref<2x128x1152xf32, #tpu.memory_space<vmem>>, vector<1x128x128xf32>
    %9 = vector.shape_cast %8 : vector<1x128x128xf32> to vector<128x128xf32>
    %c0_14 = arith.constant 0 : index
    %c0_15 = arith.constant 0 : index
    %c0_16 = arith.constant 0 : index
    %10 = vector.load %arg6[%c0_14, %c0_15, %c0_16] : memref<2x1x1024xf32, #tpu.memory_space<vmem>>, vector<1x1x128xf32>
    %11 = vector.shape_cast %10 : vector<1x1x128xf32> to vector<1x128xf32>
    %cst = arith.constant dense<0.000000e+00> : vector<24x128xf32>
    %12 = tpu.matmul %3, %9, %cst {dimension_numbers = #tpu.dot_dimension_numbers<[1], [0], [0], [1], [0, 0, 1, 1], [], []>} : vector<24x128xf32>, vector<128x128xf32>, vector<24x128xf32> -> vector<24x128xf32>
    %cst_17 = arith.constant dense<0.000000e+00> : vector<24x128xf32>
    %13 = tpu.matmul %7, %12, %cst_17 {dimension_numbers = #tpu.dot_dimension_numbers<[1], [0], [0], [1], [0, 0, 1, 1], [], []>} : vector<24x24xf32>, vector<24x128xf32>, vector<24x128xf32> -> vector<24x128xf32>
    %14 = vector.broadcast %11 : vector<1x128xf32> to vector<24x128xf32>
    %15 = arith.addf %13, %14 : vector<24x128xf32>
    %cst_18 = arith.constant 0.000000e+00 : f32
    %16 = vector.broadcast %cst_18 : f32 to vector<24x128xf32>
    %17 = arith.cmpf ogt, %15, %16 : vector<24x128xf32>
    %cst_19 = arith.constant 2.000000e-01 : f32
    %18 = vector.broadcast %cst_19 : f32 to vector<24x128xf32>
    %19 = arith.mulf %18, %15 : vector<24x128xf32>
    %20 = arith.select %17, %15, %19 : vector<24x128xi1>, vector<24x128xf32>
    %c0_20 = arith.constant 0 : index
    %c0_21 = arith.constant 0 : index
    %c128 = arith.constant 128 : index
    %21 = vector.load %arg4[%c0_20, %c0_21, %c128] : memref<2x128x1152xf32, #tpu.memory_space<vmem>>, vector<1x128x128xf32>
    %22 = vector.shape_cast %21 : vector<1x128x128xf32> to vector<128x128xf32>
    %c0_22 = arith.constant 0 : index
    %c0_23 = arith.constant 0 : index
    %c128_24 = arith.constant 128 : index
    %23 = vector.load %arg6[%c0_22, %c0_23, %c128_24] : memref<2x1x1024xf32, #tpu.memory_space<vmem>>, vector<1x1x128xf32>
    %24 = vector.shape_cast %23 : vector<1x1x128xf32> to vector<1x128xf32>
    %cst_25 = arith.constant dense<0.000000e+00> : vector<24x128xf32>
    %25 = tpu.matmul %1, %22, %cst_25 {dimension_numbers = #tpu.dot_dimension_numbers<[1], [0], [0], [1], [0, 0, 1, 1], [], []>} : vector<24x128xf32>, vector<128x128xf32>, vector<24x128xf32> -> vector<24x128xf32>
    %cst_26 = arith.constant dense<0.000000e+00> : vector<24x128xf32>
    %26 = tpu.matmul %5, %25, %cst_26 {dimension_numbers = #tpu.dot_dimension_numbers<[1], [0], [0], [1], [0, 0, 1, 1], [], []>} : vector<24x24xf32>, vector<24x128xf32>, vector<24x128xf32> -> vector<24x128xf32>
    %27 = vector.broadcast %24 : vector<1x128xf32> to vector<24x128xf32>
    %28 = arith.addf %26, %27 : vector<24x128xf32>
    %cst_27 = arith.constant 0.000000e+00 : f32
    %29 = vector.broadcast %cst_27 : f32 to vector<24x128xf32>
    %30 = arith.cmpf ogt, %28, %29 : vector<24x128xf32>
    %cst_28 = arith.constant 2.000000e-01 : f32
    %31 = vector.broadcast %cst_28 : f32 to vector<24x128xf32>
    %32 = arith.mulf %31, %28 : vector<24x128xf32>
    %33 = arith.select %30, %28, %32 : vector<24x128xi1>, vector<24x128xf32>
    %c0_29 = arith.constant 0 : index
    %c0_30 = arith.constant 0 : index
    %c256 = arith.constant 256 : index
    %34 = vector.load %arg4[%c0_29, %c0_30, %c256] : memref<2x128x1152xf32, #tpu.memory_space<vmem>>, vector<1x128x128xf32>
    %35 = vector.shape_cast %34 : vector<1x128x128xf32> to vector<128x128xf32>
    %cst_31 = arith.constant dense<0.000000e+00> : vector<24x128xf32>
    %36 = tpu.matmul %33, %35, %cst_31 {dimension_numbers = #tpu.dot_dimension_numbers<[1], [0], [0], [1], [0, 0, 1, 1], [], []>} : vector<24x128xf32>, vector<128x128xf32>, vector<24x128xf32> -> vector<24x128xf32>
    %c0_32 = arith.constant 0 : index
    %c0_33 = arith.constant 0 : index
    %c384 = arith.constant 384 : index
    %37 = vector.load %arg4[%c0_32, %c0_33, %c384] : memref<2x128x1152xf32, #tpu.memory_space<vmem>>, vector<1x128x128xf32>
    %38 = vector.shape_cast %37 : vector<1x128x128xf32> to vector<128x128xf32>
    %cst_34 = arith.constant dense<0.000000e+00> : vector<24x128xf32>
    %39 = tpu.matmul %20, %38, %cst_34 {dimension_numbers = #tpu.dot_dimension_numbers<[1], [0], [0], [1], [0, 0, 1, 1], [], []>} : vector<24x128xf32>, vector<128x128xf32>, vector<24x128xf32> -> vector<24x128xf32>
    %40 = arith.addf %36, %39 : vector<24x128xf32>
    %c0_35 = arith.constant 0 : index
    %c0_36 = arith.constant 0 : index
    %c256_37 = arith.constant 256 : index
    %41 = vector.load %arg6[%c0_35, %c0_36, %c256_37] : memref<2x1x1024xf32, #tpu.memory_space<vmem>>, vector<1x1x128xf32>
    %42 = vector.shape_cast %41 : vector<1x1x128xf32> to vector<1x128xf32>
    %43 = vector.broadcast %42 : vector<1x128xf32> to vector<24x128xf32>
    %44 = arith.addf %40, %43 : vector<24x128xf32>
    %c0_38 = arith.constant 0 : index
    %c0_39 = arith.constant 0 : index
    %c512 = arith.constant 512 : index
    %45 = vector.load %arg4[%c0_38, %c0_39, %c512] : memref<2x128x1152xf32, #tpu.memory_space<vmem>>, vector<1x128x128xf32>
    %46 = vector.shape_cast %45 : vector<1x128x128xf32> to vector<128x128xf32>
    %c0_40 = arith.constant 0 : index
    %c0_41 = arith.constant 0 : index
    %c384_42 = arith.constant 384 : index
    %47 = vector.load %arg6[%c0_40, %c0_41, %c384_42] : memref<2x1x1024xf32, #tpu.memory_space<vmem>>, vector<1x1x128xf32>
    %48 = vector.shape_cast %47 : vector<1x1x128xf32> to vector<1x128xf32>
    %cst_43 = arith.constant dense<0.000000e+00> : vector<24x128xf32>
    %49 = tpu.matmul %44, %46, %cst_43 {dimension_numbers = #tpu.dot_dimension_numbers<[1], [0], [0], [1], [0, 0, 1, 1], [], []>} : vector<24x128xf32>, vector<128x128xf32>, vector<24x128xf32> -> vector<24x128xf32>
    %cst_44 = arith.constant dense<0.000000e+00> : vector<24x128xf32>
    %50 = tpu.matmul %5, %49, %cst_44 {dimension_numbers = #tpu.dot_dimension_numbers<[1], [0], [0], [1], [0, 0, 1, 1], [], []>} : vector<24x24xf32>, vector<24x128xf32>, vector<24x128xf32> -> vector<24x128xf32>
    %51 = vector.broadcast %48 : vector<1x128xf32> to vector<24x128xf32>
    %52 = arith.addf %50, %51 : vector<24x128xf32>
    %cst_45 = arith.constant 0.000000e+00 : f32
    %53 = vector.broadcast %cst_45 : f32 to vector<24x128xf32>
    %54 = arith.cmpf ogt, %52, %53 : vector<24x128xf32>
    %cst_46 = arith.constant 2.000000e-01 : f32
    %55 = vector.broadcast %cst_46 : f32 to vector<24x128xf32>
    %56 = arith.mulf %55, %52 : vector<24x128xf32>
    %57 = arith.select %54, %52, %56 : vector<24x128xi1>, vector<24x128xf32>
    %c0_47 = arith.constant 0 : index
    %c0_48 = arith.constant 0 : index
    %c640 = arith.constant 640 : index
    %58 = vector.load %arg4[%c0_47, %c0_48, %c640] : memref<2x128x1152xf32, #tpu.memory_space<vmem>>, vector<1x128x256xf32>
    %59 = vector.shape_cast %58 : vector<1x128x256xf32> to vector<128x256xf32>
    %c0_49 = arith.constant 0 : index
    %c0_50 = arith.constant 0 : index
    %c512_51 = arith.constant 512 : index
    %60 = vector.load %arg6[%c0_49, %c0_50, %c512_51] : memref<2x1x1024xf32, #tpu.memory_space<vmem>>, vector<1x1x256xf32>
    %61 = vector.shape_cast %60 : vector<1x1x256xf32> to vector<1x256xf32>
    %cst_52 = arith.constant dense<0.000000e+00> : vector<24x256xf32>
    %62 = tpu.matmul %57, %59, %cst_52 {dimension_numbers = #tpu.dot_dimension_numbers<[1], [0], [0], [1], [0, 0, 1, 1], [], []>} : vector<24x128xf32>, vector<128x256xf32>, vector<24x256xf32> -> vector<24x256xf32>
    %cst_53 = arith.constant dense<0.000000e+00> : vector<24x256xf32>
    %63 = tpu.matmul %5, %62, %cst_53 {dimension_numbers = #tpu.dot_dimension_numbers<[1], [0], [0], [1], [0, 0, 1, 1], [], []>} : vector<24x24xf32>, vector<24x256xf32>, vector<24x256xf32> -> vector<24x256xf32>
    %64 = vector.broadcast %61 : vector<1x256xf32> to vector<24x256xf32>
    %65 = arith.addf %63, %64 : vector<24x256xf32>
    %cst_54 = arith.constant 0.000000e+00 : f32
    %66 = vector.broadcast %cst_54 : f32 to vector<24x256xf32>
    %67 = arith.cmpf ogt, %65, %66 : vector<24x256xf32>
    %cst_55 = arith.constant 2.000000e-01 : f32
    %68 = vector.broadcast %cst_55 : f32 to vector<24x256xf32>
    %69 = arith.mulf %68, %65 : vector<24x256xf32>
    %70 = arith.select %67, %65, %69 : vector<24x256xi1>, vector<24x256xf32>
    %c0_56 = arith.constant 0 : index
    %c0_57 = arith.constant 0 : index
    %c0_58 = arith.constant 0 : index
    %71 = vector.load %arg5[%c0_56, %c0_57, %c0_58] : memref<2x256x256xf32, #tpu.memory_space<vmem>>, vector<1x256x256xf32>
    %72 = vector.shape_cast %71 : vector<1x256x256xf32> to vector<256x256xf32>
    %cst_59 = arith.constant dense<0.000000e+00> : vector<24x256xf32>
    %73 = tpu.matmul %70, %72, %cst_59 {dimension_numbers = #tpu.dot_dimension_numbers<[1], [0], [0], [1], [0, 0, 1, 1], [], []>} : vector<24x256xf32>, vector<256x256xf32>, vector<24x256xf32> -> vector<24x256xf32>
    %c0_60 = arith.constant 0 : index
    %c0_61 = arith.constant 0 : index
    %c896 = arith.constant 896 : index
    %74 = vector.load %arg4[%c0_60, %c0_61, %c896] : memref<2x128x1152xf32, #tpu.memory_space<vmem>>, vector<1x128x256xf32>
    %75 = vector.shape_cast %74 : vector<1x128x256xf32> to vector<128x256xf32>
    %cst_62 = arith.constant dense<0.000000e+00> : vector<24x256xf32>
    %76 = tpu.matmul %1, %75, %cst_62 {dimension_numbers = #tpu.dot_dimension_numbers<[1], [0], [0], [1], [0, 0, 1, 1], [], []>} : vector<24x128xf32>, vector<128x256xf32>, vector<24x256xf32> -> vector<24x256xf32>
    %77 = arith.addf %73, %76 : vector<24x256xf32>
    %c0_63 = arith.constant 0 : index
    %c0_64 = arith.constant 0 : index
    %c768 = arith.constant 768 : index
    %78 = vector.load %arg6[%c0_63, %c0_64, %c768] : memref<2x1x1024xf32, #tpu.memory_space<vmem>>, vector<1x1x256xf32>
    %79 = vector.shape_cast %78 : vector<1x1x256xf32> to vector<1x256xf32>
    %80 = vector.broadcast %79 : vector<1x256xf32> to vector<24x256xf32>
    %81 = arith.addf %77, %80 : vector<24x256xf32>
    %82 = vector.extract_strided_slice %81 {offsets = [0, 0], sizes = [24, 128], strides = [1, 1]} : vector<24x256xf32> to vector<24x128xf32>
    %83 = vector.extract_strided_slice %81 {offsets = [0, 128], sizes = [24, 128], strides = [1, 1]} : vector<24x256xf32> to vector<24x128xf32>
    %c0_65 = arith.constant 0 : index
    %c0_66 = arith.constant 0 : index
    %c0_67 = arith.constant 0 : index
    %84 = vector.load %arg7[%c0_65, %c0_66, %c0_67] : memref<2x24x128xf32, #tpu.memory_space<vmem>>, vector<1x24x128xf32>
    %85 = vector.shape_cast %84 : vector<1x24x128xf32> to vector<24x128xf32>
    %86 = vector.shape_cast %82 : vector<24x128xf32> to vector<1x24x128xf32>
    tpu.vector_store %arg7[%c0_65, %c0_66, %c0_67], %86 {strides = array<i32>} : memref<2x24x128xf32, #tpu.memory_space<vmem>>, vector<1x24x128xf32>,
    %cst_68 = arith.constant 0.000000e+00 : f32
    %87 = vector.broadcast %cst_68 : f32 to vector<24x128xf32>
    %88 = arith.maximumf %83, %87 : vector<24x128xf32>
    %89 = math.absf %83 : vector<24x128xf32>
    %cst_69 = arith.constant 0.000000e+00 : f32
    %90 = vector.broadcast %cst_69 : f32 to vector<24x128xf32>
    %91 = arith.subf %90, %89 : vector<24x128xf32>
    %92 = math.exp %91 : vector<24x128xf32>
    %93 = math.log1p %92 : vector<24x128xf32>
    %94 = arith.addf %88, %93 : vector<24x128xf32>
    %cst_70 = arith.constant 0.899999976 : f32
    %95 = vector.broadcast %cst_70 : f32 to vector<24x128xf32>
    %96 = arith.mulf %95, %94 : vector<24x128xf32>
    %cst_71 = arith.constant 1.000000e-01 : f32
    %97 = vector.broadcast %cst_71 : f32 to vector<24x128xf32>
    %98 = arith.addf %97, %96 : vector<24x128xf32>
    %cst_72 = arith.constant -2.30258512 : f32
    %cst_73 = arith.constant 1.60943794 : f32
    %99 = vector.broadcast %cst_72 : f32 to vector<24x128xf32>
    %100 = arith.maximumf %99, %98 : vector<24x128xf32>
    %101 = vector.broadcast %cst_73 : f32 to vector<24x128xf32>
    %102 = arith.minimumf %101, %100 : vector<24x128xf32>
    %103 = math.exp %102 : vector<24x128xf32>
    %cst_74 = arith.constant 1.28193557 : f32
    %104 = vector.broadcast %cst_74 : f32 to vector<24x128xf32>
    %105 = arith.subf %104, %102 : vector<24x128xf32>
    %106 = arith.mulf %103, %103 : vector<24x128xf32>
    %107 = arith.mulf %82, %82 : vector<24x128xf32>
    %108 = arith.addf %106, %107 : vector<24x128xf32>
    %cst_75 = arith.constant 0.0385030359 : f32
    %109 = vector.broadcast %cst_75 : f32 to vector<24x128xf32>
    %110 = arith.mulf %108, %109 : vector<24x128xf32>
    %111 = arith.addf %105, %110 : vector<24x128xf32>
    %cst_76 = arith.constant 5.000000e-01 : f32
    %112 = vector.broadcast %cst_76 : f32 to vector<24x128xf32>
    %113 = arith.subf %111, %112 : vector<24x128xf32>
    %114 = tpu.iota {dimensions = array<i32: 0>} : vector<24x128xi32>
    %115 = tpu.iota {dimensions = array<i32: 1>} : vector<24x128xi32>
    %c16_i32 = arith.constant 16 : i32
    %116 = vector.broadcast %c16_i32 : i32 to vector<24x128xi32>
    %117 = arith.cmpi slt, %114, %116 : vector<24x128xi32>
    %c32_i32 = arith.constant 32 : i32
    %118 = vector.broadcast %c32_i32 : i32 to vector<24x128xi32>
    %119 = arith.cmpi slt, %115, %118 : vector<24x128xi32>
    %120 = arith.andi %117, %119 : vector<24x128xi1>
    %cst_77 = arith.constant 0.000000e+00 : f32
    %121 = vector.broadcast %cst_77 : f32 to vector<24x128xf32>
    %122 = arith.select %120, %113, %121 : vector<24x128xi1>, vector<24x128xf32>
    %cst_78 = arith.constant dense<0.000000e+00> : vector<24xf32>
    %123 = vector.multi_reduction <add>, %122, %cst_78 [1] : vector<24x128xf32> to vector<24xf32>
    %124 = vector.shape_cast %123 : vector<24xf32> to vector<24x1xf32>
    %cst_79 = arith.constant dense<0.000000e+00> : vector<1xf32>
    %125 = vector.multi_reduction <add>, %124, %cst_79 [0] : vector<24x1xf32> to vector<1xf32>
    %126 = vector.shape_cast %125 : vector<1xf32> to vector<1x1xf32>
    %cst_80 = arith.constant 6.250000e-02 : f32
    %127 = vector.broadcast %cst_80 : f32 to vector<1x1xf32>
    %128 = arith.mulf %126, %127 : vector<1x1xf32>
    %c1 = arith.constant 1 : index
    %c0_81 = arith.constant 0 : index
    %c0_82 = arith.constant 0 : index
    %129 = vector.load %arg0[%c1, %c0_81, %c0_82] : memref<2x24x128xf32, #tpu.memory_space<vmem>>, vector<1x24x128xf32>
    %130 = vector.shape_cast %129 : vector<1x24x128xf32> to vector<24x128xf32>
    %c1_83 = arith.constant 1 : index
    %c0_84 = arith.constant 0 : index
    %c0_85 = arith.constant 0 : index
    %131 = vector.load %arg1[%c1_83, %c0_84, %c0_85] : memref<2x24x128xf32, #tpu.memory_space<vmem>>, vector<1x24x128xf32>
    %132 = vector.shape_cast %131 : vector<1x24x128xf32> to vector<24x128xf32>
    %c1_86 = arith.constant 1 : index
    %c0_87 = arith.constant 0 : index
    %c0_88 = arith.constant 0 : index
    %133 = vector.load %arg2[%c1_86, %c0_87, %c0_88] : memref<2x24x24xf32, #tpu.memory_space<vmem>>, vector<1x24x24xf32>
    %134 = vector.shape_cast %133 : vector<1x24x24xf32> to vector<24x24xf32>
    %c1_89 = arith.constant 1 : index
    %c0_90 = arith.constant 0 : index
    %c0_91 = arith.constant 0 : index
    %135 = vector.load %arg3[%c1_89, %c0_90, %c0_91] : memref<2x24x24xf32, #tpu.memory_space<vmem>>, vector<1x24x24xf32>
    %136 = vector.shape_cast %135 : vector<1x24x24xf32> to vector<24x24xf32>
    %c1_92 = arith.constant 1 : index
    %c0_93 = arith.constant 0 : index
    %c0_94 = arith.constant 0 : index
    %137 = vector.load %arg4[%c1_92, %c0_93, %c0_94] : memref<2x128x1152xf32, #tpu.memory_space<vmem>>, vector<1x128x128xf32>
    %138 = vector.shape_cast %137 : vector<1x128x128xf32> to vector<128x128xf32>
    %c1_95 = arith.constant 1 : index
    %c0_96 = arith.constant 0 : index
    %c0_97 = arith.constant 0 : index
    %139 = vector.load %arg6[%c1_95, %c0_96, %c0_97] : memref<2x1x1024xf32, #tpu.memory_space<vmem>>, vector<1x1x128xf32>
    %140 = vector.shape_cast %139 : vector<1x1x128xf32> to vector<1x128xf32>
    %cst_98 = arith.constant dense<0.000000e+00> : vector<24x128xf32>
    %141 = tpu.matmul %132, %138, %cst_98 {dimension_numbers = #tpu.dot_dimension_numbers<[1], [0], [0], [1], [0, 0, 1, 1], [], []>} : vector<24x128xf32>, vector<128x128xf32>, vector<24x128xf32> -> vector<24x128xf32>
    %cst_99 = arith.constant dense<0.000000e+00> : vector<24x128xf32>
    %142 = tpu.matmul %136, %141, %cst_99 {dimension_numbers = #tpu.dot_dimension_numbers<[1], [0], [0], [1], [0, 0, 1, 1], [], []>} : vector<24x24xf32>, vector<24x128xf32>, vector<24x128xf32> -> vector<24x128xf32>
    %143 = vector.broadcast %140 : vector<1x128xf32> to vector<24x128xf32>
    %144 = arith.addf %142, %143 : vector<24x128xf32>
    %cst_100 = arith.constant 0.000000e+00 : f32
    %145 = vector.broadcast %cst_100 : f32 to vector<24x128xf32>
    %146 = arith.cmpf ogt, %144, %145 : vector<24x128xf32>
    %cst_101 = arith.constant 2.000000e-01 : f32
    %147 = vector.broadcast %cst_101 : f32 to vector<24x128xf32>
    %148 = arith.mulf %147, %144 : vector<24x128xf32>
    %149 = arith.select %146, %144, %148 : vector<24x128xi1>, vector<24x128xf32>
    %c1_102 = arith.constant 1 : index
    %c0_103 = arith.constant 0 : index
    %c128_104 = arith.constant 128 : index
    %150 = vector.load %arg4[%c1_102, %c0_103, %c128_104] : memref<2x128x1152xf32, #tpu.memory_space<vmem>>, vector<1x128x128xf32>
    %151 = vector.shape_cast %150 : vector<1x128x128xf32> to vector<128x128xf32>
    %c1_105 = arith.constant 1 : index
    %c0_106 = arith.constant 0 : index
    %c128_107 = arith.constant 128 : index
    %152 = vector.load %arg6[%c1_105, %c0_106, %c128_107] : memref<2x1x1024xf32, #tpu.memory_space<vmem>>, vector<1x1x128xf32>
    %153 = vector.shape_cast %152 : vector<1x1x128xf32> to vector<1x128xf32>
    %cst_108 = arith.constant dense<0.000000e+00> : vector<24x128xf32>
    %154 = tpu.matmul %130, %151, %cst_108 {dimension_numbers = #tpu.dot_dimension_numbers<[1], [0], [0], [1], [0, 0, 1, 1], [], []>} : vector<24x128xf32>, vector<128x128xf32>, vector<24x128xf32> -> vector<24x128xf32>
    %cst_109 = arith.constant dense<0.000000e+00> : vector<24x128xf32>
    %155 = tpu.matmul %134, %154, %cst_109 {dimension_numbers = #tpu.dot_dimension_numbers<[1], [0], [0], [1], [0, 0, 1, 1], [], []>} : vector<24x24xf32>, vector<24x128xf32>, vector<24x128xf32> -> vector<24x128xf32>
    %156 = vector.broadcast %153 : vector<1x128xf32> to vector<24x128xf32>
    %157 = arith.addf %155, %156 : vector<24x128xf32>
    %cst_110 = arith.constant 0.000000e+00 : f32
    %158 = vector.broadcast %cst_110 : f32 to vector<24x128xf32>
    %159 = arith.cmpf ogt, %157, %158 : vector<24x128xf32>
    %cst_111 = arith.constant 2.000000e-01 : f32
    %160 = vector.broadcast %cst_111 : f32 to vector<24x128xf32>
    %161 = arith.mulf %160, %157 : vector<24x128xf32>
    %162 = arith.select %159, %157, %161 : vector<24x128xi1>, vector<24x128xf32>
    %c1_112 = arith.constant 1 : index
    %c0_113 = arith.constant 0 : index
    %c256_114 = arith.constant 256 : index
    %163 = vector.load %arg4[%c1_112, %c0_113, %c256_114] : memref<2x128x1152xf32, #tpu.memory_space<vmem>>, vector<1x128x128xf32>
    %164 = vector.shape_cast %163 : vector<1x128x128xf32> to vector<128x128xf32>
    %cst_115 = arith.constant dense<0.000000e+00> : vector<24x128xf32>
    %165 = tpu.matmul %162, %164, %cst_115 {dimension_numbers = #tpu.dot_dimension_numbers<[1], [0], [0], [1], [0, 0, 1, 1], [], []>} : vector<24x128xf32>, vector<128x128xf32>, vector<24x128xf32> -> vector<24x128xf32>
    %c1_116 = arith.constant 1 : index
    %c0_117 = arith.constant 0 : index
    %c384_118 = arith.constant 384 : index
    %166 = vector.load %arg4[%c1_116, %c0_117, %c384_118] : memref<2x128x1152xf32, #tpu.memory_space<vmem>>, vector<1x128x128xf32>
    %167 = vector.shape_cast %166 : vector<1x128x128xf32> to vector<128x128xf32>
    %cst_119 = arith.constant dense<0.000000e+00> : vector<24x128xf32>
    %168 = tpu.matmul %149, %167, %cst_119 {dimension_numbers = #tpu.dot_dimension_numbers<[1], [0], [0], [1], [0, 0, 1, 1], [], []>} : vector<24x128xf32>, vector<128x128xf32>, vector<24x128xf32> -> vector<24x128xf32>
    %169 = arith.addf %165, %168 : vector<24x128xf32>
    %c1_120 = arith.constant 1 : index
    %c0_121 = arith.constant 0 : index
    %c256_122 = arith.constant 256 : index
    %170 = vector.load %arg6[%c1_120, %c0_121, %c256_122] : memref<2x1x1024xf32, #tpu.memory_space<vmem>>, vector<1x1x128xf32>
    %171 = vector.shape_cast %170 : vector<1x1x128xf32> to vector<1x128xf32>
    %172 = vector.broadcast %171 : vector<1x128xf32> to vector<24x128xf32>
    %173 = arith.addf %169, %172 : vector<24x128xf32>
    %c1_123 = arith.constant 1 : index
    %c0_124 = arith.constant 0 : index
    %c512_125 = arith.constant 512 : index
    %174 = vector.load %arg4[%c1_123, %c0_124, %c512_125] : memref<2x128x1152xf32, #tpu.memory_space<vmem>>, vector<1x128x128xf32>
    %175 = vector.shape_cast %174 : vector<1x128x128xf32> to vector<128x128xf32>
    %c1_126 = arith.constant 1 : index
    %c0_127 = arith.constant 0 : index
    %c384_128 = arith.constant 384 : index
    %176 = vector.load %arg6[%c1_126, %c0_127, %c384_128] : memref<2x1x1024xf32, #tpu.memory_space<vmem>>, vector<1x1x128xf32>
    %177 = vector.shape_cast %176 : vector<1x1x128xf32> to vector<1x128xf32>
    %cst_129 = arith.constant dense<0.000000e+00> : vector<24x128xf32>
    %178 = tpu.matmul %173, %175, %cst_129 {dimension_numbers = #tpu.dot_dimension_numbers<[1], [0], [0], [1], [0, 0, 1, 1], [], []>} : vector<24x128xf32>, vector<128x128xf32>, vector<24x128xf32> -> vector<24x128xf32>
    %cst_130 = arith.constant dense<0.000000e+00> : vector<24x128xf32>
    %179 = tpu.matmul %134, %178, %cst_130 {dimension_numbers = #tpu.dot_dimension_numbers<[1], [0], [0], [1], [0, 0, 1, 1], [], []>} : vector<24x24xf32>, vector<24x128xf32>, vector<24x128xf32> -> vector<24x128xf32>
    %180 = vector.broadcast %177 : vector<1x128xf32> to vector<24x128xf32>
    %181 = arith.addf %179, %180 : vector<24x128xf32>
    %cst_131 = arith.constant 0.000000e+00 : f32
    %182 = vector.broadcast %cst_131 : f32 to vector<24x128xf32>
    %183 = arith.cmpf ogt, %181, %182 : vector<24x128xf32>
    %cst_132 = arith.constant 2.000000e-01 : f32
    %184 = vector.broadcast %cst_132 : f32 to vector<24x128xf32>
    %185 = arith.mulf %184, %181 : vector<24x128xf32>
    %186 = arith.select %183, %181, %185 : vector<24x128xi1>, vector<24x128xf32>
    %c1_133 = arith.constant 1 : index
    %c0_134 = arith.constant 0 : index
    %c640_135 = arith.constant 640 : index
    %187 = vector.load %arg4[%c1_133, %c0_134, %c640_135] : memref<2x128x1152xf32, #tpu.memory_space<vmem>>, vector<1x128x256xf32>
    %188 = vector.shape_cast %187 : vector<1x128x256xf32> to vector<128x256xf32>
    %c1_136 = arith.constant 1 : index
    %c0_137 = arith.constant 0 : index
    %c512_138 = arith.constant 512 : index
    %189 = vector.load %arg6[%c1_136, %c0_137, %c512_138] : memref<2x1x1024xf32, #tpu.memory_space<vmem>>, vector<1x1x256xf32>
    %190 = vector.shape_cast %189 : vector<1x1x256xf32> to vector<1x256xf32>
    %cst_139 = arith.constant dense<0.000000e+00> : vector<24x256xf32>
    %191 = tpu.matmul %186, %188, %cst_139 {dimension_numbers = #tpu.dot_dimension_numbers<[1], [0], [0], [1], [0, 0, 1, 1], [], []>} : vector<24x128xf32>, vector<128x256xf32>, vector<24x256xf32> -> vector<24x256xf32>
    %cst_140 = arith.constant dense<0.000000e+00> : vector<24x256xf32>
    %192 = tpu.matmul %134, %191, %cst_140 {dimension_numbers = #tpu.dot_dimension_numbers<[1], [0], [0], [1], [0, 0, 1, 1], [], []>} : vector<24x24xf32>, vector<24x256xf32>, vector<24x256xf32> -> vector<24x256xf32>
    %193 = vector.broadcast %190 : vector<1x256xf32> to vector<24x256xf32>
    %194 = arith.addf %192, %193 : vector<24x256xf32>
    %cst_141 = arith.constant 0.000000e+00 : f32
    %195 = vector.broadcast %cst_141 : f32 to vector<24x256xf32>
    %196 = arith.cmpf ogt, %194, %195 : vector<24x256xf32>
    %cst_142 = arith.constant 2.000000e-01 : f32
    %197 = vector.broadcast %cst_142 : f32 to vector<24x256xf32>
    %198 = arith.mulf %197, %194 : vector<24x256xf32>
    %199 = arith.select %196, %194, %198 : vector<24x256xi1>, vector<24x256xf32>
    %c1_143 = arith.constant 1 : index
    %c0_144 = arith.constant 0 : index
    %c0_145 = arith.constant 0 : index
    %200 = vector.load %arg5[%c1_143, %c0_144, %c0_145] : memref<2x256x256xf32, #tpu.memory_space<vmem>>, vector<1x256x256xf32>
    %201 = vector.shape_cast %200 : vector<1x256x256xf32> to vector<256x256xf32>
    %cst_146 = arith.constant dense<0.000000e+00> : vector<24x256xf32>
    %202 = tpu.matmul %199, %201, %cst_146 {dimension_numbers = #tpu.dot_dimension_numbers<[1], [0], [0], [1], [0, 0, 1, 1], [], []>} : vector<24x256xf32>, vector<256x256xf32>, vector<24x256xf32> -> vector<24x256xf32>
    %c1_147 = arith.constant 1 : index
    %c0_148 = arith.constant 0 : index
    %c896_149 = arith.constant 896 : index
    %203 = vector.load %arg4[%c1_147, %c0_148, %c896_149] : memref<2x128x1152xf32, #tpu.memory_space<vmem>>, vector<1x128x256xf32>
    %204 = vector.shape_cast %203 : vector<1x128x256xf32> to vector<128x256xf32>
    %cst_150 = arith.constant dense<0.000000e+00> : vector<24x256xf32>
    %205 = tpu.matmul %130, %204, %cst_150 {dimension_numbers = #tpu.dot_dimension_numbers<[1], [0], [0], [1], [0, 0, 1, 1], [], []>} : vector<24x128xf32>, vector<128x256xf32>, vector<24x256xf32> -> vector<24x256xf32>
    %206 = arith.addf %202, %205 : vector<24x256xf32>
    %c1_151 = arith.constant 1 : index
    %c0_152 = arith.constant 0 : index
    %c768_153 = arith.constant 768 : index
    %207 = vector.load %arg6[%c1_151, %c0_152, %c768_153] : memref<2x1x1024xf32, #tpu.memory_space<vmem>>, vector<1x1x256xf32>
    %208 = vector.shape_cast %207 : vector<1x1x256xf32> to vector<1x256xf32>
    %209 = vector.broadcast %208 : vector<1x256xf32> to vector<24x256xf32>
    %210 = arith.addf %206, %209 : vector<24x256xf32>
    %211 = vector.extract_strided_slice %210 {offsets = [0, 0], sizes = [24, 128], strides = [1, 1]} : vector<24x256xf32> to vector<24x128xf32>
    %212 = vector.extract_strided_slice %210 {offsets = [0, 128], sizes = [24, 128], strides = [1, 1]} : vector<24x256xf32> to vector<24x128xf32>
    %c1_154 = arith.constant 1 : index
    %c0_155 = arith.constant 0 : index
    %c0_156 = arith.constant 0 : index
    %213 = vector.load %arg7[%c1_154, %c0_155, %c0_156] : memref<2x24x128xf32, #tpu.memory_space<vmem>>, vector<1x24x128xf32>
    %214 = vector.shape_cast %213 : vector<1x24x128xf32> to vector<24x128xf32>
    %215 = vector.shape_cast %211 : vector<24x128xf32> to vector<1x24x128xf32>
    tpu.vector_store %arg7[%c1_154, %c0_155, %c0_156], %215 {strides = array<i32>} : memref<2x24x128xf32, #tpu.memory_space<vmem>>, vector<1x24x128xf32>,
    %cst_157 = arith.constant 0.000000e+00 : f32
    %216 = vector.broadcast %cst_157 : f32 to vector<24x128xf32>
    %217 = arith.maximumf %212, %216 : vector<24x128xf32>
    %218 = math.absf %212 : vector<24x128xf32>
    %cst_158 = arith.constant 0.000000e+00 : f32
    %219 = vector.broadcast %cst_158 : f32 to vector<24x128xf32>
    %220 = arith.subf %219, %218 : vector<24x128xf32>
    %221 = math.exp %220 : vector<24x128xf32>
    %222 = math.log1p %221 : vector<24x128xf32>
    %223 = arith.addf %217, %222 : vector<24x128xf32>
    %cst_159 = arith.constant 0.899999976 : f32
    %224 = vector.broadcast %cst_159 : f32 to vector<24x128xf32>
    %225 = arith.mulf %224, %223 : vector<24x128xf32>
    %cst_160 = arith.constant 1.000000e-01 : f32
    %226 = vector.broadcast %cst_160 : f32 to vector<24x128xf32>
    %227 = arith.addf %226, %225 : vector<24x128xf32>
    %cst_161 = arith.constant -2.30258512 : f32
    %cst_162 = arith.constant 1.60943794 : f32
    %228 = vector.broadcast %cst_161 : f32 to vector<24x128xf32>
    %229 = arith.maximumf %228, %227 : vector<24x128xf32>
    %230 = vector.broadcast %cst_162 : f32 to vector<24x128xf32>
    %231 = arith.minimumf %230, %229 : vector<24x128xf32>
    %232 = math.exp %231 : vector<24x128xf32>
    %cst_163 = arith.constant 1.28193557 : f32
    %233 = vector.broadcast %cst_163 : f32 to vector<24x128xf32>
    %234 = arith.subf %233, %231 : vector<24x128xf32>
    %235 = arith.mulf %232, %232 : vector<24x128xf32>
    %236 = arith.mulf %211, %211 : vector<24x128xf32>
    %237 = arith.addf %235, %236 : vector<24x128xf32>
    %cst_164 = arith.constant 0.0385030359 : f32
    %238 = vector.broadcast %cst_164 : f32 to vector<24x128xf32>
    %239 = arith.mulf %237, %238 : vector<24x128xf32>
    %240 = arith.addf %234, %239 : vector<24x128xf32>
    %cst_165 = arith.constant 5.000000e-01 : f32
    %241 = vector.broadcast %cst_165 : f32 to vector<24x128xf32>
    %242 = arith.subf %240, %241 : vector<24x128xf32>
    %243 = tpu.iota {dimensions = array<i32: 0>} : vector<24x128xi32>
    %244 = tpu.iota {dimensions = array<i32: 1>} : vector<24x128xi32>
    %c24_i32 = arith.constant 24 : i32
    %245 = vector.broadcast %c24_i32 : i32 to vector<24x128xi32>
    %246 = arith.cmpi slt, %243, %245 : vector<24x128xi32>
    %c32_i32_166 = arith.constant 32 : i32
    %247 = vector.broadcast %c32_i32_166 : i32 to vector<24x128xi32>
    %248 = arith.cmpi slt, %244, %247 : vector<24x128xi32>
    %249 = arith.andi %246, %248 : vector<24x128xi1>
    %cst_167 = arith.constant 0.000000e+00 : f32
    %250 = vector.broadcast %cst_167 : f32 to vector<24x128xf32>
    %251 = arith.select %249, %242, %250 : vector<24x128xi1>, vector<24x128xf32>
    %cst_168 = arith.constant dense<0.000000e+00> : vector<24xf32>
    %252 = vector.multi_reduction <add>, %251, %cst_168 [1] : vector<24x128xf32> to vector<24xf32>
    %253 = vector.shape_cast %252 : vector<24xf32> to vector<24x1xf32>
    %cst_169 = arith.constant dense<0.000000e+00> : vector<1xf32>
    %254 = vector.multi_reduction <add>, %253, %cst_169 [0] : vector<24x1xf32> to vector<1xf32>
    %255 = vector.shape_cast %254 : vector<1xf32> to vector<1x1xf32>
    %cst_170 = arith.constant 0.0416666679 : f32
    %256 = vector.broadcast %cst_170 : f32 to vector<1x1xf32>
    %257 = arith.mulf %255, %256 : vector<1x1xf32>
    %258 = arith.addf %128, %257 : vector<1x1xf32>
    %c0_171 = arith.constant 0 : index
    %c0_172 = arith.constant 0 : index
    %259 = vector.load %arg8[%c0_171, %c0_172] : memref<1x1xf32, #tpu.memory_space<vmem>>, vector<1x1xf32>
    tpu.vector_store %arg8[%c0_171, %c0_172], %258 {strides = array<i32>} : memref<1x1xf32, #tpu.memory_space<vmem>>, vector<1x1xf32>,
    return
  }
}

</mosaic_0001>

<bundles_post_ra>
// kernel: last_layer_forward.1
= control target key start
LH: loop header
LB: loop body
LE: loop exit
PB: predicated region body
PF: predicated region fallthrough
CT: control target
= control target key end

     0   :  { %14 = vsyncpa [#allocation3], 0  ;;  %s2561_s0 = inlined_call_operand.vmem [shape: f32[2,24,128], index: 0, kind: input, shape index: {}]   ;;  %s2562_s1 = inlined_call_operand.vmem [shape: f32[2,24,128], index: 1, kind: input, shape index: {}]   ;;  %s2563_s2 = inlined_call_operand.hbm [shape: f32[2,24,24], index: 2, kind: input, shape index: {}]   ;;  %s2564_s3 = inlined_call_operand.hbm [shape: f32[2,24,24], index: 3, kind: input, shape index: {}]   ;;  %s2565_s4 = inlined_call_operand.hbm [shape: f32[2,128,1152], index: 4, kind: input, shape index: {}]   ;;  %s2566_s5 = inlined_call_operand.hbm [shape: f32[2,256,256], index: 5, kind: input, shape index: {}]   ;;  %s2567_s6 = inlined_call_operand.hbm [shape: f32[2,1,1024], index: 6, kind: input, shape index: {}]   ;;  %s2568_s7 = inlined_call_operand.vmem [shape: f32[2,24,128], index: 7, kind: output, shape index: {0}]   ;;  %s2569_s8 = inlined_call_operand.hbm [shape: f32[1,1], index: 8, kind: output, shape index: {1}]  }
   0x1   :  { %15 = vsyncpa [#allocation6], 0 }
   0x2   :  { %16 = vsyncpa [#allocation9], 0 }
   0x3   :  { %17 = vsyncpa [#allocation4], 0  ;;  %s39_s29 = sshll.u32 %s2564_s3, 4  ;;  %s2230_s30 = smov [#allocation5]   ;;  %s40_s29 = int_to_ptr.hbm [resolvable:$true] %s39_s29 }
   0x4   :  { %s41_s9 = sshll.u32 %s2230_s30, 4  ;;  %s65_s12 = sshll.u32 %s2566_s5, 4  ;;  %s42_s9 = int_to_ptr.vmem [resolvable:$true] %s41_s9  ;;  %s66_s12 = int_to_ptr.hbm [resolvable:$true] %s65_s12 }
   0x5   :  { %s2231_s13 = smov 128   ;;  %s2232_s14 = smov 8  }
   0x6   :  { %47 = dma.hbm_to_vmem [thread:$0]  %s40_s29, 768, %s42_s9, [#allocation6], %s2231_s13, %s2231_s13, %s2232_s14  }
   0x7   :  { %s2233_s15 = smov [#allocation8]   ;;  %s2234_s17 = smov 256  }
   0x8   :  { %s67_s16 = sshll.u32 %s2233_s15, 4  ;;  %s2235_s3 = smov 16   ;;  %s68_s16 = int_to_ptr.vmem [resolvable:$true] %s67_s16 }
   0x9   :  { %73 = dma.hbm_to_vmem [thread:$0]  %s66_s12, 16384, %s68_s16, [#allocation9], %s2234_s17, %s2234_s17, %s2235_s3  }
   0xa   :  { %s26_s20 = sshll.u32 %s2563_s2, 4  ;;  %s2236_s21 = smov [#allocation2]   ;;  %s27_s20 = int_to_ptr.hbm [resolvable:$true] %s26_s20 }
   0xb   :  { %s28_s5 = sshll.u32 %s2236_s21, 4  ;;  %s52_s24 = sshll.u32 %s2565_s4, 4  ;;  %s29_s5 = int_to_ptr.vmem [resolvable:$true] %s28_s5  ;;  %s53_s24 = int_to_ptr.hbm [resolvable:$true] %s52_s24 }
   0xc   :  { %34 = dma.hbm_to_vmem [thread:$0]  %s27_s20, 768, %s29_s5, [#allocation3], %s2231_s13, %s2231_s13, %s2232_s14  }
   0xd   :  { %s2237_s25 = smov [#allocation7]   ;;  %s2238_s27 = smov 1152  }
   0xe   :  { %s54_s26 = sshll.u32 %s2237_s25, 4  ;;  %s2239_s28 = smov 72   ;;  %s55_s26 = int_to_ptr.vmem [resolvable:$true] %s54_s26 }
   0xf   :  { %60 = dma.hbm_to_vmem [thread:$0]  %s53_s24, 36864, %s55_s26, [#allocation6], %s2238_s27, %s2238_s27, %s2239_s28  }
  0x10   :  { %s78_s30 = sshll.u32 %s2567_s6, 4  ;;  %s2240_s9 = smov [#allocation10]   ;;  %s79_s30 = int_to_ptr.hbm [resolvable:$true] %s78_s30 }
  0x11   :  { %s80_s10 = sshll.u32 %s2240_s9, 4  ;;  %s81_s10 = int_to_ptr.vmem [resolvable:$true] %s80_s10 }
  0x12   :  { %86 = dma.hbm_to_vmem [thread:$0]  %s79_s30, 256, %s81_s10, [#allocation9], %s2231_s13, %s2231_s13, %s2232_s14  }
  0x13   :  { %2222 = dma.done.wait [#allocation3], 768  }
  0x14   :  { %2223 = vsyncadd [#allocation3], 4294966528 }
  0x15   :  { %2224 = dma.done.wait [#allocation6], 37632  }
  0x16   :  { %2225 = vsyncadd [#allocation6], 4294929664 }
  0x17   :  { %2226 = dma.done.wait [#allocation9], 16640  }
  0x18   :  { %2227 = vsyncadd [#allocation9], 4294950656  ;;  %v134_v0 = vld [vmem:[#allocation7 + $0x438] sm:$0xff]  ;;  %v225_v1 = vld [vmem:[#allocation7 + $0x440] sm:$0xff]  ;;  %vm165_vm0 = vcmask 195584   ;;  %s1933_s23 = sshll.u32 %s2569_s8, 4  ;;  %s1934_s23 = int_to_ptr.hbm [resolvable:$true] %s1933_s23 }
  0x19   :  { %v133_v2 = vld [vmem:[#allocation7 + $0x3f0] sm:$0xff]  ;;  %136 = vmatpush.msra.mxu0 %v134_v0  ;;  %227 = vmatpush.msra.mxu2 %v225_v1  ;;  %v224_v3 = vld [vmem:[#allocation7 + $0x3f8] sm:$0xff]  ;;  %v132_v4 = vld [vmem:[#allocation7 + $0x3a8] sm:$0xff] }
  0x1a   :  { %v223_v5 = vld [vmem:[#allocation7 + $0x3b0] sm:$0xff]  ;;  %v131_v6 = vld [vmem:[#allocation7 + $0x360] sm:$0xff]  ;;  %v222_v7 = vld [vmem:[#allocation7 + $0x368] sm:$0xff] }
  0x1b   :  { %137 = vmatpush.msra.mxu0 %v133_v2  ;;  %228 = vmatpush.msra.mxu2 %v224_v3  ;;  %v130_v8 = vld [vmem:[#allocation7 + $0x318] sm:$0xff]  ;;  %v221_v9 = vld [vmem:[#allocation7 + $0x320] sm:$0xff]  ;;  %v129_v10 = vld [vmem:[#allocation7 + $0x2d0] sm:$0xff] }
  0x1c   :  { %v220_v11 = vld [vmem:[#allocation7 + $0x2d8] sm:$0xff]  ;;  %v128_v12 = vld [vmem:[#allocation7 + $0x288] sm:$0xff]  ;;  %v219_v13 = vld [vmem:[#allocation7 + $0x290] sm:$0xff] }
  0x1d   :  { %138 = vmatpush.msra.mxu0 %v132_v4  ;;  %229 = vmatpush.msra.mxu2 %v223_v5  ;;  %v127_v14 = vld [vmem:[#allocation7 + $0x240] sm:$0xff]  ;;  %v218_v15 = vld [vmem:[#allocation7 + $0x248] sm:$0xff]  ;;  %v126_v16 = vld [vmem:[#allocation7 + $0x1f8] sm:$0xff] }
  0x1e   :  { %v217_v17 = vld [vmem:[#allocation7 + $0x200] sm:$0xff]  ;;  %v125_v18 = vld [vmem:[#allocation7 + $0x1b0] sm:$0xff]  ;;  %v216_v19 = vld [vmem:[#allocation7 + $0x1b8] sm:$0xff] }
  0x1f   :  { %139 = vmatpush.msra.mxu0 %v131_v6  ;;  %230 = vmatpush.msra.mxu2 %v222_v7  ;;  %v124_v20 = vld [vmem:[#allocation7 + $0x168] sm:$0xff]  ;;  %v215_v21 = vld [vmem:[#allocation7 + $0x170] sm:$0xff]  ;;  %v123_v22 = vld [vmem:[#allocation7 + $0x120] sm:$0xff] }
  0x20   :  { %v214_v23 = vld [vmem:[#allocation7 + $0x128] sm:$0xff]  ;;  %v122_v24 = vld [vmem:[#allocation7 + $0xd8] sm:$0xff]  ;;  %v213_v25 = vld [vmem:[#allocation7 + $0xe0] sm:$0xff] }
  0x21   :  { %140 = vmatpush.msra.mxu0 %v130_v8  ;;  %231 = vmatpush.msra.mxu2 %v221_v9  ;;  %v121_v26 = vld [vmem:[#allocation7 + $0x90] sm:$0xff]  ;;  %v212_v27 = vld [vmem:[#allocation7 + $0x98] sm:$0xff]  ;;  %v120_v28 = vld [vmem:[#allocation7 + $0x48] sm:$0xff] }
  0x22   :  { %v211_v29 = vld [vmem:[#allocation7 + $0x50] sm:$0xff]  ;;  %v119_v30 = vld [vmem:[#allocation7] sm:$0xff]  ;;  %v210_v31 = vld [vmem:[#allocation7 + $0x8] sm:$0xff] }
  0x23   :  { %141 = vmatpush.msra.mxu0 %v129_v10  ;;  %232 = vmatpush.msra.mxu2 %v220_v11  ;;  %v110_v32 = vld [vmem:[%s2562_s1] sm:$0xff]  ;;  %v111_v34 = vld [vmem:[%s2562_s1 + $0x8] sm:$0xff]  ;;  %v112_v36 = vld [vmem:[%s2562_s1 + $0x10] sm:$0xff] }
  0x24   :  { %v2318_v33 = vld [vmem:[%s2561_s0] sm:$0xff]  ;;  %v2327_v35 = vld [vmem:[%s2561_s0 + $0x8] sm:$0xff]  ;;  %v2336_v37 = vld [vmem:[%s2561_s0 + $0x10] sm:$0xff] }
  0x25   :  { %142 = vmatpush.msra.mxu0 %v128_v12  ;;  %233 = vmatpush.msra.mxu2 %v219_v13  ;;  %v116_v43 = vld [vmem:[#allocation5] sm:$0xff]  ;;  %v330_v46 = vld [vmem:[#allocation7 + $0x408] sm:$0xff]  ;;  %v329_v47 = vld [vmem:[#allocation7 + $0x3c0] sm:$0xff] }
  0x26   :  { %v331_v44 = vld [vmem:[#allocation7 + $0x450] sm:$0xff]  ;;  %v2340_v48 = vld [vmem:[#allocation2] sm:$0xff]  ;;  %v315_v49 = vld [vmem:[#allocation7 + $0x448] sm:$0xff] }
  0x27   :  { %143 = vmatpush.msra.mxu0 %v127_v14  ;;  %234 = vmatpush.msra.mxu2 %v218_v15  ;;  %v328_v50 = vld [vmem:[#allocation7 + $0x378] sm:$0xff]  ;;  %v314_v52 = vld [vmem:[#allocation7 + $0x400] sm:$0xff]  ;;  %v327_v53 = vld [vmem:[#allocation7 + $0x330] sm:$0xff] }
  0x28   :  { %v117_v51 = vld [vmem:[#allocation5 + $0x8] sm:$0xff]  ;;  %v326_v55 = vld [vmem:[#allocation7 + $0x2e8] sm:$0xff]  ;;  %v312_v56 = vld [vmem:[#allocation7 + $0x370] sm:$0xff] }
  0x29   :  { %144 = vmatpush.msra.mxu0 %v126_v16  ;;  %235 = vmatpush.msra.mxu2 %v217_v17  ;;  %v313_v54 = vld [vmem:[#allocation7 + $0x3b8] sm:$0xff]  ;;  %v325_v57 = vld [vmem:[#allocation7 + $0x2a0] sm:$0xff]  ;;  %v2345_v58 = vld [vmem:[#allocation2 + $0x8] sm:$0xff] }
  0x2a   :  { %v311_v59 = vld [vmem:[#allocation7 + $0x328] sm:$0xff]  ;;  %v324_v60 = vld [vmem:[#allocation7 + $0x258] sm:$0xff]  ;;  %v118_v61 = vld [vmem:[#allocation5 + $0x10] sm:$0xff] }
  0x2b   :  { %145 = vmatpush.msra.mxu0 %v125_v18  ;;  %236 = vmatpush.msra.mxu2 %v216_v19  ;;  %v310_v62 = vld [vmem:[#allocation7 + $0x2e0] sm:$0xff]  ;;  %v323_v63 = vld [vmem:[#allocation7 + $0x210] sm:$0xff]  ;;  %v309_v0 = vld [vmem:[#allocation7 + $0x298] sm:$0xff] }
  0x2c   :  { %v322_v1 = vld [vmem:[#allocation7 + $0x1c8] sm:$0xff]  ;;  %v308_v2 = vld [vmem:[#allocation7 + $0x250] sm:$0xff]  ;;  %v321_v3 = vld [vmem:[#allocation7 + $0x180] sm:$0xff] }
  0x2d   :  { %146 = vmatpush.msra.mxu0 %v124_v20  ;;  %237 = vmatpush.msra.mxu2 %v215_v21  ;;  %v2350_v4 = vld [vmem:[#allocation2 + $0x10] sm:$0xff]  ;;  %v307_v5 = vld [vmem:[#allocation7 + $0x208] sm:$0xff]  ;;  %v306_v6 = vld [vmem:[#allocation7 + $0x1c0] sm:$0xff] }
  0x2e   :  { %v305_v7 = vld [vmem:[#allocation7 + $0x178] sm:$0xff]  ;;  %v304_v8 = vld [vmem:[#allocation7 + $0x130] sm:$0xff]  ;;  %v303_v9 = vld [vmem:[#allocation7 + $0xe8] sm:$0xff] }
  0x2f   :  { %147 = vmatpush.msra.mxu0 %v123_v22  ;;  %238 = vmatpush.msra.mxu2 %v214_v23  ;;  %v320_v10 = vld [vmem:[#allocation7 + $0x138] sm:$0xff]  ;;  %v302_v11 = vld [vmem:[#allocation7 + $0xa0] sm:$0xff]  ;;  %v319_v12 = vld [vmem:[#allocation7 + $0xf0] sm:$0xff] }
  0x30   :  { %v301_v13 = vld [vmem:[#allocation7 + $0x58] sm:$0xff]  ;;  %v318_v14 = vld [vmem:[#allocation7 + $0xa8] sm:$0xff]  ;;  %v300_v15 = vld [vmem:[#allocation7 + $0x10] sm:$0xff] }
  0x31   :  { %148 = vmatpush.msra.mxu0 %v122_v24  ;;  %239 = vmatpush.msra.mxu2 %v213_v25  ;;  %v317_v16 = vld [vmem:[#allocation7 + $0x60] sm:$0xff]  ;;  %v316_v17 = vld [vmem:[#allocation7 + $0x18] sm:$0xff]  ;;  %v405_v22 = vld [vmem:[#allocation7 + $0x410] sm:$0xff] }
  0x32   :  { %v2038_v18 = vld [vmem:[#allocation10] ss:$0 sm:$0xff]  ;;  %v406_v21 = vld [vmem:[#allocation7 + $0x458] sm:$0xff]  ;;  %v404_v24 = vld [vmem:[#allocation7 + $0x3c8] sm:$0xff] }
  0x33   :  { %149 = vmatpush.msra.mxu0 %v121_v26  ;;  %240 = vmatpush.msra.mxu2 %v212_v27  ;;  %v403_v26 = vld [vmem:[#allocation7 + $0x380] sm:$0xff] }
  0x35   :  { %150 = vmatpush.msra.mxu0 %v120_v28  ;;  %241 = vmatpush.msra.mxu2 %v211_v29  ;;  %v402_v28 = vld [vmem:[#allocation7 + $0x338] sm:$0xff]  ;;  %v2037_v29 = vld [vmem:[#allocation10 + $0x1] ss:$0 sm:$0xff] }
  0x37   :  { %151 = vmatpush.msra.mxu0 %v119_v30  ;;  %242 = vmatpush.msra.mxu2 %v210_v31  ;;  %v401_v31 = vld [vmem:[#allocation7 + $0x2f0] sm:$0xff] }
  0x38   :  { %152 = vmatmul.f32.vlgmr.msra.gmra.mxu0 %v110_v32  ;;  %243 = vmatmul.f32.vlgmr.msra.gmra.mxu2 %v2318_v33 }
  0x39   :  { %408 = vmatpush.msrb.mxu0 %v406_v21  ;;  %v498_v21 = vld [vmem:[#allocation7 + $0x3d0] sm:$0xff] }
  0x3b   :  { %409 = vmatpush.msrb.mxu0 %v405_v22  ;;  %v499_v22 = vld [vmem:[#allocation7 + $0x3d8] sm:$0xff] }
  0x3d   :  { %410 = vmatpush.msrb.mxu0 %v404_v24  ;;  %v497_v24 = vld [vmem:[#allocation7 + $0x390] sm:$0xff] }
  0x3f   :  { %411 = vmatpush.msrb.mxu0 %v403_v26  ;;  %v495_v26 = vld [vmem:[#allocation7 + $0x348] sm:$0xff] }
  0x40   :  { %155 = vmatmul.f32.gmra.mxu0 %v111_v34  ;;  %246 = vmatmul.f32.gmra.mxu2 %v2327_v35 }
  0x41   :  { %412 = vmatpush.msrb.mxu0 %v402_v28  ;;  %v493_v28 = vld [vmem:[#allocation7 + $0x300] sm:$0xff] }
  0x43   :  { %413 = vmatpush.msrb.mxu0 %v401_v31  ;;  %v491_v31 = vld [vmem:[#allocation7 + $0x2b8] sm:$0xff] }
  0x48   :  { %158 = vmatmul.f32.gmra.mxu0 %v112_v36  ;;  %249 = vmatmul.f32.gmra.mxu2 %v2336_v37  ;;  %v400_v36 = vld [vmem:[#allocation7 + $0x2a8] sm:$0xff] }
  0x49   :  { %414 = vmatpush.msrb.mxu0 %v400_v36  ;;  %v486_v36 = vld [vmem:[#allocation7 + $0x220] sm:$0xff] }
  0xb5   :  { %v153_v38 = vpop.f32.mrf.mxu0 }
  0xbb   :  { %v244_v39 = vpop.f32.mrf.mxu2 }
  0xbd   :  { %v156_v40 = vpop.f32.mrf.mxu0 }
  0xc3   :  { %v247_v41 = vpop.f32.mrf.mxu2 }
  0xc5   :  { %v159_v42 = vpop.f32.mrf.mxu0 }
  0xc6   :  { %188 = vmatpush.msra.mxu1 %v159_v42 }
  0xc8   :  { %189 = vmatpush.msra.mxu1 %v156_v40  ;;  %v399_v40 = vld [vmem:[#allocation7 + $0x260] sm:$0xff] }
  0xc9   :  { %415 = vmatpush.msrb.mxu0 %v399_v40  ;;  %v485_v40 = vld [vmem:[#allocation7 + $0x1e0] sm:$0xff] }
  0xca   :  { %190 = vmatpush.msra.mxu1 %v153_v38 }
  0xcb   :  { %v250_v45 = vpop.f32.mrf.mxu2  ;;  %1947 = vmatmul.msk.f32.vlgmr.msra.gmra.mxu1 %vm165_vm0, %v116_v43  ;;  %v398_v43 = vld [vmem:[#allocation7 + $0x218] sm:$0xff] }
  0xcc   :  { %278 = vmatpush.msra.mxu3 %v250_v45  ;;  %332 = vmatpush.msrb.mxu1 %v331_v44 }
  0xcd   :  { %416 = vmatpush.msrb.mxu0 %v398_v43  ;;  %v480_v43 = vld [vmem:[#allocation7 + $0x148] sm:$0xff] }
  0xce   :  { %279 = vmatpush.msra.mxu3 %v247_v41  ;;  %333 = vmatpush.msrb.mxu1 %v330_v46  ;;  %v397_v46 = vld [vmem:[#allocation7 + $0x1d0] sm:$0xff] }
  0xcf   :  { %417 = vmatpush.msrb.mxu0 %v397_v46  ;;  %v479_v46 = vld [vmem:[#allocation7 + $0x108] sm:$0xff] }
  0xd0   :  { %280 = vmatpush.msra.mxu3 %v244_v39  ;;  %334 = vmatpush.msrb.mxu1 %v329_v47 }
  0xd1   :  { %1950 = vmatmul.msk.f32.vlgmr.msra.gmra.mxu3 %vm165_vm0, %v2340_v48 }
  0xd2   :  { %358 = vmatpush.msrb.mxu3 %v315_v49  ;;  %335 = vmatpush.msrb.mxu1 %v328_v50  ;;  %v396_v50 = vld [vmem:[#allocation7 + $0x188] sm:$0xff] }
  0xd3   :  { %1948 = vmatmul.msk.f32.gmra.mxu1 %vm165_vm0, %v117_v51  ;;  %418 = vmatpush.msrb.mxu0 %v396_v50  ;;  %v474_v50 = vld [vmem:[#allocation7 + $0x70] sm:$0xff] }
  0xd4   :  { %359 = vmatpush.msrb.mxu3 %v314_v52  ;;  %336 = vmatpush.msrb.mxu1 %v327_v53  ;;  %v395_v53 = vld [vmem:[#allocation7 + $0x140] sm:$0xff] }
  0xd5   :  { %419 = vmatpush.msrb.mxu0 %v395_v53  ;;  %v473_v53 = vld [vmem:[#allocation7 + $0x30] sm:$0xff] }
  0xd6   :  { %360 = vmatpush.msrb.mxu3 %v313_v54  ;;  %337 = vmatpush.msrb.mxu1 %v326_v55 }
  0xd8   :  { %361 = vmatpush.msrb.mxu3 %v312_v56  ;;  %338 = vmatpush.msrb.mxu1 %v325_v57 }
  0xd9   :  { %1951 = vmatmul.msk.f32.gmra.mxu3 %vm165_vm0, %v2345_v58 }
  0xda   :  { %362 = vmatpush.msrb.mxu3 %v311_v59  ;;  %339 = vmatpush.msrb.mxu1 %v324_v60 }
  0xdb   :  { %1949 = vmatmul.msk.f32.gmra.mxu1 %vm165_vm0, %v118_v61  ;;  %v394_v61 = vld [vmem:[#allocation7 + $0xf8] sm:$0xff] }
  0xdc   :  { %363 = vmatpush.msrb.mxu3 %v310_v62  ;;  %340 = vmatpush.msrb.mxu1 %v323_v63  ;;  %v393_v62 = vld [vmem:[#allocation7 + $0xb0] sm:$0xff]  ;;  %v392_v63 = vld [vmem:[#allocation7 + $0x68] sm:$0xff] }
  0xdd   :  { %420 = vmatpush.msrb.mxu0 %v394_v61 }
  0xde   :  { %364 = vmatpush.msrb.mxu3 %v309_v0  ;;  %341 = vmatpush.msrb.mxu1 %v322_v1  ;;  %v391_v0 = vld [vmem:[#allocation7 + $0x20] sm:$0xff] }
  0xdf   :  { %421 = vmatpush.msrb.mxu0 %v393_v62 }
  0xe0   :  { %365 = vmatpush.msrb.mxu3 %v308_v2  ;;  %342 = vmatpush.msrb.mxu1 %v321_v3  ;;  %v2039_v2 = vld [vmem:[#allocation10 + $0x2] ss:$0 sm:$0xff] }
  0xe1   :  { %1952 = vmatmul.msk.f32.gmra.mxu3 %vm165_vm0, %v2350_v4  ;;  %422 = vmatpush.msrb.mxu0 %v392_v63 }
  0xe2   :  { %366 = vmatpush.msrb.mxu3 %v307_v5  ;;  %343 = vmatpush.msrb.mxu1 %v320_v10 }
  0xe3   :  { %423 = vmatpush.msrb.mxu0 %v391_v0 }
  0xe4   :  { %367 = vmatpush.msrb.mxu3 %v306_v6  ;;  %344 = vmatpush.msrb.mxu1 %v319_v12 }
  0xe6   :  { %368 = vmatpush.msrb.mxu3 %v305_v7  ;;  %345 = vmatpush.msrb.mxu1 %v318_v14 }
  0xe8   :  { %369 = vmatpush.msrb.mxu3 %v304_v8  ;;  %346 = vmatpush.msrb.mxu1 %v317_v16  ;;  %v502_v16 = vld [vmem:[#allocation7 + $0x460] sm:$0xff] }
  0xea   :  { %370 = vmatpush.msrb.mxu3 %v303_v9  ;;  %347 = vmatpush.msrb.mxu1 %v316_v17  ;;  %v503_v17 = vld [vmem:[#allocation7 + $0x468] sm:$0xff] }
  0xec   :  { %371 = vmatpush.msrb.mxu3 %v302_v11  ;;  %505 = vmatpush.msra.mxu1 %v502_v16  ;;  %v720_v16 = vld [vmem:[#allocation7 + $0x398] sm:$0xff] }
  0xee   :  { %372 = vmatpush.msrb.mxu3 %v301_v13 }
  0xf0   :  { %373 = vmatpush.msrb.mxu3 %v300_v15 }
  0xf2   :  { %531 = vmatpush.msra.mxu3 %v503_v17  ;;  %v721_v17 = vld [vmem:[#allocation7 + $0x3a0] sm:$0xff] }
 0x148   :  { %v192_v19 = vpop.f32.mrf.mxu1 }
 0x149   :  { %v193_v20 = vadd.f32 %v2038_v18, %v192_v19  ;;  %v501_v19 = vld [vmem:[#allocation7 + $0x420] sm:$0xff] }
 0x14a   :  { %532 = vmatpush.msra.mxu3 %v501_v19  ;;  %v719_v19 = vld [vmem:[#allocation7 + $0x358] sm:$0xff] }
 0x14b   :  { %vm201_vm1 = vcmp.gt.f32.partialorder %v193_v20, 0.0  ;;  %v204_v23 = vmul.f32 0.2, %v193_v20 }
 0x14c   :  { %533 = vmatpush.msra.mxu3 %v499_v22  ;;  %v662_v22 = vld [vmem:[#allocation8 + $0xf0] sm:$0xff] }
 0x14d   :  { %v207_v25 = vsel %vm201_vm1, %v193_v20, %v204_v23  ;;  %v496_v23 = vld [vmem:[#allocation7 + $0x388] sm:$0xff] }
 0x14e   :  { %348 = vmatmul.f32.vlgmr.msrb.gmra.mxu1 %v207_v25  ;;  %v494_v25 = vld [vmem:[#allocation7 + $0x340] sm:$0xff]  ;;  %534 = vmatpush.msra.mxu3 %v497_v24 }
 0x14f   :  { %v714_v24 = vld [vmem:[#allocation7 + $0x2c0] sm:$0xff] }
 0x150   :  { %v195_v27 = vpop.f32.mrf.mxu1  ;;  %535 = vmatpush.msra.mxu3 %v495_v26  ;;  %v660_v26 = vld [vmem:[#allocation8 + $0xe0] sm:$0xff] }
 0x151   :  { %v196_v30 = vadd.f32 %v2038_v18, %v195_v27  ;;  %v492_v27 = vld [vmem:[#allocation7 + $0x2f8] sm:$0xff] }
 0x152   :  { %536 = vmatpush.msra.mxu3 %v493_v28  ;;  %v713_v28 = vld [vmem:[#allocation7 + $0x280] sm:$0xff] }
 0x153   :  { %vm202_vm2 = vcmp.gt.f32.partialorder %v196_v30, 0.0  ;;  %v205_v32 = vmul.f32 0.2, %v196_v30 }
 0x154   :  { %v282_v34 = vpop.f32.mrf.mxu3  ;;  %537 = vmatpush.msra.mxu3 %v491_v31  ;;  %v711_v31 = vld [vmem:[#allocation7 + $0x238] sm:$0xff] }
 0x155   :  { %v283_v38 = vadd.f32 %v2037_v29, %v282_v34  ;;  %v208_v39 = vsel %vm202_vm2, %v196_v30, %v205_v32  ;;  %v490_v30 = vld [vmem:[#allocation7 + $0x2b0] sm:$0xff]  ;;  %v488_v32 = vld [vmem:[#allocation7 + $0x268] sm:$0xff] }
 0x156   :  { %351 = vmatmul.f32.gmra.mxu1 %v208_v39  ;;  %v489_v34 = vld [vmem:[#allocation7 + $0x270] sm:$0xff]  ;;  %v484_v39 = vld [vmem:[#allocation7 + $0x1d8] sm:$0xff] }
 0x157   :  { %vm291_vm3 = vcmp.gt.f32.partialorder %v283_v38, 0.0  ;;  %v294_v41 = vmul.f32 0.2, %v283_v38  ;;  %538 = vmatpush.msra.mxu3 %v489_v34  ;;  %v656_v34 = vld [vmem:[#allocation8 + $0xc0] sm:$0xff] }
 0x158   :  { %v198_v42 = vpop.f32.mrf.mxu1 }
 0x159   :  { %v297_v44 = vsel %vm291_vm3, %v283_v38, %v294_v41  ;;  %v199_v45 = vadd.f32 %v2038_v18, %v198_v42  ;;  %v500_v18 = vld [vmem:[#allocation7 + $0x418] sm:$0xff]  ;;  %v487_v38 = vld [vmem:[#allocation7 + $0x228] sm:$0xff]  ;;  %v482_v41 = vld [vmem:[#allocation7 + $0x190] sm:$0xff] }
 0x15a   :  { %374 = vmatmul.f32.vlgmr.msrb.gmra.mxu3 %v297_v44  ;;  %506 = vmatpush.msra.mxu1 %v500_v18  ;;  %v483_v42 = vld [vmem:[#allocation7 + $0x198] sm:$0xff]  ;;  %v481_v44 = vld [vmem:[#allocation7 + $0x150] sm:$0xff] }
 0x15b   :  { %vm203_vm4 = vcmp.gt.f32.partialorder %v199_v45, 0.0  ;;  %v206_v47 = vmul.f32 0.2, %v199_v45  ;;  %539 = vmatpush.msra.mxu3 %v487_v38  ;;  %v718_v18 = vld [vmem:[#allocation7 + $0x350] sm:$0xff] }
 0x15c   :  { %v285_v49 = vpop.f32.mrf.mxu3  ;;  %507 = vmatpush.msra.mxu1 %v498_v21  ;;  %v717_v21 = vld [vmem:[#allocation7 + $0x310] sm:$0xff] }
 0x15d   :  { %v286_v51 = vadd.f32 %v2037_v29, %v285_v49  ;;  %v209_v52 = vsel %vm203_vm4, %v199_v45, %v206_v47  ;;  %540 = vmatpush.msra.mxu3 %v485_v40  ;;  %v478_v45 = vld [vmem:[#allocation7 + $0x100] sm:$0xff]  ;;  %v476_v47 = vld [vmem:[#allocation7 + $0xb8] sm:$0xff]  ;;  %v694_v38 = vld [vmem:[#allocation8 + $0x1f0] sm:$0xff] }
 0x15e   :  { %354 = vmatmul.f32.gmra.mxu1 %v209_v52  ;;  %v477_v49 = vld [vmem:[#allocation7 + $0xc0] sm:$0xff]  ;;  %v472_v52 = vld [vmem:[#allocation7 + $0x28] sm:$0xff]  ;;  %v654_v40 = vld [vmem:[#allocation8 + $0xb0] sm:$0xff] }
 0x15f   :  { %vm292_vm5 = vcmp.gt.f32.partialorder %v286_v51, 0.0  ;;  %v295_v54 = vmul.f32 0.2, %v286_v51  ;;  %508 = vmatpush.msra.mxu1 %v496_v23  ;;  %541 = vmatpush.msra.mxu3 %v483_v42  ;;  %v692_v42 = vld [vmem:[#allocation8 + $0x1e0] sm:$0xff] }
 0x161   :  { %v298_v55 = vsel %vm292_vm5, %v286_v51, %v295_v54  ;;  %509 = vmatpush.msra.mxu1 %v494_v25  ;;  %542 = vmatpush.msra.mxu3 %v481_v44  ;;  %v475_v51 = vld [vmem:[#allocation7 + $0x78] sm:$0xff]  ;;  %v2040_v54 = vld [vmem:[#allocation10 + $0x3] ss:$0 sm:$0xff]  ;;  %v715_v25 = vld [vmem:[#allocation7 + $0x2c8] sm:$0xff] }
 0x162   :  { %377 = vmatmul.f32.gmra.mxu3 %v298_v55  ;;  %v705_v44 = vld [vmem:[#allocation7 + $0x160] sm:$0xff] }
 0x163   :  { %510 = vmatpush.msra.mxu1 %v492_v27  ;;  %543 = vmatpush.msra.mxu3 %v479_v46  ;;  %v712_v27 = vld [vmem:[#allocation7 + $0x278] sm:$0xff]  ;;  %v650_v46 = vld [vmem:[#allocation8 + $0x90] sm:$0xff] }
 0x164   :  { %v288_v56 = vpop.f32.mrf.mxu3 }
 0x165   :  { %v289_v57 = vadd.f32 %v2037_v29, %v288_v56  ;;  %511 = vmatpush.msra.mxu1 %v490_v30  ;;  %544 = vmatpush.msra.mxu3 %v477_v49  ;;  %v658_v30 = vld [vmem:[#allocation8 + $0xd0] sm:$0xff]  ;;  %v700_v49 = vld [vmem:[#allocation7 + $0xc8] sm:$0xff] }
 0x167   :  { %vm293_vm6 = vcmp.gt.f32.partialorder %v289_v57, 0.0  ;;  %v296_v59 = vmul.f32 0.2, %v289_v57  ;;  %512 = vmatpush.msra.mxu1 %v488_v32  ;;  %545 = vmatpush.msra.mxu3 %v475_v51  ;;  %v708_v32 = vld [vmem:[#allocation7 + $0x1e8] sm:$0xff]  ;;  %v701_v51 = vld [vmem:[#allocation7 + $0xd0] sm:$0xff] }
 0x169   :  { %v299_v60 = vsel %vm293_vm6, %v289_v57, %v296_v59  ;;  %513 = vmatpush.msra.mxu1 %v486_v36  ;;  %546 = vmatpush.msra.mxu3 %v473_v53  ;;  %v709_v36 = vld [vmem:[#allocation7 + $0x1f0] sm:$0xff]  ;;  %v698_v53 = vld [vmem:[#allocation7 + $0x80] sm:$0xff] }
 0x16a   :  { %380 = vmatmul.f32.gmra.mxu3 %v299_v60 }
 0x16b   :  { %514 = vmatpush.msra.mxu1 %v484_v39  ;;  %v706_v39 = vld [vmem:[#allocation7 + $0x1a0] sm:$0xff] }
 0x16d   :  { %515 = vmatpush.msra.mxu1 %v482_v41  ;;  %v707_v41 = vld [vmem:[#allocation7 + $0x1a8] sm:$0xff] }
 0x16f   :  { %516 = vmatpush.msra.mxu1 %v480_v43  ;;  %v704_v43 = vld [vmem:[#allocation7 + $0x158] sm:$0xff] }
 0x171   :  { %517 = vmatpush.msra.mxu1 %v478_v45  ;;  %v702_v45 = vld [vmem:[#allocation7 + $0x110] sm:$0xff] }
 0x173   :  { %518 = vmatpush.msra.mxu1 %v476_v47  ;;  %v703_v47 = vld [vmem:[#allocation7 + $0x118] sm:$0xff] }
 0x175   :  { %519 = vmatpush.msra.mxu1 %v474_v50  ;;  %v648_v50 = vld [vmem:[#allocation8 + $0x80] sm:$0xff] }
 0x177   :  { %520 = vmatpush.msra.mxu1 %v472_v52  ;;  %v690_v52 = vld [vmem:[#allocation8 + $0x1d0] sm:$0xff] }
 0x1cb   :  { %v349_v1 = vpop.f32.mrf.mxu1 }
 0x1d3   :  { %v352_v7 = vpop.f32.mrf.mxu1 }
 0x1db   :  { %v355_v11 = vpop.f32.mrf.mxu1 }
 0x1dd   :  { %v375_v3 = vpop.f32.mrf.mxu3 }
 0x1de   :  { %v376_v5 = vadd.f32 %v375_v3, %v349_v1 }
 0x1e0   :  { %v388_v6 = vadd.f32 %v2039_v2, %v376_v5 }
 0x1e2   :  { %424 = vmatmul.f32.vlgmr.msrb.gmra.mxu0 %v388_v6 }
 0x1e5   :  { %v378_v8 = vpop.f32.mrf.mxu3 }
 0x1e6   :  { %v379_v9 = vadd.f32 %v378_v8, %v352_v7  ;;  %v726_v8 = vld [vmem:[#allocation7 + $0x470] sm:$0xff] }
 0x1e7   :  { %728 = vmatpush.msrb.mxu1 %v726_v8  ;;  %v655_v8 = vld [vmem:[#allocation8 + $0xb8] sm:$0xff] }
 0x1e8   :  { %v389_v10 = vadd.f32 %v2039_v2, %v379_v9  ;;  %v724_v9 = vld [vmem:[#allocation7 + $0x428] sm:$0xff] }
 0x1e9   :  { %729 = vmatpush.msrb.mxu1 %v724_v9  ;;  %v689_v9 = vld [vmem:[#allocation8 + $0x1c8] sm:$0xff] }
 0x1ea   :  { %427 = vmatmul.f32.gmra.mxu0 %v389_v10  ;;  %v727_v10 = vld [vmem:[#allocation7 + $0x478] sm:$0xff] }
 0x1eb   :  { %754 = vmatpush.msrb.mxu3 %v727_v10  ;;  %v636_v10 = vld [vmem:[#allocation8 + $0x20] sm:$0xff] }
 0x1ed   :  { %v381_v12 = vpop.f32.mrf.mxu3 }
 0x1ee   :  { %v382_v13 = vadd.f32 %v381_v12, %v355_v11  ;;  %v722_v12 = vld [vmem:[#allocation7 + $0x3e0] sm:$0xff] }
 0x1ef   :  { %730 = vmatpush.msrb.mxu1 %v722_v12  ;;  %v687_v12 = vld [vmem:[#allocation8 + $0x1b8] sm:$0xff] }
 0x1f0   :  { %v390_v14 = vadd.f32 %v2039_v2, %v382_v13  ;;  %v725_v13 = vld [vmem:[#allocation7 + $0x430] sm:$0xff] }
 0x1f1   :  { %755 = vmatpush.msrb.mxu3 %v725_v13  ;;  %731 = vmatpush.msrb.mxu1 %v720_v16  ;;  %v682_v13 = vld [vmem:[#allocation8 + $0x190] sm:$0xff]  ;;  %v680_v16 = vld [vmem:[#allocation8 + $0x180] sm:$0xff] }
 0x1f2   :  { %430 = vmatmul.f32.gmra.mxu0 %v390_v14  ;;  %v723_v14 = vld [vmem:[#allocation7 + $0x3e8] sm:$0xff] }
 0x1f3   :  { %756 = vmatpush.msrb.mxu3 %v723_v14  ;;  %732 = vmatpush.msrb.mxu1 %v718_v18  ;;  %v685_v14 = vld [vmem:[#allocation8 + $0x1a8] sm:$0xff]  ;;  %v683_v18 = vld [vmem:[#allocation8 + $0x198] sm:$0xff] }
 0x1f5   :  { %757 = vmatpush.msrb.mxu3 %v721_v17  ;;  %v649_v17 = vld [vmem:[#allocation8 + $0x88] sm:$0xff] }
 0x1f7   :  { %758 = vmatpush.msrb.mxu3 %v719_v19  ;;  %v632_v19 = vld [vmem:[#allocation8] sm:$0xff] }
 0x1f9   :  { %759 = vmatpush.msrb.mxu3 %v717_v21  ;;  %v647_v21 = vld [vmem:[#allocation8 + $0x78] sm:$0xff] }
 0x1fb   :  { %760 = vmatpush.msrb.mxu3 %v715_v25  ;;  %v679_v25 = vld [vmem:[#allocation8 + $0x178] sm:$0xff] }
 0x1fd   :  { %761 = vmatpush.msrb.mxu3 %v713_v28  ;;  %v675_v28 = vld [vmem:[#allocation8 + $0x158] sm:$0xff] }
 0x1ff   :  { %762 = vmatpush.msrb.mxu3 %v711_v31  ;;  %v637_v31 = vld [vmem:[#allocation8 + $0x28] sm:$0xff] }
 0x201   :  { %763 = vmatpush.msrb.mxu3 %v709_v36  ;;  %v633_v36 = vld [vmem:[#allocation8 + $0x8] sm:$0xff] }
 0x203   :  { %764 = vmatpush.msrb.mxu3 %v707_v41  ;;  %v1136_v41 = vld [vmem:[#allocation7 + $0x878] sm:$0xff] }
 0x205   :  { %765 = vmatpush.msrb.mxu3 %v705_v44  ;;  %v1135_v44 = vld [vmem:[#allocation7 + $0x830] sm:$0xff] }
 0x207   :  { %766 = vmatpush.msrb.mxu3 %v703_v47  ;;  %v1043_v47 = vld [vmem:[#allocation7 + $0x7e0] sm:$0xff] }
 0x209   :  { %767 = vmatpush.msrb.mxu3 %v701_v51  ;;  %v1042_v51 = vld [vmem:[#allocation7 + $0x798] sm:$0xff] }
 0x25f   :  { %v425_v15 = vpop.f32.mrf.mxu0 }
 0x267   :  { %v428_v20 = vpop.f32.mrf.mxu0 }
 0x26f   :  { %v431_v29 = vpop.f32.mrf.mxu0 }
 0x270   :  { %450 = vmatpush.msrb.mxu2 %v431_v29  ;;  %v710_v29 = vld [vmem:[#allocation7 + $0x230] sm:$0xff] }
 0x272   :  { %451 = vmatpush.msrb.mxu2 %v428_v20  ;;  %v716_v20 = vld [vmem:[#allocation7 + $0x308] sm:$0xff] }
 0x273   :  { %733 = vmatpush.msrb.mxu1 %v716_v20  ;;  %v678_v20 = vld [vmem:[#allocation8 + $0x170] sm:$0xff] }
 0x274   :  { %452 = vmatpush.msrb.mxu2 %v425_v15 }
 0x275   :  { %1953 = vmatmul.msk.f32.vlgmr.msrb.gmra.mxu2 %vm165_vm0, %v2340_v48  ;;  %734 = vmatpush.msrb.mxu1 %v714_v24  ;;  %v645_v24 = vld [vmem:[#allocation8 + $0x68] sm:$0xff] }
 0x277   :  { %735 = vmatpush.msrb.mxu1 %v712_v27  ;;  %v641_v27 = vld [vmem:[#allocation8 + $0x48] sm:$0xff] }
 0x279   :  { %736 = vmatpush.msrb.mxu1 %v710_v29  ;;  %v639_v29 = vld [vmem:[#allocation8 + $0x38] sm:$0xff] }
 0x27b   :  { %737 = vmatpush.msrb.mxu1 %v708_v32  ;;  %v671_v32 = vld [vmem:[#allocation8 + $0x138] sm:$0xff] }
 0x27d   :  { %1954 = vmatmul.msk.f32.gmra.mxu2 %vm165_vm0, %v2345_v58  ;;  %738 = vmatpush.msrb.mxu1 %v706_v39  ;;  %v676_v39 = vld [vmem:[#allocation8 + $0x160] sm:$0xff] }
 0x27f   :  { %739 = vmatpush.msrb.mxu1 %v704_v43  ;;  %v667_v43 = vld [vmem:[#allocation8 + $0x118] sm:$0xff] }
 0x281   :  { %740 = vmatpush.msrb.mxu1 %v702_v45  ;;  %v672_v45 = vld [vmem:[#allocation8 + $0x140] sm:$0xff] }
 0x283   :  { %741 = vmatpush.msrb.mxu1 %v700_v49  ;;  %v1134_v49 = vld [vmem:[#allocation7 + $0x7e8] sm:$0xff] }
 0x285   :  { %1955 = vmatmul.msk.f32.gmra.mxu2 %vm165_vm0, %v2350_v4  ;;  %742 = vmatpush.msrb.mxu1 %v698_v53  ;;  %v668_v53 = vld [vmem:[#allocation8 + $0x120] sm:$0xff] }
 0x2f8   :  { %v454_v55 = vpop.f32.mrf.mxu2 }
 0x2f9   :  { %v455_v56 = vadd.f32 %v2040_v54, %v454_v55  ;;  %v699_v55 = vld [vmem:[#allocation7 + $0x88] sm:$0xff] }
 0x2fa   :  { %768 = vmatpush.msrb.mxu3 %v699_v55  ;;  %v1132_v55 = vld [vmem:[#allocation7 + $0x758] sm:$0xff] }
 0x2fb   :  { %vm463_vm7 = vcmp.gt.f32.partialorder %v455_v56, 0.0  ;;  %v466_v57 = vmul.f32 0.2, %v455_v56 }
 0x2fd   :  { %v469_v59 = vsel %vm463_vm7, %v455_v56, %v466_v57  ;;  %v688_v56 = vld [vmem:[#allocation8 + $0x1c0] sm:$0xff]  ;;  %v696_v57 = vld [vmem:[#allocation7 + $0x38] sm:$0xff] }
 0x2fe   :  { %521 = vmatmul.f32.vlgmr.msra.gmra.mxu1 %v469_v59  ;;  %547 = vmatmul.f32.vlgmr.msra.gmra.mxu3 %v469_v59  ;;  %v663_v59 = vld [vmem:[#allocation8 + $0xf8] sm:$0xff] }
 0x2ff   :  { %743 = vmatpush.msrb.mxu1 %v696_v57  ;;  %v1040_v57 = vld [vmem:[#allocation7 + $0x708] sm:$0xff] }
 0x300   :  { %v457_v60 = vpop.f32.mrf.mxu2 }
 0x301   :  { %v458_v61 = vadd.f32 %v2040_v54, %v457_v60  ;;  %v697_v60 = vld [vmem:[#allocation7 + $0x40] sm:$0xff]  ;;  %832 = vmatpush.msra.mxu1 %v663_v59 }
 0x302   :  { %769 = vmatpush.msrb.mxu3 %v697_v60  ;;  %v664_v59 = vld [vmem:[#allocation8 + $0x100] sm:$0xff] }
 0x303   :  { %vm464_vm8 = vcmp.gt.f32.partialorder %v458_v61, 0.0  ;;  %v467_v62 = vmul.f32 0.2, %v458_v61  ;;  %v1039_v60 = vld [vmem:[#allocation7 + $0x6c0] sm:$0xff] }
 0x305   :  { %v470_v63 = vsel %vm464_vm8, %v458_v61, %v467_v62  ;;  %v661_v61 = vld [vmem:[#allocation8 + $0xe8] sm:$0xff]  ;;  %v695_v62 = vld [vmem:[#allocation8 + $0x1f8] sm:$0xff] }
 0x306   :  { %524 = vmatmul.f32.gmra.mxu1 %v470_v63  ;;  %550 = vmatmul.f32.gmra.mxu3 %v470_v63  ;;  %v642_v63 = vld [vmem:[#allocation8 + $0x50] sm:$0xff] }
 0x307   :  { %833 = vmatpush.msra.mxu1 %v661_v61  ;;  %858 = vmatpush.msra.mxu3 %v695_v62  ;;  %v1130_v61 = vld [vmem:[#allocation7 + $0x6c8] sm:$0xff]  ;;  %v1038_v62 = vld [vmem:[#allocation7 + $0x678] sm:$0xff] }
 0x308   :  { %v460_v0 = vpop.f32.mrf.mxu2 }
 0x309   :  { %v461_v1 = vadd.f32 %v2040_v54, %v460_v0  ;;  %v646_v54 = vld [vmem:[#allocation8 + $0x70] sm:$0xff]  ;;  %v659_v0 = vld [vmem:[#allocation8 + $0xd8] sm:$0xff] }
 0x30a   :  { %834 = vmatpush.msra.mxu1 %v659_v0  ;;  %v1037_v0 = vld [vmem:[#allocation7 + $0x630] sm:$0xff] }
 0x30b   :  { %vm465_vm9 = vcmp.gt.f32.partialorder %v461_v1, 0.0  ;;  %v468_v2 = vmul.f32 0.2, %v461_v1 }
 0x30d   :  { %v471_v3 = vsel %vm465_vm9, %v461_v1, %v468_v2  ;;  %v693_v1 = vld [vmem:[#allocation8 + $0x1e8] sm:$0xff]  ;;  %v640_v2 = vld [vmem:[#allocation8 + $0x40] sm:$0xff] }
 0x30e   :  { %527 = vmatmul.f32.gmra.mxu1 %v471_v3  ;;  %553 = vmatmul.f32.gmra.mxu3 %v471_v3  ;;  %v686_v3 = vld [vmem:[#allocation8 + $0x1b0] sm:$0xff] }
 0x30f   :  { %859 = vmatpush.msra.mxu3 %v693_v1  ;;  %v1128_v1 = vld [vmem:[#allocation7 + $0x638] sm:$0xff] }
 0x316   :  { %744 = vmatmul.f32.vlgmr.msrb.gmra.mxu1 %v2318_v33  ;;  %770 = vmatmul.f32.vlgmr.msrb.gmra.mxu3 %v2318_v33  ;;  %v651_v33 = vld [vmem:[#allocation8 + $0x98] sm:$0xff] }
 0x31e   :  { %747 = vmatmul.f32.gmra.mxu1 %v2327_v35  ;;  %773 = vmatmul.f32.gmra.mxu3 %v2327_v35  ;;  %v677_v35 = vld [vmem:[#allocation8 + $0x168] sm:$0xff] }
 0x326   :  { %750 = vmatmul.f32.gmra.mxu1 %v2336_v37  ;;  %776 = vmatmul.f32.gmra.mxu3 %v2336_v37  ;;  %v669_v37 = vld [vmem:[#allocation8 + $0x128] sm:$0xff] }
 0x37b   :  { %v522_v5 = vpop.f32.mrf.mxu1 }
 0x381   :  { %v548_v6 = vpop.f32.mrf.mxu3 }
 0x383   :  { %v525_v7 = vpop.f32.mrf.mxu1 }
 0x389   :  { %v551_v11 = vpop.f32.mrf.mxu3 }
 0x38b   :  { %v528_v15 = vpop.f32.mrf.mxu1 }
 0x38c   :  { %575 = vmatpush.msra.mxu2 %v528_v15  ;;  %v634_v15 = vld [vmem:[#allocation8 + $0x10] sm:$0xff] }
 0x38e   :  { %576 = vmatpush.msra.mxu2 %v525_v7  ;;  %v638_v7 = vld [vmem:[#allocation8 + $0x30] sm:$0xff] }
 0x390   :  { %577 = vmatpush.msra.mxu2 %v522_v5  ;;  %v657_v5 = vld [vmem:[#allocation8 + $0xc8] sm:$0xff] }
 0x391   :  { %v554_v23 = vpop.f32.mrf.mxu3  ;;  %1956 = vmatmul.msk.f32.vlgmr.msra.gmra.mxu2 %vm165_vm0, %v2340_v48  ;;  %835 = vmatpush.msra.mxu1 %v657_v5  ;;  %v1035_v5 = vld [vmem:[#allocation7 + $0x5a0] sm:$0xff] }
 0x392   :  { %601 = vmatpush.msra.mxu0 %v554_v23  ;;  %780 = vmatpush.msrb.mxu2 %v662_v22  ;;  %v681_v22 = vld [vmem:[#allocation8 + $0x188] sm:$0xff]  ;;  %v1046_v23 = vld [vmem:[#allocation7 + $0x8b8] sm:$0xff] }
 0x393   :  { %836 = vmatpush.msra.mxu1 %v655_v8  ;;  %v1033_v8 = vld [vmem:[#allocation7 + $0x510] sm:$0xff] }
 0x394   :  { %602 = vmatpush.msra.mxu0 %v551_v11  ;;  %781 = vmatpush.msrb.mxu2 %v660_v26  ;;  %v653_v11 = vld [vmem:[#allocation8 + $0xa8] sm:$0xff]  ;;  %v643_v26 = vld [vmem:[#allocation8 + $0x58] sm:$0xff] }
 0x395   :  { %837 = vmatpush.msra.mxu1 %v653_v11  ;;  %v504_v11 = vld [vmem:[#allocation10 + $0x4] sm:$0x3] }
 0x396   :  { %603 = vmatpush.msra.mxu0 %v548_v6  ;;  %782 = vmatpush.msrb.mxu2 %v658_v30  ;;  %v691_v6 = vld [vmem:[#allocation8 + $0x1d8] sm:$0xff]  ;;  %v673_v30 = vld [vmem:[#allocation8 + $0x148] sm:$0xff] }
 0x397   :  { %1959 = vmatmul.msk.f32.vlgmr.msra.gmra.mxu0 %vm165_vm0, %v2340_v48  ;;  %v652_v48 = vld [vmem:[#allocation8 + $0xa0] sm:$0xff]  ;;  %860 = vmatpush.msra.mxu3 %v691_v6  ;;  %v1126_v6 = vld [vmem:[#allocation7 + $0x5a8] sm:$0xff] }
 0x398   :  { %783 = vmatpush.msrb.mxu2 %v656_v34  ;;  %806 = vmatpush.msrb.mxu0 %v694_v38  ;;  %v635_v34 = vld [vmem:[#allocation8 + $0x18] sm:$0xff]  ;;  %v1137_v38 = vld [vmem:[#allocation7 + $0x8c0] sm:$0xff] }
 0x399   :  { %1957 = vmatmul.msk.f32.gmra.mxu2 %vm165_vm0, %v2345_v58  ;;  %861 = vmatpush.msra.mxu3 %v689_v9  ;;  %v1124_v9 = vld [vmem:[#allocation7 + $0x518] sm:$0xff] }
 0x39a   :  { %784 = vmatpush.msrb.mxu2 %v654_v40  ;;  %807 = vmatpush.msrb.mxu0 %v692_v42  ;;  %v1045_v40 = vld [vmem:[#allocation7 + $0x870] sm:$0xff] }
 0x39b   :  { %862 = vmatpush.msra.mxu3 %v687_v12  ;;  %838 = vmatpush.msra.mxu1 %v651_v33  ;;  %v674_v42 = vld [vmem:[#allocation8 + $0x150] sm:$0xff]  ;;  %v1122_v33 = vld [vmem:[#allocation7 + $0x488] sm:$0xff] }
 0x39c   :  { %785 = vmatpush.msrb.mxu2 %v652_v48  ;;  %808 = vmatpush.msrb.mxu0 %v690_v52  ;;  %v1044_v48 = vld [vmem:[#allocation7 + $0x828] sm:$0xff]  ;;  %v1133_v52 = vld [vmem:[#allocation7 + $0x7a0] sm:$0xff]  ;;  %v1123_v12 = vld [vmem:[#allocation7 + $0x4d0] sm:$0xff] }
 0x39d   :  { %863 = vmatpush.msra.mxu3 %v685_v14  ;;  %839 = vmatpush.msra.mxu1 %v649_v17  ;;  %v558_v14 = vperm.slane %v504_v11, 0 }
 0x39e   :  { %786 = vmatpush.msrb.mxu2 %v650_v46  ;;  %809 = vmatpush.msrb.mxu0 %v688_v56  ;;  %v665_v46 = vld [vmem:[#allocation8 + $0x108] sm:$0xff]  ;;  %v666_v56 = vld [vmem:[#allocation8 + $0x110] sm:$0xff] }
 0x39f   :  { %1960 = vmatmul.msk.f32.gmra.mxu0 %vm165_vm0, %v2345_v58  ;;  %v644_v58 = vld [vmem:[#allocation8 + $0x60] sm:$0xff]  ;;  %864 = vmatpush.msra.mxu3 %v683_v18 }
 0x3a0   :  { %787 = vmatpush.msrb.mxu2 %v648_v50  ;;  %810 = vmatpush.msrb.mxu0 %v686_v3  ;;  %v670_v50 = vld [vmem:[#allocation8 + $0x130] sm:$0xff] }
 0x3a1   :  { %1958 = vmatmul.msk.f32.gmra.mxu2 %vm165_vm0, %v2350_v4  ;;  %840 = vmatpush.msra.mxu1 %v647_v21  ;;  %v1127_v3 = vld [vmem:[#allocation7 + $0x5f0] sm:$0xff] }
 0x3a2   :  { %788 = vmatpush.msrb.mxu2 %v646_v54  ;;  %865 = vmatpush.msra.mxu3 %v681_v22  ;;  %v1041_v54 = vld [vmem:[#allocation7 + $0x750] sm:$0xff] }
 0x3a3   :  { %841 = vmatpush.msra.mxu1 %v645_v24 }
 0x3a4   :  { %789 = vmatpush.msrb.mxu2 %v644_v58  ;;  %866 = vmatpush.msra.mxu3 %v679_v25  ;;  %v1131_v58 = vld [vmem:[#allocation7 + $0x710] sm:$0xff] }
 0x3a5   :  { %842 = vmatpush.msra.mxu1 %v643_v26 }
 0x3a6   :  { %790 = vmatpush.msrb.mxu2 %v642_v63  ;;  %867 = vmatpush.msra.mxu3 %v677_v35  ;;  %v1129_v63 = vld [vmem:[#allocation7 + $0x680] sm:$0xff] }
 0x3a7   :  { %1961 = vmatmul.msk.f32.gmra.mxu0 %vm165_vm0, %v2350_v4  ;;  %v684_v4 = vld [vmem:[#allocation8 + $0x1a0] sm:$0xff]  ;;  %843 = vmatpush.msra.mxu1 %v641_v27 }
 0x3a8   :  { %791 = vmatpush.msrb.mxu2 %v640_v2  ;;  %811 = vmatpush.msrb.mxu0 %v684_v4  ;;  %v1036_v2 = vld [vmem:[#allocation7 + $0x5e8] sm:$0xff]  ;;  %v1125_v4 = vld [vmem:[#allocation7 + $0x560] sm:$0xff] }
 0x3a9   :  { %868 = vmatpush.msra.mxu3 %v675_v28  ;;  %844 = vmatpush.msra.mxu1 %v639_v29 }
 0x3aa   :  { %792 = vmatpush.msrb.mxu2 %v638_v7  ;;  %812 = vmatpush.msrb.mxu0 %v682_v13  ;;  %v1034_v7 = vld [vmem:[#allocation7 + $0x558] sm:$0xff]  ;;  %v1031_v13 = vld [vmem:[#allocation7 + $0x480] sm:$0xff] }
 0x3ab   :  { %869 = vmatpush.msra.mxu3 %v673_v30  ;;  %845 = vmatpush.msra.mxu1 %v637_v31 }
 0x3ac   :  { %793 = vmatpush.msrb.mxu2 %v636_v10  ;;  %813 = vmatpush.msrb.mxu0 %v680_v16  ;;  %v1032_v10 = vld [vmem:[#allocation7 + $0x4c8] sm:$0xff] }
 0x3ad   :  { %870 = vmatpush.msra.mxu3 %v671_v32  ;;  %846 = vmatpush.msra.mxu1 %v635_v34 }
 0x3ae   :  { %794 = vmatpush.msrb.mxu2 %v634_v15  ;;  %814 = vmatpush.msrb.mxu0 %v678_v20  ;;  %v559_v15 = vperm.slane %v504_v11, 1 }
 0x3af   :  { %847 = vmatpush.msra.mxu1 %v633_v36  ;;  %871 = vmatpush.msra.mxu3 %v669_v37 }
 0x3b0   :  { %795 = vmatpush.msrb.mxu2 %v632_v19  ;;  %815 = vmatpush.msrb.mxu0 %v676_v39 }
 0x3b1   :  { %1139 = vmatpush.msrb.mxu1 %v1137_v38  ;;  %872 = vmatpush.msra.mxu3 %v667_v43  ;;  %v2384_v43 = vld [vmem:[%s2561_s0 + $0x18] sm:$0xff] }
 0x3b2   :  { %1049 = vmatpush.msra.mxu2 %v1046_v23  ;;  %816 = vmatpush.msrb.mxu0 %v674_v42  ;;  %v1968_v42 = vld [vmem:[%s2562_s1 + $0x18] sm:$0xff] }
 0x3b3   :  { %1140 = vmatpush.msrb.mxu1 %v1136_v41  ;;  %873 = vmatpush.msra.mxu3 %v665_v46  ;;  %v771_v41 = vpop.f32.mrf.mxu3 }
 0x3b4   :  { %1050 = vmatpush.msra.mxu2 %v1045_v40  ;;  %817 = vmatpush.msrb.mxu0 %v672_v45  ;;  %v1966_v45 = vld [vmem:[%s2561_s0 + $0x20] sm:$0xff] }
 0x3b5   :  { %1141 = vmatpush.msrb.mxu1 %v1135_v44  ;;  %v1969_v44 = vld [vmem:[%s2562_s1 + $0x20] sm:$0xff] }
 0x3b6   :  { %1051 = vmatpush.msra.mxu2 %v1044_v48  ;;  %818 = vmatpush.msrb.mxu0 %v670_v50  ;;  %v745_v50 = vpop.f32.mrf.mxu1 }
 0x3b7   :  { %1142 = vmatpush.msrb.mxu1 %v1134_v49  ;;  %v1967_v49 = vld [vmem:[%s2561_s0 + $0x28] sm:$0xff] }
 0x3b8   :  { %1052 = vmatpush.msra.mxu2 %v1043_v47  ;;  %819 = vmatpush.msrb.mxu0 %v668_v53  ;;  %v1970_v47 = vld [vmem:[%s2562_s1 + $0x28] sm:$0xff] }
 0x3b9   :  { %1143 = vmatpush.msrb.mxu1 %v1133_v52 }
 0x3ba   :  { %1053 = vmatpush.msra.mxu2 %v1042_v51  ;;  %820 = vmatpush.msrb.mxu0 %v666_v56 }
 0x3bb   :  { %1144 = vmatpush.msrb.mxu1 %v1132_v55  ;;  %v774_v48 = vpop.f32.mrf.mxu3  ;;  %v884_v55 = vld [vmem:[#allocation10 + $0x6] sm:$0x3] }
 0x3bc   :  { %1054 = vmatpush.msra.mxu2 %v1041_v54  ;;  %821 = vmatpush.msrb.mxu0 %v664_v59 }
 0x3bd   :  { %1145 = vmatpush.msrb.mxu1 %v1131_v58  ;;  %v887_v58 = vperm.slane %v884_v55, 1 }
 0x3be   :  { %1055 = vmatpush.msra.mxu2 %v1040_v57  ;;  %v748_v51 = vpop.f32.mrf.mxu1 }
 0x3bf   :  { %1146 = vmatpush.msrb.mxu1 %v1130_v61  ;;  %v886_v61 = vperm.slane %v884_v55, 0  ;;  %v1227_v55 = vld [vmem:[#allocation7 + $0x8c8] sm:$0xff] }
 0x3c0   :  { %1056 = vmatpush.msra.mxu2 %v1039_v60 }
 0x3c1   :  { %1147 = vmatpush.msrb.mxu1 %v1129_v63 }
 0x3c2   :  { %1057 = vmatpush.msra.mxu2 %v1038_v62 }
 0x3c3   :  { %1148 = vmatpush.msrb.mxu1 %v1128_v1  ;;  %v777_v46 = vpop.f32.mrf.mxu3 }
 0x3c4   :  { %1058 = vmatpush.msra.mxu2 %v1037_v0 }
 0x3c5   :  { %1149 = vmatpush.msrb.mxu1 %v1127_v3 }
 0x3c6   :  { %1059 = vmatpush.msra.mxu2 %v1036_v2  ;;  %v751_v52 = vpop.f32.mrf.mxu1 }
 0x3c7   :  { %1150 = vmatpush.msrb.mxu1 %v1126_v6 }
 0x3c8   :  { %1060 = vmatpush.msra.mxu2 %v1035_v5 }
 0x3c9   :  { %1151 = vmatpush.msrb.mxu1 %v1125_v4 }
 0x3ca   :  { %1061 = vmatpush.msra.mxu2 %v1034_v7 }
 0x3cb   :  { %1152 = vmatpush.msrb.mxu1 %v1124_v9 }
 0x3cc   :  { %1062 = vmatpush.msra.mxu2 %v1033_v8 }
 0x3cd   :  { %1153 = vmatpush.msrb.mxu1 %v1123_v12 }
 0x3ce   :  { %1063 = vmatpush.msra.mxu2 %v1032_v10 }
 0x3cf   :  { %1154 = vmatpush.msrb.mxu1 %v1122_v33 }
 0x3d0   :  { %1064 = vmatpush.msra.mxu2 %v1031_v13 }
 0x414   :  { %v579_v16 = vpop.f32.mrf.mxu2  ;;  %v605_v17 = vpop.f32.mrf.mxu0 }
 0x415   :  { %v580_v18 = vadd.f32 %v579_v16, %v558_v14  ;;  %v606_v19 = vadd.f32 %v605_v17, %v559_v15 }
 0x417   :  { %vm614_vm10 = vcmp.gt.f32.partialorder %v580_v18, 0.0  ;;  %v620_v20 = vmul.f32 0.2, %v580_v18  ;;  %vm615_vm11 = vcmp.gt.f32.partialorder %v606_v19, 0.0  ;;  %v621_v21 = vmul.f32 0.2, %v606_v19 }
 0x419   :  { %v626_v22 = vsel %vm614_vm10, %v580_v18, %v620_v20  ;;  %v627_v23 = vsel %vm615_vm11, %v606_v19, %v621_v21 }
 0x41a   :  { %796 = vmatmul.f32.vlgmr.msrb.gmra.mxu2 %v626_v22  ;;  %848 = vmatmul.f32.vlgmr.msra.gmra.mxu1 %v626_v22 }
 0x41b   :  { %874 = vmatmul.f32.vlgmr.msra.gmra.mxu3 %v627_v23  ;;  %822 = vmatmul.f32.vlgmr.msrb.gmra.mxu0 %v627_v23 }
 0x41c   :  { %v582_v24 = vpop.f32.mrf.mxu2  ;;  %v608_v25 = vpop.f32.mrf.mxu0  ;;  %1270 = vmatpush.msrb.mxu2 %v1227_v55  ;;  %v1231_v55 = vld [vmem:[#allocation7 + $0x570] sm:$0xff] }
 0x41d   :  { %v583_v26 = vadd.f32 %v582_v24, %v558_v14  ;;  %v609_v35 = vadd.f32 %v608_v25, %v559_v15 }
 0x41f   :  { %vm616_vm12 = vcmp.gt.f32.partialorder %v583_v26, 0.0  ;;  %v622_v27 = vmul.f32 0.2, %v583_v26  ;;  %vm617_vm13 = vcmp.gt.f32.partialorder %v609_v35, 0.0  ;;  %v623_v28 = vmul.f32 0.2, %v609_v35 }
 0x421   :  { %v628_v29 = vsel %vm616_vm12, %v583_v26, %v622_v27  ;;  %v629_v30 = vsel %vm617_vm13, %v609_v35, %v623_v28 }
 0x422   :  { %799 = vmatmul.f32.gmra.mxu2 %v628_v29  ;;  %851 = vmatmul.f32.gmra.mxu1 %v628_v29 }
 0x423   :  { %877 = vmatmul.f32.gmra.mxu3 %v629_v30  ;;  %825 = vmatmul.f32.gmra.mxu0 %v629_v30 }
 0x424   :  { %v585_v31 = vpop.f32.mrf.mxu2  ;;  %v611_v32 = vpop.f32.mrf.mxu0 }
 0x425   :  { %v586_v34 = vadd.f32 %v585_v31, %v558_v14  ;;  %v612_v36 = vadd.f32 %v611_v32, %v559_v15 }
 0x427   :  { %vm618_vm14 = vcmp.gt.f32.partialorder %v586_v34, 0.0  ;;  %v624_v38 = vmul.f32 0.2, %v586_v34  ;;  %vm619_vm15 = vcmp.gt.f32.partialorder %v612_v36, 0.0  ;;  %v625_v39 = vmul.f32 0.2, %v612_v36 }
 0x429   :  { %v630_v37 = vsel %vm618_vm14, %v586_v34, %v624_v38  ;;  %v631_v40 = vsel %vm619_vm15, %v612_v36, %v625_v39 }
 0x42a   :  { %802 = vmatmul.f32.gmra.mxu2 %v630_v37  ;;  %854 = vmatmul.f32.gmra.mxu1 %v630_v37 }
 0x42b   :  { %828 = vmatmul.f32.gmra.mxu0 %v631_v40  ;;  %880 = vmatmul.f32.gmra.mxu3 %v631_v40 }
 0x432   :  { %1065 = vmatmul.f32.vlgmr.msra.gmra.mxu2 %v1968_v42  ;;  %1155 = vmatmul.f32.vlgmr.msrb.gmra.mxu1 %v2384_v43 }
 0x43a   :  { %1068 = vmatmul.f32.gmra.mxu2 %v1969_v44  ;;  %1158 = vmatmul.f32.gmra.mxu1 %v1966_v45 }
 0x442   :  { %1071 = vmatmul.f32.gmra.mxu2 %v1970_v47  ;;  %1161 = vmatmul.f32.gmra.mxu1 %v1967_v49 }
 0x497   :  { %v849_v53 = vpop.f32.mrf.mxu1 }
 0x498   :  { %v823_v54 = vpop.f32.mrf.mxu0  ;;  %v850_v56 = vadd.f32 %v849_v53, %v771_v41 }
 0x49d   :  { %v797_v57 = vpop.f32.mrf.mxu2 }
 0x49e   :  { %v798_v59 = vadd.f32 %v797_v57, %v745_v50  ;;  %v875_v60 = vpop.f32.mrf.mxu3 }
 0x49f   :  { %v876_v62 = vadd.f32 %v875_v60, %v850_v56  ;;  %v852_v63 = vpop.f32.mrf.mxu1  ;;  %v1226_v56 = vld [vmem:[#allocation7 + $0x880] sm:$0xff] }
 0x4a0   :  { %v824_v0 = vadd.f32 %v823_v54, %v798_v59  ;;  %v826_v5 = vpop.f32.mrf.mxu0  ;;  %v853_v7 = vadd.f32 %v852_v63, %v774_v48  ;;  %1271 = vmatpush.msrb.mxu2 %v1226_v56  ;;  %v1213_v56 = vld [vmem:[#allocation7 + $0x4d8] sm:$0xff] }
 0x4a1   :  { %v891_v1 = vadd.f32 %v887_v58, %v876_v62 }
 0x4a2   :  { %v2399_v2 = vadd.f32 %v886_v61, %v824_v0 }
 0x4a3   :  { %v902_v3 = vand.u32 2147483647, %v891_v1  ;;  %v899_v37 = vmax.f32 %v891_v1, 0.0  ;;  %v1224_v1 = vld [vmem:[#allocation7 + $0x7f0] sm:$0xff] }
 0x4a4   :  { %896 = vst [vmem:[%s2568_s7] sm:$0xff] %v2399_v2 }
 0x4a5   :  { %v905_v6 = vsub.f32 0.0, %v902_v3  ;;  %v800_v4 = vpop.f32.mrf.mxu2 }
 0x4a6   :  { %v801_v8 = vadd.f32 %v800_v4, %v748_v51  ;;  %v878_v9 = vpop.f32.mrf.mxu3  ;;  %v2418_v4 = vld [vmem:[#allocation2 + $0x20] sm:$0xff] }
 0x4a7   :  { %v908_v10 = vmul.f32 1.442695, %v905_v6  ;;  %v879_v11 = vadd.f32 %v878_v9, %v853_v7  ;;  %v855_v12 = vpop.f32.mrf.mxu1  ;;  %v1223_v6 = vld [vmem:[#allocation7 + $0x7a8] sm:$0xff]  ;;  %v1243_v7 = vld [vmem:[#allocation7 + $0x8d0] sm:$0xff]  ;;  %v1222_v9 = vld [vmem:[#allocation7 + $0x760] sm:$0xff] }
 0x4a8   :  { %v827_v13 = vadd.f32 %v826_v5, %v801_v8  ;;  %v829_v18 = vpop.f32.mrf.mxu0  ;;  %v1027_v5 = vld [vmem:[#allocation5 + $0x18] sm:$0xff]  ;;  %v1221_v12 = vld [vmem:[#allocation7 + $0x718] sm:$0xff] }
 0x4a9   :  { %2045 = vpow2.f32 %v908_v10  ;;  %v893_v33 = vadd.f32 %v887_v58, %v879_v11  ;;  %v2241_v58 = vmov 0.0   ;;  %v1242_v10 = vld [vmem:[#allocation7 + $0x888] sm:$0xff] }
 0x4aa   :  { %v2405_v14 = vadd.f32 %v886_v61, %v827_v13  ;;  %1003 = vadd.xlane.f32.xlu2 %v2241_v58  ;;  %v1241_v13 = vld [vmem:[#allocation7 + $0x840] sm:$0xff]  ;;  %v1212_v58 = vld [vmem:[#allocation7 + $0x490] sm:$0xff] }
 0x4ab   :  { %v903_v15 = vand.u32 2147483647, %v893_v33  ;;  %v900_v53 = vmax.f32 %v893_v33, 0.0 }
 0x4ac   :  { %897 = vst [vmem:[%s2568_s7 + $0x8] sm:$0xff] %v2405_v14 }
 0x4ad   :  { %v906_v16 = vsub.f32 0.0, %v903_v15  ;;  %v803_v17 = vpop.f32.mrf.mxu2  ;;  %v987_v15 = vlaneseq }
 0x4ae   :  { %v804_v19 = vadd.f32 %v803_v17, %v751_v52  ;;  %v881_v20 = vpop.f32.mrf.mxu3  ;;  %v2414_v52 = vld [vmem:[#allocation2 + $0x18] sm:$0xff]  ;;  %v1220_v17 = vld [vmem:[#allocation7 + $0x6d0] sm:$0xff] }
 0x4af   :  { %v2046_v21 = vpop.eup %2045  ;;  %v910_v22 = vmul.f32 1.442695, %v906_v16  ;;  %v1156_v23 = vpop.f32.mrf.mxu1  ;;  %v1240_v20 = vld [vmem:[#allocation7 + $0x7f8] sm:$0xff] }
 0x4b0   :  { %v914_v24 = vadd.f32 1.0, %v2046_v21  ;;  %v830_v25 = vadd.f32 %v829_v18, %v804_v19  ;;  %v917_v26 = vmul.f32 -0.5, %v2046_v21  ;;  %v920_v29 = vand.u32 2147483647, %v2046_v21 }
 0x4b1   :  { %2047 = vpow2.f32 %v910_v22  ;;  %v968_v18 = vmul.f32 %v2399_v2, %v2399_v2  ;;  %v1219_v22 = vld [vmem:[#allocation7 + $0x688] sm:$0xff] }
 0x4b2   :  { %2049 = vlog2.f32 %v914_v24  ;;  %v894_v35 = vadd.f32 %v886_v61, %v830_v25  ;;  %v918_v27 = vadd.f32 1.0, %v917_v26  ;;  %vm921_vm1 = vcmp.lt.f32.partialorder %v920_v29, 0.0004427343  ;;  %v1225_v61 = vld [vmem:[#allocation7 + $0x838] sm:$0xff]  ;;  %v1239_v24 = vld [vmem:[#allocation7 + $0x7b0] sm:$0xff]  ;;  %v2425_v25 = vld [vmem:[#allocation2 + $0x28] sm:$0xff] }
 0x4b3   :  { %1272 = vmatpush.msrb.mxu2 %v1225_v61  ;;  %v2427_v26 = vand.u32 127, %v987_v15  ;;  %v1217_v29 = vld [vmem:[#allocation7 + $0x5f8] sm:$0xff]  ;;  %v2041_v61 = vld [vmem:[#allocation10 + $0x9] ss:$0 sm:$0xff] }
 0x4b4   :  { %898 = vst [vmem:[%s2568_s7 + $0x10] sm:$0xff] %v894_v35  ;;  %v919_v38 = vmul.f32 %v2046_v21, %v918_v27  ;;  %v1028_v21 = vld [vmem:[#allocation5 + $0x20] sm:$0xff]  ;;  %v1218_v35 = vld [vmem:[#allocation7 + $0x640] sm:$0xff] }
 0x4b5   :  { %v1066_v28 = vpop.f32.mrf.mxu2  ;;  %1273 = vmatpush.msrb.mxu2 %v1224_v1  ;;  %vm992_vm3 = vcmp.lt.s32.totalorder %v2427_v26, 32 }
 0x4b7   :  { %v2048_v30 = vpop.eup %2047  ;;  %v1159_v31 = vpop.f32.mrf.mxu1  ;;  %1274 = vmatpush.msrb.mxu2 %v1223_v6 }
 0x4b8   :  { %v2050_v32 = vpop.eup %2049  ;;  %v923_v34 = vadd.f32 1.0, %v2048_v30  ;;  %v926_v39 = vmul.f32 -0.5, %v2048_v30  ;;  %v929_v48 = vand.u32 2147483647, %v2048_v30 }
 0x4b9   :  { %v916_v36 = vmul.f32 0.6931472, %v2050_v32  ;;  %1275 = vmatpush.msrb.mxu2 %v1222_v9 }
 0x4ba   :  { %2051 = vlog2.f32 %v923_v34  ;;  %v927_v42 = vadd.f32 1.0, %v926_v39  ;;  %vm930_vm2 = vcmp.lt.f32.partialorder %v929_v48, 0.0004427343  ;;  %v1216_v34 = vld [vmem:[#allocation7 + $0x5b0] sm:$0xff] }
 0x4bb   :  { %v922_v40 = vsel %vm921_vm1, %v919_v38, %v916_v36  ;;  %1276 = vmatpush.msrb.mxu2 %v1221_v12  ;;  %v969_v36 = vmul.f32 %v2405_v14, %v2405_v14  ;;  %v1234_v14 = vld [vmem:[#allocation7 + $0x648] sm:$0xff] }
 0x4bc   :  { %v941_v41 = vadd.f32 %v922_v40, %v899_v37  ;;  %v928_v51 = vmul.f32 %v2048_v30, %v927_v42  ;;  %v1236_v37 = vld [vmem:[#allocation7 + $0x6d8] sm:$0xff] }
 0x4bd   :  { %v1069_v44 = vpop.f32.mrf.mxu2  ;;  %1277 = vmatpush.msrb.mxu2 %v1220_v17  ;;  %v1029_v40 = vld [vmem:[#allocation5 + $0x28] sm:$0xff]  ;;  %v1312_v17 = vld [vmem:[#allocation7 + $0x728] sm:$0xff] }
 0x4be   :  { %v944_v45 = vmul.f32 0.9, %v941_v41  ;;  %v1215_v41 = vld [vmem:[#allocation7 + $0x568] sm:$0xff] }
 0x4bf   :  { %v1162_v46 = vpop.f32.mrf.mxu1  ;;  %1278 = vmatpush.msrb.mxu2 %v1219_v22 }
 0x4c0   :  { %v2052_v47 = vpop.eup %2051  ;;  %1190 = vmatpush.msrb.mxu3 %v1162_v46  ;;  %v947_v49 = vadd.f32 0.1, %v944_v45 }
 0x4c1   :  { %v925_v50 = vmul.f32 0.6931472, %v2052_v47  ;;  %1279 = vmatpush.msrb.mxu2 %v1218_v35 }
 0x4c2   :  { %1191 = vmatpush.msrb.mxu3 %v1159_v31  ;;  %v950_v54 = vmax.f32 %v947_v49, -2.3025851  ;;  %v1237_v31 = vld [vmem:[#allocation7 + $0x720] sm:$0xff] }
 0x4c3   :  { %v931_v57 = vsel %vm930_vm2, %v928_v51, %v925_v50  ;;  %1280 = vmatpush.msrb.mxu2 %v1217_v29  ;;  %v1233_v49 = vld [vmem:[#allocation7 + $0x600] sm:$0xff]  ;;  %v1308_v29 = vld [vmem:[#allocation7 + $0x608] sm:$0xff] }
 0x4c4   :  { %v942_v59 = vadd.f32 %v931_v57, %v900_v53  ;;  %1192 = vmatpush.msrb.mxu3 %v1156_v23  ;;  %v953_v60 = vmin.f32 %v950_v54, 1.609438  ;;  %v1232_v53 = vld [vmem:[#allocation7 + $0x5b8] sm:$0xff]  ;;  %v1214_v54 = vld [vmem:[#allocation7 + $0x520] sm:$0xff]  ;;  %v1230_v57 = vld [vmem:[#allocation7 + $0x528] sm:$0xff] }
 0x4c5   :  { %v1072_v62 = vpop.f32.mrf.mxu2  ;;  %1974 = vmatmul.msk.f32.vlgmr.msrb.gmra.mxu3 %vm165_vm0, %v2414_v52  ;;  %1281 = vmatpush.msrb.mxu2 %v1216_v34 }
 0x4c6   :  { %v945_v63 = vmul.f32 0.9, %v942_v59  ;;  %1100 = vmatpush.msra.mxu0 %v1072_v62  ;;  %v956_v0 = vmul.f32 1.442695, %v953_v60  ;;  %v962_v27 = vsub.f32 1.2819356, %v953_v60 }
 0x4c7   :  { %1282 = vmatpush.msrb.mxu2 %v1215_v41  ;;  %v1229_v59 = vld [vmem:[#allocation7 + $0x4e0] sm:$0xff]  ;;  %v1228_v60 = vld [vmem:[#allocation7 + $0x498] sm:$0xff]  ;;  %v2042_v62 = vld [vmem:[#allocation10 + $0x8] ss:$0 sm:$0xff] }
 0x4c8   :  { %v948_v3 = vadd.f32 0.1, %v945_v63  ;;  %1101 = vmatpush.msra.mxu0 %v1069_v44  ;;  %2053 = vpow2.f32 %v956_v0  ;;  %v1235_v44 = vld [vmem:[#allocation7 + $0x690] sm:$0xff]  ;;  %v1318_v63 = vld [vmem:[#allocation7 + $0x8d8] sm:$0xff]  ;;  %v1304_v41 = vld [vmem:[#allocation7 + $0x4e8] sm:$0xff] }
 0x4c9   :  { %1283 = vmatpush.msrb.mxu2 %v1214_v54  ;;  %v1317_v0 = vld [vmem:[#allocation7 + $0x890] sm:$0xff]  ;;  %1320 = vmatpush.msra.mxu3 %v1318_v63 }
 0x4ca   :  { %1102 = vmatpush.msra.mxu0 %v1066_v28  ;;  %v951_v8 = vmax.f32 %v948_v3, -2.3025851  ;;  %v1238_v28 = vld [vmem:[#allocation7 + $0x768] sm:$0xff]  ;;  %v1410_v63 = vld [vmem:[#allocation7 + $0x850] sm:$0xff] }
 0x4cb   :  { %1971 = vmatmul.msk.f32.vlgmr.msra.gmra.mxu0 %vm165_vm0, %v1027_v5  ;;  %1284 = vmatpush.msrb.mxu2 %v1213_v56  ;;  %v1316_v5 = vld [vmem:[#allocation7 + $0x848] sm:$0xff] }
 0x4cc   :  { %v954_v11 = vmin.f32 %v951_v8, 1.609438  ;;  %1244 = vmatpush.msrb.mxu0 %v1243_v7  ;;  %1321 = vmatpush.msra.mxu3 %v1317_v0  ;;  %v1315_v8 = vld [vmem:[#allocation7 + $0x800] sm:$0xff]  ;;  %v1411_v0 = vld [vmem:[#allocation7 + $0x858] sm:$0xff] }
 0x4cd   :  { %1975 = vmatmul.msk.f32.gmra.mxu3 %vm165_vm0, %v2418_v4  ;;  %1285 = vmatpush.msrb.mxu2 %v1212_v58  ;;  %v1414_v58 = vld [vmem:[#allocation7 + $0x8e0] sm:$0xff] }
 0x4ce   :  { %v2054_v33 = vpop.eup %2053  ;;  %v958_v16 = vmul.f32 1.442695, %v954_v11  ;;  %1245 = vmatpush.msrb.mxu0 %v1242_v10  ;;  %v963_v45 = vsub.f32 1.2819356, %v954_v11  ;;  %1322 = vmatpush.msra.mxu3 %v1316_v5  ;;  %v1314_v11 = vld [vmem:[#allocation7 + $0x7b8] sm:$0xff]  ;;  %v1406_v5 = vld [vmem:[#allocation7 + $0x7c0] sm:$0xff] }
 0x4cf   :  { %v965_v19 = vmul.f32 %v2054_v33, %v2054_v33  ;;  %v1313_v33 = vld [vmem:[#allocation7 + $0x770] sm:$0xff] }
 0x4d0   :  { %2055 = vpow2.f32 %v958_v16  ;;  %1246 = vmatpush.msrb.mxu0 %v1241_v13  ;;  %1323 = vmatpush.msra.mxu3 %v1315_v8  ;;  %v1405_v8 = vld [vmem:[#allocation7 + $0x780] sm:$0xff] }
 0x4d1   :  { %v971_v23 = vadd.f32 %v968_v18, %v965_v19 }
 0x4d2   :  { %1247 = vmatpush.msrb.mxu0 %v1240_v20  ;;  %1324 = vmatpush.msra.mxu3 %v1314_v11  ;;  %v1311_v20 = vld [vmem:[#allocation7 + $0x6e0] sm:$0xff]  ;;  %v1403_v11 = vld [vmem:[#allocation7 + $0x738] sm:$0xff] }
 0x4d3   :  { %1972 = vmatmul.msk.f32.gmra.mxu0 %vm165_vm0, %v1028_v21  ;;  %v974_v2 = vmul.f32 0.038503036, %v971_v23  ;;  %v1310_v23 = vld [vmem:[#allocation7 + $0x698] sm:$0xff] }
 0x4d4   :  { %1248 = vmatpush.msrb.mxu0 %v1239_v24  ;;  %1325 = vmatpush.msra.mxu3 %v1313_v33  ;;  %v1398_v33 = vld [vmem:[#allocation7 + $0x6a0] sm:$0xff] }
 0x4d5   :  { %1976 = vmatmul.msk.f32.gmra.mxu3 %vm165_vm0, %v2425_v25  ;;  %v977_v30 = vadd.f32 %v974_v2, %v962_v27  ;;  %v1309_v27 = vld [vmem:[#allocation7 + $0x650] sm:$0xff] }
 0x4d6   :  { %v2056_v32 = vpop.eup %2055  ;;  %1249 = vmatpush.msrb.mxu0 %v1238_v28  ;;  %1326 = vmatpush.msra.mxu3 %v1312_v17  ;;  %v1397_v17 = vld [vmem:[#allocation7 + $0x660] sm:$0xff] }
 0x4d7   :  { %v1962_v38 = vadd.f32 -0.5, %v977_v30  ;;  %v966_v39 = vmul.f32 %v2056_v32, %v2056_v32  ;;  %v1307_v32 = vld [vmem:[#allocation7 + $0x5c0] sm:$0xff] }
 0x4d8   :  { %1250 = vmatpush.msrb.mxu0 %v1237_v31  ;;  %1327 = vmatpush.msra.mxu3 %v1311_v20  ;;  %v1392_v20 = vld [vmem:[#allocation7 + $0x5c8] sm:$0xff] }
 0x4d9   :  { %v996_v42 = vsel %vm992_vm3, %v1962_v38, 0.0  ;;  %v972_v48 = vadd.f32 %v969_v36, %v966_v39 }
 0x4da   :  { %999 = vadd.xlane.f32.xlu0 %v996_v42  ;;  %1251 = vmatpush.msrb.mxu0 %v1236_v37  ;;  %v1306_v37 = vld [vmem:[#allocation7 + $0x578] sm:$0xff]  ;;  %v1303_v42 = vld [vmem:[#allocation7 + $0x4a0] sm:$0xff] }
 0x4db   :  { %1973 = vmatmul.msk.f32.gmra.mxu0 %vm165_vm0, %v1029_v40  ;;  %v975_v46 = vmul.f32 0.038503036, %v972_v48  ;;  %1328 = vmatpush.msra.mxu3 %v1310_v23  ;;  %v1305_v40 = vld [vmem:[#allocation7 + $0x530] sm:$0xff]  ;;  %v1391_v23 = vld [vmem:[#allocation7 + $0x588] sm:$0xff] }
 0x4dc   :  { %1252 = vmatpush.msrb.mxu0 %v1235_v44  ;;  %v2043_v44 = vld [vmem:[#allocation10 + $0xa] ss:$0 sm:$0xff] }
 0x4dd   :  { %v978_v47 = vadd.f32 %v975_v46, %v963_v45  ;;  %1329 = vmatpush.msra.mxu3 %v1309_v27  ;;  %v1386_v27 = vld [vmem:[#allocation7 + $0x4f0] sm:$0xff] }
 0x4de   :  { %1253 = vmatpush.msrb.mxu0 %v1234_v14 }
 0x4df   :  { %v1963_v50 = vadd.f32 -0.5, %v978_v47  ;;  %1330 = vmatpush.msra.mxu3 %v1308_v29  ;;  %v1385_v29 = vld [vmem:[#allocation7 + $0x4b0] sm:$0xff] }
 0x4e0   :  { %1254 = vmatpush.msrb.mxu0 %v1233_v49 }
 0x4e1   :  { %v997_v51 = vsel %vm992_vm3, %v1963_v50, 0.0  ;;  %1331 = vmatpush.msra.mxu3 %v1307_v32 }
 0x4e2   :  { %1001 = vadd.xlane.f32.xlu0 %v997_v51  ;;  %1255 = vmatpush.msrb.mxu0 %v1232_v53 }
 0x4e3   :  { %1332 = vmatpush.msra.mxu3 %v1306_v37 }
 0x4e4   :  { %1256 = vmatpush.msrb.mxu0 %v1231_v55 }
 0x4e5   :  { %1333 = vmatpush.msra.mxu3 %v1305_v40 }
 0x4e6   :  { %1257 = vmatpush.msrb.mxu0 %v1230_v57 }
 0x4e7   :  { %1334 = vmatpush.msra.mxu3 %v1304_v41 }
 0x4e8   :  { %1258 = vmatpush.msrb.mxu0 %v1229_v59  ;;  %v1415_v59 = vld [vmem:[#allocation7 + $0x8e8] sm:$0xff] }
 0x4e9   :  { %1335 = vmatpush.msra.mxu3 %v1303_v42  ;;  %1443 = vmatpush.msra.mxu2 %v1415_v59  ;;  %v1632_v59 = vld [vmem:[#allocation7 + $0x7d8] sm:$0xff] }
 0x4ea   :  { %1259 = vmatpush.msrb.mxu0 %v1228_v60  ;;  %v1412_v60 = vld [vmem:[#allocation7 + $0x898] sm:$0xff] }
 0x4ec   :  { %1417 = vmatpush.msra.mxu0 %v1414_v58  ;;  %v1633_v58 = vld [vmem:[#allocation7 + $0x818] sm:$0xff] }
 0x4ee   :  { %1418 = vmatpush.msra.mxu0 %v1412_v60  ;;  %v1631_v60 = vld [vmem:[#allocation7 + $0x7d0] sm:$0xff] }
 0x4f0   :  { %1419 = vmatpush.msra.mxu0 %v1410_v63 }
 0x548   :  { %v1194_v1 = vpop.f32.mrf.mxu3  ;;  %v1104_v3 = vpop.f32.mrf.mxu0 }
 0x549   :  { %v1195_v6 = vadd.f32 %v2041_v61, %v1194_v1  ;;  %v1105_v7 = vadd.f32 %v2042_v62, %v1104_v3  ;;  %v1408_v1 = vld [vmem:[#allocation7 + $0x808] sm:$0xff]  ;;  %v1409_v3 = vld [vmem:[#allocation7 + $0x810] sm:$0xff] }
 0x54a   :  { %1420 = vmatpush.msra.mxu0 %v1408_v1  ;;  %v1575_v1 = vld [vmem:[#allocation8 + $0x2f0] sm:$0xff] }
 0x54b   :  { %vm1203_vm4 = vcmp.gt.f32.partialorder %v1195_v6, 0.0  ;;  %v1206_v9 = vmul.f32 0.2, %v1195_v6  ;;  %vm1113_vm5 = vcmp.gt.f32.partialorder %v1105_v7, 0.0  ;;  %v1116_v10 = vmul.f32 0.2, %v1105_v7 }
 0x54c   :  { %1421 = vmatpush.msra.mxu0 %v1406_v5  ;;  %v1573_v5 = vld [vmem:[#allocation8 + $0x2e0] sm:$0xff] }
 0x54d   :  { %v1209_v12 = vsel %vm1203_vm4, %v1195_v6, %v1206_v9  ;;  %v1119_v13 = vsel %vm1113_vm5, %v1105_v7, %v1116_v10  ;;  %v1407_v6 = vld [vmem:[#allocation7 + $0x7c8] sm:$0xff]  ;;  %v1404_v7 = vld [vmem:[#allocation7 + $0x778] sm:$0xff]  ;;  %v1402_v10 = vld [vmem:[#allocation7 + $0x730] sm:$0xff] }
 0x54e   :  { %1286 = vmatmul.f32.vlgmr.msrb.gmra.mxu2 %v1209_v12  ;;  %1260 = vmatmul.f32.vlgmr.msrb.gmra.mxu0 %v1119_v13  ;;  %v1400_v12 = vld [vmem:[#allocation7 + $0x6e8] sm:$0xff]  ;;  %v1401_v13 = vld [vmem:[#allocation7 + $0x6f0] sm:$0xff] }
 0x54f   :  { %1422 = vmatpush.msra.mxu0 %v1404_v7  ;;  %v1625_v7 = vld [vmem:[#allocation7 + $0x6f8] sm:$0xff] }
 0x550   :  { %v1197_v15 = vpop.f32.mrf.mxu3  ;;  %v1107_v16 = vpop.f32.mrf.mxu0 }
 0x551   :  { %v1198_v18 = vadd.f32 %v2041_v61, %v1197_v15  ;;  %v1108_v19 = vadd.f32 %v2042_v62, %v1107_v16  ;;  %1423 = vmatpush.msra.mxu0 %v1402_v10  ;;  %v1399_v15 = vld [vmem:[#allocation7 + $0x6a8] sm:$0xff]  ;;  %v1396_v16 = vld [vmem:[#allocation7 + $0x658] sm:$0xff]  ;;  %v1623_v10 = vld [vmem:[#allocation7 + $0x6b0] sm:$0xff] }
 0x553   :  { %vm1204_vm6 = vcmp.gt.f32.partialorder %v1198_v18, 0.0  ;;  %v1207_v21 = vmul.f32 0.2, %v1198_v18  ;;  %vm1114_vm7 = vcmp.gt.f32.partialorder %v1108_v19, 0.0  ;;  %v1117_v22 = vmul.f32 0.2, %v1108_v19  ;;  %1424 = vmatpush.msra.mxu0 %v1400_v12 }
 0x554   :  { %v1605_v12 = vld [vmem:[#allocation8 + $0x3e0] sm:$0xff] }
 0x555   :  { %v1210_v24 = vsel %vm1204_vm6, %v1198_v18, %v1207_v21  ;;  %v1120_v35 = vsel %vm1114_vm7, %v1108_v19, %v1117_v22  ;;  %1425 = vmatpush.msra.mxu0 %v1398_v33  ;;  %v1394_v18 = vld [vmem:[#allocation7 + $0x610] sm:$0xff]  ;;  %v1395_v19 = vld [vmem:[#allocation7 + $0x618] sm:$0xff]  ;;  %v1390_v22 = vld [vmem:[#allocation7 + $0x580] sm:$0xff] }
 0x556   :  { %1289 = vmatmul.f32.gmra.mxu2 %v1210_v24  ;;  %1263 = vmatmul.f32.gmra.mxu0 %v1120_v35  ;;  %v1393_v21 = vld [vmem:[#allocation7 + $0x5d0] sm:$0xff]  ;;  %v1388_v24 = vld [vmem:[#allocation7 + $0x538] sm:$0xff]  ;;  %v1389_v35 = vld [vmem:[#allocation7 + $0x540] sm:$0xff] }
 0x557   :  { %1426 = vmatpush.msra.mxu0 %v1396_v16  ;;  %v1571_v33 = vld [vmem:[#allocation8 + $0x2d0] sm:$0xff] }
 0x558   :  { %v1200_v2 = vpop.f32.mrf.mxu3  ;;  %v1110_v28 = vpop.f32.mrf.mxu0  ;;  %v1603_v16 = vld [vmem:[#allocation8 + $0x3d0] sm:$0xff] }
 0x559   :  { %v1201_v30 = vadd.f32 %v2041_v61, %v1200_v2  ;;  %v1111_v31 = vadd.f32 %v2042_v62, %v1110_v28  ;;  %v1413_v61 = vld [vmem:[#allocation7 + $0x8a0] sm:$0xff]  ;;  %1427 = vmatpush.msra.mxu0 %v1394_v18  ;;  %v1387_v2 = vld [vmem:[#allocation7 + $0x4f8] sm:$0xff]  ;;  %v1384_v28 = vld [vmem:[#allocation7 + $0x4a8] sm:$0xff] }
 0x55a   :  { %1444 = vmatpush.msra.mxu2 %v1413_v61  ;;  %v1630_v61 = vld [vmem:[#allocation7 + $0x790] sm:$0xff]  ;;  %v1569_v18 = vld [vmem:[#allocation8 + $0x2c0] sm:$0xff] }
 0x55b   :  { %vm1205_vm8 = vcmp.gt.f32.partialorder %v1201_v30, 0.0  ;;  %v1208_v34 = vmul.f32 0.2, %v1201_v30  ;;  %vm1115_vm9 = vcmp.gt.f32.partialorder %v1111_v31, 0.0  ;;  %v1118_v36 = vmul.f32 0.2, %v1111_v31  ;;  %1428 = vmatpush.msra.mxu0 %v1392_v20 }
 0x55c   :  { %1445 = vmatpush.msra.mxu2 %v1411_v0  ;;  %v1628_v0 = vld [vmem:[#allocation7 + $0x748] sm:$0xff]  ;;  %v1617_v20 = vld [vmem:[#allocation7 + $0x5d8] sm:$0xff] }
 0x55d   :  { %v1211_v38 = vsel %vm1205_vm8, %v1201_v30, %v1208_v34  ;;  %v1121_v39 = vsel %vm1115_vm9, %v1111_v31, %v1118_v36  ;;  %1429 = vmatpush.msra.mxu0 %v1390_v22  ;;  %v2044_v30 = vld [vmem:[#allocation10 + $0xb] ss:$0 sm:$0xff]  ;;  %v1599_v22 = vld [vmem:[#allocation8 + $0x3b0] sm:$0xff] }
 0x55e   :  { %1292 = vmatmul.f32.gmra.mxu2 %v1211_v38  ;;  %1266 = vmatmul.f32.gmra.mxu0 %v1121_v39 }
 0x55f   :  { %1446 = vmatpush.msra.mxu2 %v1409_v3  ;;  %1430 = vmatpush.msra.mxu0 %v1388_v24  ;;  %v1627_v3 = vld [vmem:[#allocation7 + $0x740] sm:$0xff]  ;;  %v1614_v24 = vld [vmem:[#allocation7 + $0x550] sm:$0xff] }
 0x561   :  { %1447 = vmatpush.msra.mxu2 %v1407_v6  ;;  %1431 = vmatpush.msra.mxu0 %v1386_v27  ;;  %v1626_v6 = vld [vmem:[#allocation7 + $0x700] sm:$0xff]  ;;  %v1613_v27 = vld [vmem:[#allocation7 + $0x548] sm:$0xff] }
 0x563   :  { %1448 = vmatpush.msra.mxu2 %v1405_v8  ;;  %1432 = vmatpush.msra.mxu0 %v1384_v28  ;;  %v1624_v8 = vld [vmem:[#allocation7 + $0x6b8] sm:$0xff]  ;;  %v1612_v28 = vld [vmem:[#allocation7 + $0x508] sm:$0xff] }
 0x565   :  { %1449 = vmatpush.msra.mxu2 %v1403_v11  ;;  %v1622_v11 = vld [vmem:[#allocation7 + $0x670] sm:$0xff] }
 0x567   :  { %1450 = vmatpush.msra.mxu2 %v1401_v13  ;;  %v1621_v13 = vld [vmem:[#allocation7 + $0x668] sm:$0xff] }
 0x569   :  { %1451 = vmatpush.msra.mxu2 %v1399_v15  ;;  %v1620_v15 = vld [vmem:[#allocation7 + $0x628] sm:$0xff] }
 0x56b   :  { %1452 = vmatpush.msra.mxu2 %v1397_v17  ;;  %v1619_v17 = vld [vmem:[#allocation7 + $0x620] sm:$0xff] }
 0x56d   :  { %1453 = vmatpush.msra.mxu2 %v1395_v19  ;;  %v1618_v19 = vld [vmem:[#allocation7 + $0x5e0] sm:$0xff] }
 0x56f   :  { %1454 = vmatpush.msra.mxu2 %v1393_v21  ;;  %v1616_v21 = vld [vmem:[#allocation7 + $0x598] sm:$0xff] }
 0x571   :  { %1455 = vmatpush.msra.mxu2 %v1391_v23  ;;  %v1615_v23 = vld [vmem:[#allocation7 + $0x590] sm:$0xff] }
 0x573   :  { %1456 = vmatpush.msra.mxu2 %v1389_v35  ;;  %v1597_v35 = vld [vmem:[#allocation8 + $0x3a0] sm:$0xff] }
 0x575   :  { %1457 = vmatpush.msra.mxu2 %v1387_v2  ;;  %v1567_v2 = vld [vmem:[#allocation8 + $0x2b0] sm:$0xff] }
 0x577   :  { %1458 = vmatpush.msra.mxu2 %v1385_v29  ;;  %v1595_v29 = vld [vmem:[#allocation8 + $0x390] sm:$0xff] }
 0x5cb   :  { %v1261_v48 = vpop.f32.mrf.mxu0 }
 0x5d1   :  { %v1287_v45 = vpop.f32.mrf.mxu2 }
 0x5d2   :  { %v1288_v46 = vadd.f32 %v1287_v45, %v1261_v48 }
 0x5d3   :  { %v1264_v47 = vpop.f32.mrf.mxu0 }
 0x5d4   :  { %v1300_v14 = vadd.f32 %v2043_v44, %v1288_v46 }
 0x5d6   :  { %1336 = vmatmul.f32.vlgmr.msra.gmra.mxu3 %v1300_v14 }
 0x5d9   :  { %v1290_v49 = vpop.f32.mrf.mxu2 }
 0x5da   :  { %v1291_v50 = vadd.f32 %v1290_v49, %v1264_v47  ;;  %v1640_v47 = vld [vmem:[#allocation7 + $0x8f8] sm:$0xff]  ;;  %v1638_v49 = vld [vmem:[#allocation7 + $0x8b0] sm:$0xff] }
 0x5db   :  { %v1267_v53 = vpop.f32.mrf.mxu0  ;;  %1667 = vmatpush.msrb.mxu2 %v1640_v47  ;;  %v2075_v47 = vld [vmem:[%s2561_s0 + $0x18] sm:$0xff] }
 0x5dc   :  { %v1301_v51 = vadd.f32 %v2043_v44, %v1291_v50  ;;  %v1639_v50 = vld [vmem:[#allocation7 + $0x8f0] sm:$0xff] }
 0x5dd   :  { %1641 = vmatpush.msrb.mxu0 %v1639_v50  ;;  %1668 = vmatpush.msrb.mxu2 %v1638_v49  ;;  %v1587_v49 = vld [vmem:[#allocation8 + $0x350] sm:$0xff]  ;;  %v2487_v50 = vld [vmem:[#allocation8 + $0x3a8] sm:$0xff] }
 0x5de   :  { %1339 = vmatmul.f32.gmra.mxu3 %v1301_v51  ;;  %v1637_v51 = vld [vmem:[#allocation7 + $0x8a8] sm:$0xff] }
 0x5df   :  { %1642 = vmatpush.msrb.mxu0 %v1637_v51  ;;  %v2489_v51 = vld [vmem:[#allocation8 + $0x2b8] sm:$0xff] }
 0x5e1   :  { %v1293_v54 = vpop.f32.mrf.mxu2 }
 0x5e2   :  { %v1294_v55 = vadd.f32 %v1293_v54, %v1267_v53  ;;  %v1636_v54 = vld [vmem:[#allocation7 + $0x868] sm:$0xff] }
 0x5e3   :  { %1669 = vmatpush.msrb.mxu2 %v1636_v54  ;;  %v1585_v54 = vld [vmem:[#allocation8 + $0x340] sm:$0xff] }
 0x5e4   :  { %v1302_v56 = vadd.f32 %v2043_v44, %v1294_v55  ;;  %v1635_v55 = vld [vmem:[#allocation7 + $0x860] sm:$0xff] }
 0x5e5   :  { %1643 = vmatpush.msrb.mxu0 %v1635_v55  ;;  %v1596_v55 = vld [vmem:[#allocation8 + $0x398] sm:$0xff] }
 0x5e6   :  { %1342 = vmatmul.f32.gmra.mxu3 %v1302_v56 }
 0x5e7   :  { %1644 = vmatpush.msrb.mxu0 %v1633_v58  ;;  %v1555_v58 = vld [vmem:[#allocation8 + $0x250] sm:$0xff] }
 0x5e9   :  { %1645 = vmatpush.msrb.mxu0 %v1631_v60  ;;  %v1594_v60 = vld [vmem:[#allocation8 + $0x388] sm:$0xff] }
 0x659   :  { %v1337_v57 = vpop.f32.mrf.mxu3 }
 0x661   :  { %v1340_v62 = vpop.f32.mrf.mxu3 }
 0x669   :  { %v1343_v9 = vpop.f32.mrf.mxu3 }
 0x66a   :  { %1362 = vmatpush.msra.mxu1 %v1343_v9  ;;  %v1607_v9 = vld [vmem:[#allocation8 + $0x3f0] sm:$0xff] }
 0x66c   :  { %1363 = vmatpush.msra.mxu1 %v1340_v62  ;;  %v1629_v62 = vld [vmem:[#allocation7 + $0x788] sm:$0xff] }
 0x66d   :  { %1646 = vmatpush.msrb.mxu0 %v1629_v62  ;;  %v1553_v62 = vld [vmem:[#allocation8 + $0x240] sm:$0xff] }
 0x66e   :  { %1364 = vmatpush.msra.mxu1 %v1337_v57  ;;  %v1634_v57 = vld [vmem:[#allocation7 + $0x820] sm:$0xff] }
 0x66f   :  { %1977 = vmatmul.msk.f32.vlgmr.msra.gmra.mxu1 %vm165_vm0, %v2414_v52  ;;  %1670 = vmatpush.msrb.mxu2 %v1634_v57  ;;  %v2076_v57 = vld [vmem:[%s2561_s0 + $0x20] sm:$0xff] }
 0x670   :  { %1647 = vmatpush.msrb.mxu0 %v1627_v3  ;;  %v1551_v3 = vld [vmem:[#allocation8 + $0x230] sm:$0xff] }
 0x671   :  { %1671 = vmatpush.msrb.mxu2 %v1632_v59  ;;  %v1583_v59 = vld [vmem:[#allocation8 + $0x330] sm:$0xff] }
 0x672   :  { %1648 = vmatpush.msrb.mxu0 %v1625_v7  ;;  %v1579_v7 = vld [vmem:[#allocation8 + $0x310] sm:$0xff] }
 0x673   :  { %1672 = vmatpush.msrb.mxu2 %v1630_v61  ;;  %v2500_v61 = vld [vmem:[#allocation8 + $0x298] sm:$0xff] }
 0x674   :  { %1649 = vmatpush.msrb.mxu0 %v1623_v10  ;;  %v1549_v10 = vld [vmem:[#allocation8 + $0x220] sm:$0xff] }
 0x675   :  { %1673 = vmatpush.msrb.mxu2 %v1628_v0  ;;  %v2503_v0 = vld [vmem:[#allocation8 + $0x288] sm:$0xff] }
 0x676   :  { %1650 = vmatpush.msrb.mxu0 %v1621_v13  ;;  %v2077_v13 = vld [vmem:[%s2561_s0 + $0x28] sm:$0xff] }
 0x677   :  { %1978 = vmatmul.msk.f32.gmra.mxu1 %vm165_vm0, %v2418_v4  ;;  %1674 = vmatpush.msrb.mxu2 %v1626_v6  ;;  %v2506_v6 = vld [vmem:[#allocation8 + $0x278] sm:$0xff] }
 0x678   :  { %1651 = vmatpush.msrb.mxu0 %v1619_v17  ;;  %v1545_v17 = vld [vmem:[#allocation8 + $0x200] sm:$0xff] }
 0x679   :  { %1675 = vmatpush.msrb.mxu2 %v1624_v8  ;;  %v1588_v8 = vld [vmem:[#allocation8 + $0x358] sm:$0xff] }
 0x67a   :  { %1652 = vmatpush.msrb.mxu0 %v1617_v20  ;;  %v1548_v20 = vld [vmem:[#allocation8 + $0x218] sm:$0xff] }
 0x67b   :  { %1676 = vmatpush.msrb.mxu2 %v1622_v11  ;;  %v1577_v11 = vld [vmem:[#allocation8 + $0x300] sm:$0xff] }
 0x67c   :  { %1653 = vmatpush.msrb.mxu0 %v1615_v23  ;;  %v1580_v23 = vld [vmem:[#allocation8 + $0x318] sm:$0xff] }
 0x67d   :  { %1677 = vmatpush.msrb.mxu2 %v1620_v15  ;;  %v1584_v15 = vld [vmem:[#allocation8 + $0x338] sm:$0xff] }
 0x67e   :  { %1654 = vmatpush.msrb.mxu0 %v1613_v27 }
 0x67f   :  { %1979 = vmatmul.msk.f32.gmra.mxu1 %vm165_vm0, %v2425_v25  ;;  %1678 = vmatpush.msrb.mxu2 %v1618_v19  ;;  %v1552_v19 = vld [vmem:[#allocation8 + $0x238] sm:$0xff] }
 0x681   :  { %1679 = vmatpush.msrb.mxu2 %v1616_v21  ;;  %v1582_v21 = vld [vmem:[#allocation8 + $0x328] sm:$0xff] }
 0x683   :  { %1680 = vmatpush.msrb.mxu2 %v1614_v24  ;;  %v1578_v24 = vld [vmem:[#allocation8 + $0x308] sm:$0xff] }
 0x685   :  { %1681 = vmatpush.msrb.mxu2 %v1612_v28 }
 0x6ec   :  { %v1366_v31 = vpop.f32.mrf.mxu1 }
 0x6ed   :  { %v1367_v32 = vadd.f32 %v2044_v30, %v1366_v31  ;;  %v1565_v31 = vld [vmem:[#allocation8 + $0x2a0] sm:$0xff] }
 0x6ef   :  { %vm1375_vm10 = vcmp.gt.f32.partialorder %v1367_v32, 0.0  ;;  %v1378_v34 = vmul.f32 0.2, %v1367_v32 }
 0x6f1   :  { %v1381_v36 = vsel %vm1375_vm10, %v1367_v32, %v1378_v34  ;;  %v1610_v32 = vld [vmem:[#allocation7 + $0x4c0] sm:$0xff]  ;;  %v2456_v34 = vld [vmem:[#allocation8 + $0x3f8] sm:$0xff] }
 0x6f2   :  { %1433 = vmatmul.f32.vlgmr.msra.gmra.mxu0 %v1381_v36  ;;  %1459 = vmatmul.f32.vlgmr.msra.gmra.mxu2 %v1381_v36  ;;  %v1609_v36 = vld [vmem:[#allocation7 + $0x4b8] sm:$0xff] }
 0x6f3   :  { %1682 = vmatpush.msrb.mxu2 %v1610_v32 }
 0x6f4   :  { %v1369_v38 = vpop.f32.mrf.mxu1 }
 0x6f5   :  { %v1370_v39 = vadd.f32 %v2044_v30, %v1369_v38  ;;  %v2458_v38 = vld [vmem:[#allocation8 + $0x3e8] sm:$0xff]  ;;  %1771 = vmatpush.msra.mxu2 %v2456_v34 }
 0x6f7   :  { %vm1376_vm11 = vcmp.gt.f32.partialorder %v1370_v39, 0.0  ;;  %v1379_v37 = vmul.f32 0.2, %v1370_v39  ;;  %1772 = vmatpush.msra.mxu2 %v2458_v38 }
 0x6f9   :  { %v1382_v40 = vsel %vm1376_vm11, %v1370_v39, %v1379_v37  ;;  %v2460_v39 = vld [vmem:[#allocation8 + $0x2f8] sm:$0xff]  ;;  %v1563_v37 = vld [vmem:[#allocation8 + $0x290] sm:$0xff] }
 0x6fa   :  { %1436 = vmatmul.f32.gmra.mxu0 %v1382_v40  ;;  %1462 = vmatmul.f32.gmra.mxu2 %v1382_v40  ;;  %v1591_v40 = vld [vmem:[#allocation8 + $0x370] sm:$0xff] }
 0x6fc   :  { %v1372_v41 = vpop.f32.mrf.mxu1 }
 0x6fd   :  { %v1373_v42 = vadd.f32 %v2044_v30, %v1372_v41  ;;  %v1611_v30 = vld [vmem:[#allocation7 + $0x500] sm:$0xff]  ;;  %v2465_v41 = vld [vmem:[#allocation8 + $0x3d8] sm:$0xff] }
 0x6fe   :  { %1655 = vmatpush.msrb.mxu0 %v1611_v30  ;;  %1773 = vmatpush.msra.mxu2 %v2465_v41 }
 0x6ff   :  { %vm1377_vm12 = vcmp.gt.f32.partialorder %v1373_v42, 0.0  ;;  %v1380_v48 = vmul.f32 0.2, %v1373_v42 }
 0x700   :  { %1656 = vmatpush.msrb.mxu0 %v1609_v36 }
 0x701   :  { %v1383_v44 = vsel %vm1377_vm12, %v1373_v42, %v1380_v48  ;;  %v2467_v42 = vld [vmem:[#allocation8 + $0x2e8] sm:$0xff]  ;;  %v1561_v48 = vld [vmem:[#allocation8 + $0x280] sm:$0xff] }
 0x702   :  { %1439 = vmatmul.f32.gmra.mxu0 %v1383_v44  ;;  %1465 = vmatmul.f32.gmra.mxu2 %v1383_v44  ;;  %v2472_v44 = vld [vmem:[#allocation8 + $0x3c8] sm:$0xff] }
 0x703   :  { %1745 = vmatpush.msra.mxu0 %v2460_v39  ;;  %1774 = vmatpush.msra.mxu2 %v2472_v44 }
 0x705   :  { %1746 = vmatpush.msra.mxu0 %v2467_v42 }
 0x70a   :  { %1683 = vmatmul.f32.vlgmr.msrb.gmra.mxu2 %v2384_v43  ;;  %v2480_v43 = vld [vmem:[#allocation8 + $0x2c8] sm:$0xff]  ;;  %1657 = vmatmul.f32.vlgmr.msrb.gmra.mxu0 %v2075_v47 }
 0x712   :  { %1686 = vmatmul.f32.gmra.mxu2 %v2076_v57  ;;  %1660 = vmatmul.f32.gmra.mxu0 %v2076_v57 }
 0x71a   :  { %1689 = vmatmul.f32.gmra.mxu2 %v2077_v13  ;;  %1663 = vmatmul.f32.gmra.mxu0 %v2077_v13 }
 0x76f   :  { %v1434_v45 = vpop.f32.mrf.mxu0 }
 0x775   :  { %v1460_v46 = vpop.f32.mrf.mxu2 }
 0x777   :  { %v1437_v14 = vpop.f32.mrf.mxu0 }
 0x77d   :  { %v1463_v53 = vpop.f32.mrf.mxu2 }
 0x77f   :  { %v1440_v56 = vpop.f32.mrf.mxu0 }
 0x780   :  { %1487 = vmatpush.msrb.mxu1 %v1440_v56  ;;  %v2493_v56 = vld [vmem:[#allocation8 + $0x2a8] sm:$0xff] }
 0x782   :  { %1488 = vmatpush.msrb.mxu1 %v1437_v14  ;;  %v2478_v14 = vld [vmem:[#allocation8 + $0x3b8] sm:$0xff] }
 0x783   :  { %1775 = vmatpush.msra.mxu2 %v2478_v14 }
 0x784   :  { %1489 = vmatpush.msrb.mxu1 %v1434_v45  ;;  %v2474_v45 = vld [vmem:[#allocation8 + $0x2d8] sm:$0xff] }
 0x785   :  { %v1466_v63 = vpop.f32.mrf.mxu2  ;;  %1980 = vmatmul.msk.f32.vlgmr.msrb.gmra.mxu1 %vm165_vm0, %v2414_v52  ;;  %1747 = vmatpush.msra.mxu0 %v2474_v45 }
 0x786   :  { %1513 = vmatpush.msrb.mxu3 %v1466_v63  ;;  %1693 = vmatpush.msra.mxu1 %v1575_v1  ;;  %v1592_v63 = vld [vmem:[#allocation8 + $0x378] sm:$0xff]  ;;  %v1581_v1 = vld [vmem:[#allocation8 + $0x320] sm:$0xff] }
 0x787   :  { %1748 = vmatpush.msra.mxu0 %v2480_v43  ;;  %1776 = vmatpush.msra.mxu2 %v2487_v50 }
 0x788   :  { %1514 = vmatpush.msrb.mxu3 %v1463_v53  ;;  %1694 = vmatpush.msra.mxu1 %v1573_v5  ;;  %v1557_v53 = vld [vmem:[#allocation8 + $0x260] sm:$0xff]  ;;  %v1590_v5 = vld [vmem:[#allocation8 + $0x368] sm:$0xff] }
 0x789   :  { %1749 = vmatpush.msra.mxu0 %v2489_v51  ;;  %1777 = vmatpush.msra.mxu2 %v1596_v55 }
 0x78a   :  { %1515 = vmatpush.msrb.mxu3 %v1460_v46  ;;  %1695 = vmatpush.msra.mxu1 %v1571_v33  ;;  %v1559_v46 = vld [vmem:[#allocation8 + $0x270] sm:$0xff]  ;;  %v1556_v33 = vld [vmem:[#allocation8 + $0x258] sm:$0xff] }
 0x78b   :  { %1983 = vmatmul.msk.f32.vlgmr.msrb.gmra.mxu3 %vm165_vm0, %v2414_v52  ;;  %v1601_v52 = vld [vmem:[#allocation8 + $0x3c0] sm:$0xff]  ;;  %1750 = vmatpush.msra.mxu0 %v2493_v56 }
 0x78c   :  { %1719 = vmatpush.msra.mxu3 %v1607_v9  ;;  %1696 = vmatpush.msra.mxu1 %v1569_v18  ;;  %v1558_v9 = vld [vmem:[#allocation8 + $0x268] sm:$0xff] }
 0x78d   :  { %1981 = vmatmul.msk.f32.gmra.mxu1 %vm165_vm0, %v2418_v4  ;;  %1778 = vmatpush.msra.mxu2 %v1594_v60  ;;  %v1554_v18 = vld [vmem:[#allocation8 + $0x248] sm:$0xff] }
 0x78e   :  { %1720 = vmatpush.msra.mxu3 %v1605_v12  ;;  %1697 = vmatpush.msra.mxu1 %v1567_v2  ;;  %v1586_v12 = vld [vmem:[#allocation8 + $0x348] sm:$0xff] }
 0x78f   :  { %1751 = vmatpush.msra.mxu0 %v2500_v61  ;;  %1779 = vmatpush.msra.mxu2 %v1592_v63 }
 0x790   :  { %1721 = vmatpush.msra.mxu3 %v1603_v16  ;;  %1698 = vmatpush.msra.mxu1 %v1565_v31  ;;  %v1547_v16 = vld [vmem:[#allocation8 + $0x210] sm:$0xff] }
 0x791   :  { %1752 = vmatpush.msra.mxu0 %v2503_v0  ;;  %1780 = vmatpush.msra.mxu2 %v1590_v5 }
 0x792   :  { %1722 = vmatpush.msra.mxu3 %v1601_v52  ;;  %1699 = vmatpush.msra.mxu1 %v1563_v37  ;;  %v1550_v52 = vld [vmem:[#allocation8 + $0x228] sm:$0xff] }
 0x793   :  { %1984 = vmatmul.msk.f32.gmra.mxu3 %vm165_vm0, %v2418_v4  ;;  %v1593_v4 = vld [vmem:[#allocation8 + $0x380] sm:$0xff]  ;;  %1753 = vmatpush.msra.mxu0 %v2506_v6 }
 0x794   :  { %1723 = vmatpush.msra.mxu3 %v1599_v22  ;;  %1700 = vmatpush.msra.mxu1 %v1561_v48  ;;  %v1546_v22 = vld [vmem:[#allocation8 + $0x208] sm:$0xff] }
 0x795   :  { %1982 = vmatmul.msk.f32.gmra.mxu1 %vm165_vm0, %v2425_v25  ;;  %1781 = vmatpush.msra.mxu2 %v1588_v8 }
 0x796   :  { %1724 = vmatpush.msra.mxu3 %v1597_v35  ;;  %1701 = vmatpush.msra.mxu1 %v1559_v46  ;;  %v1416_v35 = vld [vmem:[#allocation10 + $0xc] sm:$0x3] }
 0x797   :  { %1754 = vmatpush.msra.mxu0 %v1558_v9  ;;  %1782 = vmatpush.msra.mxu2 %v1586_v12  ;;  %v1470_v27 = vperm.slane %v1416_v35, 0  ;;  %v1471_v32 = vperm.slane %v1416_v35, 1 }
 0x798   :  { %1725 = vmatpush.msra.mxu3 %v1595_v29  ;;  %1702 = vmatpush.msra.mxu1 %v1557_v53  ;;  %v1684_v53 = vpop.f32.mrf.mxu2 }
 0x799   :  { %1755 = vmatpush.msra.mxu0 %v1556_v33  ;;  %1783 = vmatpush.msra.mxu2 %v1584_v15 }
 0x79a   :  { %1726 = vmatpush.msra.mxu3 %v1593_v4  ;;  %1703 = vmatpush.msra.mxu1 %v1555_v58 }
 0x79b   :  { %1985 = vmatmul.msk.f32.gmra.mxu3 %vm165_vm0, %v2425_v25  ;;  %v1589_v25 = vld [vmem:[#allocation8 + $0x360] sm:$0xff]  ;;  %1756 = vmatpush.msra.mxu0 %v1554_v18 }
 0x79c   :  { %1727 = vmatpush.msra.mxu3 %v1591_v40  ;;  %1704 = vmatpush.msra.mxu1 %v1553_v62 }
 0x79d   :  { %1757 = vmatpush.msra.mxu0 %v1552_v19  ;;  %1784 = vmatpush.msra.mxu2 %v1582_v21 }
 0x79e   :  { %1728 = vmatpush.msra.mxu3 %v1589_v25  ;;  %1705 = vmatpush.msra.mxu1 %v1551_v3 }
 0x79f   :  { %1758 = vmatpush.msra.mxu0 %v1550_v52  ;;  %1785 = vmatpush.msra.mxu2 %v1580_v23 }
 0x7a0   :  { %1729 = vmatpush.msra.mxu3 %v1587_v49  ;;  %1706 = vmatpush.msra.mxu1 %v1549_v10 }
 0x7a1   :  { %1759 = vmatpush.msra.mxu0 %v1548_v20  ;;  %1786 = vmatpush.msra.mxu2 %v1578_v24 }
 0x7a2   :  { %1730 = vmatpush.msra.mxu3 %v1585_v54  ;;  %1707 = vmatpush.msra.mxu1 %v1547_v16 }
 0x7a3   :  { %1760 = vmatpush.msra.mxu0 %v1546_v22 }
 0x7a4   :  { %1731 = vmatpush.msra.mxu3 %v1583_v59  ;;  %1708 = vmatpush.msra.mxu1 %v1545_v17 }
 0x7a6   :  { %1732 = vmatpush.msra.mxu3 %v1581_v1  ;;  %1992 = vmatpush.msrb.mxu1 %v2460_v39 }
 0x7a8   :  { %1733 = vmatpush.msra.mxu3 %v1579_v7  ;;  %1993 = vmatpush.msrb.mxu1 %v2467_v42 }
 0x7aa   :  { %1734 = vmatpush.msra.mxu3 %v1577_v11  ;;  %1994 = vmatpush.msrb.mxu1 %v2474_v45 }
 0x7ac   :  { %2008 = vmatpush.msrb.mxu3 %v2456_v34  ;;  %1995 = vmatpush.msrb.mxu1 %v2480_v43 }
 0x7ae   :  { %2009 = vmatpush.msrb.mxu3 %v2458_v38  ;;  %1996 = vmatpush.msrb.mxu1 %v2489_v51  ;;  %v1658_v51 = vpop.f32.mrf.mxu0 }
 0x7b0   :  { %2010 = vmatpush.msrb.mxu3 %v2465_v41  ;;  %1997 = vmatpush.msrb.mxu1 %v2493_v56 }
 0x7b2   :  { %2011 = vmatpush.msrb.mxu3 %v2472_v44  ;;  %1998 = vmatpush.msrb.mxu1 %v2500_v61 }
 0x7b4   :  { %2012 = vmatpush.msrb.mxu3 %v2478_v14  ;;  %1999 = vmatpush.msrb.mxu1 %v2503_v0 }
 0x7b6   :  { %2013 = vmatpush.msrb.mxu3 %v2487_v50  ;;  %2000 = vmatpush.msrb.mxu1 %v2506_v6  ;;  %v1661_v54 = vpop.f32.mrf.mxu0 }
 0x7b8   :  { %2014 = vmatpush.msrb.mxu3 %v1596_v55  ;;  %2001 = vmatpush.msrb.mxu1 %v1558_v9  ;;  %v1687_v55 = vpop.f32.mrf.mxu2 }
 0x7ba   :  { %2015 = vmatpush.msrb.mxu3 %v1594_v60  ;;  %2002 = vmatpush.msrb.mxu1 %v1556_v33  ;;  %v1797_v60 = vld [vmem:[#allocation10 + $0xe] sm:$0x3] }
 0x7bb   :  { %v1800_v0 = vperm.slane %v1797_v60, 1 }
 0x7bc   :  { %2016 = vmatpush.msrb.mxu3 %v1592_v63  ;;  %2003 = vmatpush.msrb.mxu1 %v1554_v18  ;;  %v1799_v63 = vperm.slane %v1797_v60, 0 }
 0x7be   :  { %2017 = vmatpush.msrb.mxu3 %v1590_v5  ;;  %2004 = vmatpush.msrb.mxu1 %v1552_v19  ;;  %v1664_v56 = vpop.f32.mrf.mxu0 }
 0x7c0   :  { %2018 = vmatpush.msrb.mxu3 %v1588_v8  ;;  %2005 = vmatpush.msrb.mxu1 %v1550_v52  ;;  %v1690_v58 = vpop.f32.mrf.mxu2 }
 0x7c2   :  { %2019 = vmatpush.msrb.mxu3 %v1586_v12  ;;  %2006 = vmatpush.msrb.mxu1 %v1548_v20 }
 0x7c4   :  { %2020 = vmatpush.msrb.mxu3 %v1584_v15  ;;  %2007 = vmatpush.msrb.mxu1 %v1546_v22 }
 0x7c6   :  { %2021 = vmatpush.msrb.mxu3 %v1582_v21 }
 0x7c8   :  { %2022 = vmatpush.msrb.mxu3 %v1580_v23 }
 0x7ca   :  { %2023 = vmatpush.msrb.mxu3 %v1578_v24 }
 0x802   :  { %v1491_v2 = vpop.f32.mrf.mxu1 }
 0x803   :  { %v1492_v28 = vadd.f32 %v1491_v2, %v1470_v27 }
 0x805   :  { %vm1526_vm0 = vcmp.gt.f32.partialorder %v1492_v28, 0.0  ;;  %v1532_v29 = vmul.f32 0.2, %v1492_v28 }
 0x807   :  { %v1538_v30 = vsel %vm1526_vm0, %v1492_v28, %v1532_v29 }
 0x808   :  { %1709 = vmatmul.f32.vlgmr.msra.gmra.mxu1 %v1538_v30  ;;  %1761 = vmatmul.f32.vlgmr.msra.gmra.mxu0 %v1538_v30 }
 0x80a   :  { %v1494_v31 = vpop.f32.mrf.mxu1 }
 0x80b   :  { %v1495_v4 = vadd.f32 %v1494_v31, %v1470_v27 }
 0x80d   :  { %v1534_v34 = vmul.f32 0.2, %v1495_v4  ;;  %vm1528_vm13 = vcmp.gt.f32.partialorder %v1495_v4, 0.0 }
 0x80e   :  { %v1517_v36 = vpop.f32.mrf.mxu3 }
 0x80f   :  { %v1518_v38 = vadd.f32 %v1517_v36, %v1471_v32  ;;  %v1540_v39 = vsel %vm1528_vm13, %v1495_v4, %v1534_v34 }
 0x810   :  { %1712 = vmatmul.f32.gmra.mxu1 %v1540_v39  ;;  %1764 = vmatmul.f32.gmra.mxu0 %v1540_v39 }
 0x811   :  { %vm1527_vm14 = vcmp.gt.f32.partialorder %v1518_v38, 0.0  ;;  %v1533_v37 = vmul.f32 0.2, %v1518_v38 }
 0x812   :  { %v1497_v40 = vpop.f32.mrf.mxu1 }
 0x813   :  { %v1539_v41 = vsel %vm1527_vm14, %v1518_v38, %v1533_v37  ;;  %v1498_v42 = vadd.f32 %v1497_v40, %v1470_v27 }
 0x814   :  { %1735 = vmatmul.f32.vlgmr.msra.gmra.mxu3 %v1539_v41  ;;  %1787 = vmatmul.f32.vlgmr.msra.gmra.mxu2 %v1539_v41 }
 0x815   :  { %v1536_v48 = vmul.f32 0.2, %v1498_v42  ;;  %vm1530_vm15 = vcmp.gt.f32.partialorder %v1498_v42, 0.0 }
 0x816   :  { %v1520_v44 = vpop.f32.mrf.mxu3 }
 0x817   :  { %v1521_v45 = vadd.f32 %v1520_v44, %v1471_v32  ;;  %v1542_v25 = vsel %vm1530_vm15, %v1498_v42, %v1536_v48 }
 0x818   :  { %1715 = vmatmul.f32.gmra.mxu1 %v1542_v25 }
 0x819   :  { %v1535_v46 = vmul.f32 0.2, %v1521_v45  ;;  %vm1529_vm1 = vcmp.gt.f32.partialorder %v1521_v45, 0.0 }
 0x81b   :  { %v1541_v14 = vsel %vm1529_vm1, %v1521_v45, %v1535_v46 }
 0x81c   :  { %1738 = vmatmul.f32.gmra.mxu3 %v1541_v14  ;;  %1790 = vmatmul.f32.gmra.mxu2 %v1541_v14 }
 0x81e   :  { %v1523_v43 = vpop.f32.mrf.mxu3 }
 0x81f   :  { %v1524_v47 = vadd.f32 %v1523_v43, %v1471_v32 }
 0x820   :  { %1767 = vmatmul.f32.vlgmr.msrb.gmra.mxu1 %v1542_v25 }
 0x821   :  { %v1537_v49 = vmul.f32 0.2, %v1524_v47  ;;  %vm1531_vm2 = vcmp.gt.f32.partialorder %v1524_v47, 0.0 }
 0x823   :  { %v1543_v50 = vsel %vm1531_vm2, %v1524_v47, %v1537_v49 }
 0x824   :  { %1741 = vmatmul.f32.gmra.mxu3 %v1543_v50 }
 0x82c   :  { %1793 = vmatmul.f32.vlgmr.msrb.gmra.mxu3 %v1543_v50 }
 0x885   :  { %v1710_v57 = vpop.f32.mrf.mxu1  ;;  %v1762_v59 = vpop.f32.mrf.mxu0 }
 0x886   :  { %v1711_v61 = vadd.f32 %v1710_v57, %v1658_v51  ;;  %v1763_v62 = vadd.f32 %v1762_v59, %v1684_v53 }
 0x88d   :  { %v1713_v1 = vpop.f32.mrf.mxu1  ;;  %v1765_v10 = vpop.f32.mrf.mxu0 }
 0x88e   :  { %v1714_v13 = vadd.f32 %v1713_v1, %v1661_v54  ;;  %v1766_v33 = vadd.f32 %v1765_v10, %v1687_v55 }
 0x895   :  { %v1716_v52 = vpop.f32.mrf.mxu1 }
 0x896   :  { %v1717_v24 = vadd.f32 %v1716_v52, %v1664_v56 }
 0x897   :  { %v1736_v3 = vpop.f32.mrf.mxu3  ;;  %v1788_v5 = vpop.f32.mrf.mxu2 }
 0x898   :  { %v1737_v6 = vadd.f32 %v1736_v3, %v1711_v61  ;;  %v1789_v7 = vadd.f32 %v1788_v5, %v1763_v62 }
 0x89a   :  { %v2528_v8 = vadd.f32 %v1799_v63, %v1737_v6  ;;  %v1804_v9 = vadd.f32 %v1800_v0, %v1789_v7 }
 0x89c   :  { %1986 = vst [vmem:[%s2568_s7 + $0x18] sm:$0xff] %v2528_v8  ;;  %v1816_v11 = vand.u32 2147483647, %v1804_v9  ;;  %v1813_v25 = vmax.f32 %v1804_v9, 0.0 }
 0x89d   :  { %v1768_v32 = vpop.f32.mrf.mxu1 }
 0x89e   :  { %v1819_v12 = vsub.f32 0.0, %v1816_v11  ;;  %v1769_v34 = vadd.f32 %v1768_v32, %v1690_v58 }
 0x89f   :  { %v1739_v15 = vpop.f32.mrf.mxu3  ;;  %v1791_v16 = vpop.f32.mrf.mxu2 }
 0x8a0   :  { %v1822_v17 = vmul.f32 1.442695, %v1819_v12  ;;  %v1740_v18 = vadd.f32 %v1739_v15, %v1714_v13  ;;  %v1792_v19 = vadd.f32 %v1791_v16, %v1766_v33  ;;  %v1882_v15 = vmul.f32 %v2528_v8, %v2528_v8 }
 0x8a2   :  { %2057 = vpow2.f32 %v1822_v17  ;;  %v2534_v20 = vadd.f32 %v1799_v63, %v1740_v18  ;;  %v1806_v21 = vadd.f32 %v1800_v0, %v1792_v19 }
 0x8a4   :  { %1987 = vst [vmem:[%s2568_s7 + $0x20] sm:$0xff] %v2534_v20  ;;  %v1817_v22 = vand.u32 2147483647, %v1806_v21  ;;  %v1814_v58 = vmax.f32 %v1806_v21, 0.0 }
 0x8a6   :  { %v1820_v23 = vsub.f32 0.0, %v1817_v22 }
 0x8a7   :  { %v1742_v35 = vpop.f32.mrf.mxu3 }
 0x8a8   :  { %v2058_v27 = vpop.eup %2057  ;;  %v1824_v2 = vmul.f32 1.442695, %v1820_v23  ;;  %v1743_v28 = vadd.f32 %v1742_v35, %v1717_v24 }
 0x8a9   :  { %v1828_v29 = vadd.f32 1.0, %v2058_v27  ;;  %v1831_v30 = vmul.f32 -0.5, %v2058_v27  ;;  %v1834_v36 = vand.u32 2147483647, %v2058_v27 }
 0x8aa   :  { %2059 = vpow2.f32 %v1824_v2  ;;  %v2540_v31 = vadd.f32 %v1799_v63, %v1743_v28  ;;  %v1883_v28 = vmul.f32 %v2534_v20, %v2534_v20 }
 0x8ab   :  { %2061 = vlog2.f32 %v1828_v29  ;;  %v1832_v4 = vadd.f32 1.0, %v1831_v30  ;;  %vm1835_vm4 = vcmp.lt.f32.partialorder %v1834_v36, 0.0004427343 }
 0x8ac   :  { %1988 = vst [vmem:[%s2568_s7 + $0x28] sm:$0xff] %v2540_v31  ;;  %s2242_s7 = smov [#allocation11]  }
 0x8ad   :  { %v1833_v48 = vmul.f32 %v2058_v27, %v1832_v4  ;;  %s1931_s21 = sshll.u32 %s2242_s7, 4  ;;  %s1932_s21 = int_to_ptr.vmem [resolvable:$true] %s1931_s21 }
 0x8af   :  { %v1794_v38 = vpop.f32.mrf.mxu3 }
 0x8b0   :  { %v2060_v39 = vpop.eup %2059  ;;  %v1795_v37 = vadd.f32 %v1794_v38, %v1769_v34 }
 0x8b1   :  { %v2062_v40 = vpop.eup %2061  ;;  %v1837_v41 = vadd.f32 1.0, %v2060_v39  ;;  %v1840_v44 = vmul.f32 -0.5, %v2060_v39  ;;  %v1843_v51 = vand.u32 2147483647, %v2060_v39 }
 0x8b2   :  { %v1830_v42 = vmul.f32 0.6931472, %v2062_v40  ;;  %v1808_v45 = vadd.f32 %v1800_v0, %v1795_v37 }
 0x8b3   :  { %2063 = vlog2.f32 %v1837_v41  ;;  %v1841_v47 = vadd.f32 1.0, %v1840_v44  ;;  %vm1844_vm5 = vcmp.lt.f32.partialorder %v1843_v51, 0.0004427343 }
 0x8b4   :  { %v1836_v46 = vsel %vm1835_vm4, %v1833_v48, %v1830_v42  ;;  %v1818_v14 = vand.u32 2147483647, %v1808_v45  ;;  %v1815_v19 = vmax.f32 %v1808_v45, 0.0  ;;  %v1884_v48 = vmul.f32 %v2540_v31, %v2540_v31 }
 0x8b5   :  { %v1855_v43 = vadd.f32 %v1836_v46, %v1813_v25  ;;  %v1842_v57 = vmul.f32 %v2060_v39, %v1841_v47 }
 0x8b6   :  { %v1821_v49 = vsub.f32 0.0, %v1818_v14 }
 0x8b7   :  { %v1858_v50 = vmul.f32 0.9, %v1855_v43 }
 0x8b8   :  { %v1826_v53 = vmul.f32 1.442695, %v1821_v49  ;;  %v1000_v49 = vpop.xlane.xlu0 %999 }
 0x8b9   :  { %v2064_v54 = vpop.eup %2063  ;;  %v1861_v55 = vadd.f32 0.1, %v1858_v50 }
 0x8ba   :  { %v1839_v56 = vmul.f32 0.6931472, %v2064_v54  ;;  %2065 = vpow2.f32 %v1826_v53  ;;  %v1004_v53 = vpop.xlane.xlu2 %1003 }
 0x8bb   :  { %v1864_v59 = vmax.f32 %v1861_v55, -2.3025851 }
 0x8bc   :  { %v1845_v60 = vsel %vm1844_vm5, %v1842_v57, %v1839_v56 }
 0x8bd   :  { %v1856_v61 = vadd.f32 %v1845_v60, %v1814_v58  ;;  %v1867_v62 = vmin.f32 %v1864_v59, 1.609438 }
 0x8bf   :  { %v1859_v63 = vmul.f32 0.9, %v1856_v61  ;;  %v1870_v0 = vmul.f32 1.442695, %v1867_v62  ;;  %v1876_v23 = vsub.f32 1.2819356, %v1867_v62 }
 0x8c0   :  { %v2066_v1 = vpop.eup %2065  ;;  %v1002_v50 = vpop.xlane.xlu0 %1001 }
 0x8c1   :  { %v1862_v3 = vadd.f32 0.1, %v1859_v63  ;;  %v1846_v5 = vadd.f32 1.0, %v2066_v1  ;;  %v1849_v6 = vmul.f32 -0.5, %v2066_v1  ;;  %2067 = vpow2.f32 %v1870_v0 }
 0x8c2   :  { %v1852_v11 = vand.u32 2147483647, %v2066_v1  ;;  %v1005_v51 = vadd.f32 %v1002_v50, %v1000_v49 }
 0x8c3   :  { %2069 = vlog2.f32 %v1846_v5  ;;  %v1865_v7 = vmax.f32 %v1862_v3, -2.3025851  ;;  %v1850_v10 = vadd.f32 1.0, %v1849_v6 }
 0x8c4   :  { %vm1853_vm6 = vcmp.lt.f32.partialorder %v1852_v11, 0.0004427343  ;;  %v1006_v55 = vadd.f32 %v1005_v51, %v1004_v53 }
 0x8c5   :  { %v1868_v9 = vmin.f32 %v1865_v7, 1.609438  ;;  %v1851_v18 = vmul.f32 %v2066_v1, %v1850_v10 }
 0x8c6   :  { %v1007_v56 = vrot.slane %v1006_v55, 4 }
 0x8c7   :  { %v1872_v12 = vmul.f32 1.442695, %v1868_v9  ;;  %v2068_v13 = vpop.eup %2067  ;;  %v1877_v36 = vsub.f32 1.2819356, %v1868_v9 }
 0x8c8   :  { %v1879_v16 = vmul.f32 %v2068_v13, %v2068_v13  ;;  %v1008_v57 = vadd.f32 %v1007_v56, %v1006_v55 }
 0x8c9   :  { %v2070_v33 = vpop.eup %2069  ;;  %2071 = vpow2.f32 %v1872_v12 }
 0x8ca   :  { %v1848_v17 = vmul.f32 0.6931472, %v2070_v33  ;;  %v1885_v52 = vadd.f32 %v1882_v15, %v1879_v16  ;;  %v1009_v31 = vrot.slane %v1008_v57, 2 }
 0x8cc   :  { %v1854_v21 = vsel %vm1853_vm6, %v1851_v18, %v1848_v17  ;;  %v1888_v24 = vmul.f32 0.038503036, %v1885_v52  ;;  %v1010_v62 = vadd.f32 %v1009_v31, %v1008_v57 }
 0x8cd   :  { %v1857_v22 = vadd.f32 %v1854_v21, %v1815_v19 }
 0x8ce   :  { %v1891_v2 = vadd.f32 %v1888_v24, %v1876_v23  ;;  %v1011_v1 = vrot.slane %v1010_v62, 1 }
 0x8cf   :  { %v2072_v35 = vpop.eup %2071  ;;  %v1860_v27 = vmul.f32 0.9, %v1857_v22 }
 0x8d0   :  { %v1880_v29 = vmul.f32 %v2072_v35, %v2072_v35  ;;  %v1989_v8 = vadd.f32 -0.5, %v1891_v2  ;;  %v1012_v5 = vadd.f32 %v1011_v1, %v1010_v62 }
 0x8d1   :  { %v1863_v30 = vadd.f32 0.1, %v1860_v27 }
 0x8d2   :  { %v1886_v32 = vadd.f32 %v1883_v28, %v1880_v29  ;;  %v1903_v4 = vsel %vm992_vm3, %v1989_v8, 0.0  ;;  %v1013_v9 = vmul.f32 0.0625, %v1012_v5 }
 0x8d3   :  { %v1866_v34 = vmax.f32 %v1863_v30, -2.3025851  ;;  %1906 = vadd.xlane.f32.xlu1 %v1903_v4 }
 0x8d4   :  { %v1889_v38 = vmul.f32 0.038503036, %v1886_v32 }
 0x8d5   :  { %v1869_v39 = vmin.f32 %v1866_v34, 1.609438 }
 0x8d6   :  { %v1892_v37 = vadd.f32 %v1889_v38, %v1877_v36 }
 0x8d7   :  { %v1874_v40 = vmul.f32 1.442695, %v1869_v39  ;;  %v1878_v25 = vsub.f32 1.2819356, %v1869_v39 }
 0x8d8   :  { %v1990_v41 = vadd.f32 -0.5, %v1892_v37 }
 0x8d9   :  { %2073 = vpow2.f32 %v1874_v40 }
 0x8da   :  { %v1904_v42 = vsel %vm992_vm3, %v1990_v41, 0.0 }
 0x8db   :  { %1908 = vadd.xlane.f32.xlu1 %v1904_v42 }
 0x8df   :  { %v2074_v20 = vpop.eup %2073 }
 0x8e0   :  { %v1881_v44 = vmul.f32 %v2074_v20, %v2074_v20 }
 0x8e2   :  { %v1887_v45 = vadd.f32 %v1884_v48, %v1881_v44 }
 0x8e4   :  { %v1890_v46 = vmul.f32 0.038503036, %v1887_v45 }
 0x8e6   :  { %v1893_v14 = vadd.f32 %v1890_v46, %v1878_v25 }
 0x8e8   :  { %v1991_v43 = vadd.f32 -0.5, %v1893_v14 }
 0x8ea   :  { %v1905_v47 = vsel %vm992_vm3, %v1991_v43, 0.0  ;;  %vm1922_vm3 = vcmask 0  }
 0x8eb   :  { %1910 = vadd.xlane.f32.xlu2 %v1905_v47 }
 0x946   :  { %v1907_v54 = vpop.xlane.xlu1 %1906 }
 0x94e   :  { %v1909_v58 = vpop.xlane.xlu1 %1908 }
 0x94f   :  { %v1912_v59 = vadd.f32 %v1909_v58, %v1907_v54 }
 0x95e   :  { %v1911_v60 = vpop.xlane.xlu2 %1910 }
 0x95f   :  { %v1913_v61 = vadd.f32 %v1912_v59, %v1911_v60 }
 0x961   :  { %v1914_v63 = vrot.slane %v1913_v61, 4 }
 0x963   :  { %v1915_v0 = vadd.f32 %v1914_v63, %v1913_v61 }
 0x965   :  { %v1916_v26 = vrot.slane %v1915_v0, 2 }
 0x967   :  { %v1917_v3 = vadd.f32 %v1916_v26, %v1915_v0 }
 0x969   :  { %v1918_v6 = vrot.slane %v1917_v3, 1 }
 0x96b   :  { %v1919_v7 = vadd.f32 %v1918_v6, %v1917_v3 }
 0x96d   :  { %v1920_v10 = vmul.f32 0.041666668, %v1919_v7 }
 0x96f   :  { %v1921_v11 = vadd.f32 %v1920_v10, %v1013_v9 }
 0x971   :  { %1923 = vst.msk [vmem:[#allocation11] sm:$0x1] %vm1922_vm3, %v1921_v11 }
 0x972   :  { %1936 = dma.vmem_to_hbm [thread:$0]  %s1932_s21, 16, %s1934_s23, [#allocation4]  }
 0x973   :  { %2228 = dma.done.wait [#allocation4], 16  }
 0x974   :  { %2229 = vsyncadd [#allocation4], 4294967280 }
 0x975   :  { %1943 = vsyncpa [#allocation3], 1 }
 0x976   :  { %1944 = vsyncpa [#allocation6], 1 }
 0x977   :  { %1945 = vsyncpa [#allocation9], 1 }
 0x978   :  { %1946 = vsyncpa [#allocation4], 1 }

</bundles_post_ra>
